<compile_context>
chip_gen: v7x
topology: tpu7x:2x2x1
jax: 0.10.0
libtpu: 0.0.40
codegen_flags: <defaults>
</compile_context>

<pallas_src>
import functools
import math
import numpy as np
import jax
import jax.numpy as jnp
from jax.experimental import pallas as pl
from jax.experimental.pallas import tpu as pltpu


def _round_up(x, m):
    return ((x + m - 1) // m) * m


def _pad_rows(m):
    # Pad the (small) row count only to the next multiple of 16 (bf16 sublane
    # packing), not 128 -- avoids wasting MXU passes / LHS DMA on zeros.
    return _round_up(max(m, 16), 16) if m <= 256 else _round_up(m, 256)


# ----------------------------------------------------------------------------
# Pallas kernels
# ----------------------------------------------------------------------------
def _matmul_kernel(a_ref, b_ref, o_ref):
    # Single-shot MXU matmul: the whole K dimension is one block, so there is
    # no reduction grid axis, no accumulator scratch and no pl.when phasing.
    o_ref[...] = jnp.dot(a_ref[...], b_ref[...],
                         preferred_element_type=jnp.float32).astype(o_ref.dtype)


def _small_matmul(a, b):
    """C = A @ B for a small-M, small-K problem.

    A: (Mp, K) bf16, B: (K, Np) bf16 constant (pre-padded).  The N axis is
    split into exactly 2 'parallel' tiles (>=256 lanes when Np >= 512) so both
    v7x TensorCores get work and the 256-lane MXU on v6e/v7x is filled.
    """
    Mp, K = a.shape
    Kb, Np = b.shape
    assert K == Kb
    tm = Mp if Mp <= 256 else 256
    assert Mp % tm == 0
    tn = Np // 2 if (Np // 2) % 128 == 0 and Np // 2 >= 128 else 128
    assert Np % tn == 0
    return pl.pallas_call(
        _matmul_kernel,
        out_shape=jax.ShapeDtypeStruct((Mp, Np), jnp.float32),
        grid_spec=pltpu.PrefetchScalarGridSpec(
            num_scalar_prefetch=0,
            grid=(Mp // tm, Np // tn),
            in_specs=[pl.BlockSpec((tm, K), lambda i, j: (i, 0)),
                      pl.BlockSpec((K, tn), lambda i, j: (0, j))],
            out_specs=pl.BlockSpec((tm, tn), lambda i, j: (i, j)),
        ),
        compiler_params=pltpu.CompilerParams(
            dimension_semantics=("parallel", "parallel"),
            vmem_limit_bytes=32 * 1024 * 1024),
    )(a, b)


def _band_resample_kernel(g_ref, k_ref, o_ref):
    # out[m, j] = sum_d g[m, d, j] * k[0, d, j].  taps (~15) is the sublane
    # axis, so the VPU does the multiply and the XLU does the sublane reduce.
    o_ref[...] = jnp.sum(g_ref[...] * k_ref[...], axis=1)


def _band_resample_pallas(g, k):
    """Banded sinc resample: g (Mp, taps, Np) f32, k (1, taps, Np) f32."""
    Mp, taps, Np = g.shape
    tm = Mp if Mp <= 128 else 128
    assert Mp % tm == 0
    # >=2 lane tiles (both v7x TensorCores work in parallel) but bound each g
    # block to ~6 MiB so double-buffered inputs + output stay well under the
    # 32 MiB scoped-VMEM limit on every generation (v5e default is 16 MiB).
    cands = [t for t in range(Np // 2, 127, -128) if Np % t == 0]
    tn = next((t for t in cands if tm * taps * t * 4 <= (6 << 20)), 128)
    assert Np % tn == 0 and tn % 128 == 0
    return pl.pallas_call(
        _band_resample_kernel,
        out_shape=jax.ShapeDtypeStruct((Mp, Np), jnp.float32),
        grid_spec=pltpu.PrefetchScalarGridSpec(
            num_scalar_prefetch=0,
            grid=(Mp // tm, Np // tn),
            in_specs=[pl.BlockSpec((tm, taps, tn), lambda i, j: (i, 0, j)),
                      pl.BlockSpec((1, taps, tn), lambda i, j: (0, 0, j))],
            out_specs=pl.BlockSpec((tm, tn), lambda i, j: (i, j)),
        ),
        compiler_params=pltpu.CompilerParams(
            dimension_semantics=("parallel", "parallel"),
            vmem_limit_bytes=32 * 1024 * 1024),
    )(g, k)


# ----------------------------------------------------------------------------
# Host-side constant construction (cached, pre-padded, bf16 where MXU-bound)
# ----------------------------------------------------------------------------
def _hann_window(n):
    i = np.arange(n)
    return (0.5 - 0.5 * np.cos(2.0 * np.pi * i / n)).astype(np.float32)


def _stft_matrix(n_fft, window):
    # X = (frames * window) @ (cos - i sin);  window folded into the matrix.
    n_freq = n_fft // 2 + 1
    n = np.arange(n_fft, dtype=np.float64)[:, None]
    k = np.arange(n_freq, dtype=np.float64)[None, :]
    ang = 2.0 * np.pi * n * k / n_fft
    m = np.concatenate([np.cos(ang), -np.sin(ang)], axis=1)
    m = m * window.astype(np.float64)[:, None]
    return m.astype(np.float32)                      # (n_fft, 2*n_freq)


def _istft_matrix(n_fft, window):
    # Onesided inverse real DFT, with the synthesis window folded in.
    n_freq = n_fft // 2 + 1
    k = np.arange(n_freq, dtype=np.float64)[:, None]
    n = np.arange(n_fft, dtype=np.float64)[None, :]
    ang = 2.0 * np.pi * k * n / n_fft
    coeff = np.full((n_freq, 1), 2.0)
    coeff[0, 0] = 1.0
    coeff[-1, 0] = 1.0
    a = coeff * np.cos(ang) / n_fft                  # multiplies real part
    b = -coeff * np.sin(ang) / n_fft                 # multiplies imag part
    m = np.concatenate([a, b], axis=0) * window.astype(np.float64)[None, :]
    return m.astype(np.float32)                      # (2*n_freq, n_fft)


@functools.lru_cache(maxsize=None)
def _get_stft_consts(n_fft, win_length):
    """Pre-padded bf16 DFT/IDFT matrices (2*n_freq padded to a multiple of 256
    so _small_matmul gets exactly 2 N tiles) + the float32 analysis window.
    bf16 halves HBM traffic and keeps the MXU on its native path; accumulation
    stays float32 (acceptable drift for an augmentation layer)."""
    window = _hann_window(win_length)
    n_freq = n_fft // 2 + 1
    np_pad = _round_up(2 * n_freq, 256)
    stft = np.zeros((n_fft, np_pad), np.float32)
    stft[:, :2 * n_freq] = _stft_matrix(n_fft, window)
    istft = np.zeros((np_pad, n_fft), np.float32)
    istft[:2 * n_freq, :] = _istft_matrix(n_fft, window)
    return (jnp.asarray(stft, jnp.bfloat16),
            jnp.asarray(istft, jnp.bfloat16),
            window)


def _band_sinc_kernel(orig_freq, new_freq, lowpass_filter_width=6, rolloff=0.99):
    """Banded form of torchaudio's sinc resample kernel.

    The dense (new, 2*width + orig) kernel is exactly zero outside a band of
    2*width + 1 taps per output phase (the hann lowpass window is clipped to
    zero beyond +-lowpass_filter_width), so only that band is built, together
    with the per-phase starting column c0(j) = floor(j * orig / new).
    """
    gcd = math.gcd(int(orig_freq), int(new_freq))
    orig = int(orig_freq) // gcd
    new = int(new_freq) // gcd
    base_freq = min(orig, new) * rolloff
    width = math.ceil(lowpass_filter_width * orig / base_freq)
    taps = 2 * width + 1
    j = np.arange(new, dtype=np.float64)[:, None]
    c0 = np.floor(j * orig / new).astype(np.int64)   # (new, 1) band start cols
    d = np.arange(taps, dtype=np.float64)[None, :]
    t = ((c0 + d - width) / orig - j / new) * base_freq
    t = np.clip(t, -lowpass_filter_width, lowpass_filter_width)
    win = np.cos(t * np.pi / lowpass_filter_width / 2.0) ** 2    # sinc_interp_hann
    t = t * np.pi
    scale = base_freq / orig
    kern = np.where(t == 0.0, 1.0, np.sin(t) / np.where(t == 0.0, 1.0, t))
    kern = (kern * win * scale).astype(np.float32)               # (new, taps)
    return kern, c0[:, 0], width, taps, orig, new


@functools.lru_cache(maxsize=None)
def _get_resample_consts(orig_freq, new_freq):
    kern, c0, width, taps, orig, new = _band_sinc_kernel(orig_freq, new_freq)
    np_pad = _round_up(new, 256)
    k = np.zeros((1, taps, np_pad), np.float32)
    k[0, :, :new] = kern.T
    return jnp.asarray(k), c0, width, taps, orig, new, np_pad


# ----------------------------------------------------------------------------
# Pipeline stages
# ----------------------------------------------------------------------------
def _phase_vocoder(real, imag, rate, hop_length):
    # real/imag: (B, T, freq) -> stretched (B, ceil(T/rate), freq).
    # Time axis = 1 so freq (257) stays on the lane axis (high vreg occupancy,
    # no transposes before/after the STFT / ISTFT matmuls).
    _, T, n_freq = real.shape
    time_steps = np.arange(0, T, rate, dtype=np.float64)
    alphas = jnp.asarray((time_steps % 1.0).astype(np.float32))[None, :, None]
    phase_adv = jnp.asarray(
        np.linspace(0.0, np.pi * hop_length, n_freq).astype(np.float32))[None, None, :]
    phase_0 = jnp.arctan2(imag[:, :1, :], real[:, :1, :])
    realp = jnp.pad(real, ((0, 0), (0, 2), (0, 0)))
    imagp = jnp.pad(imag, ((0, 0), (0, 2), (0, 0)))
    idx0 = time_steps.astype(np.int64)
    idx1 = idx0 + 1
    r0, i0 = realp[:, idx0, :], imagp[:, idx0, :]
    r1, i1 = realp[:, idx1, :], imagp[:, idx1, :]
    angle_0 = jnp.arctan2(i0, r0)
    angle_1 = jnp.arctan2(i1, r1)
    norm_0 = jnp.sqrt(r0 * r0 + i0 * i0)
    norm_1 = jnp.sqrt(r1 * r1 + i1 * i1)
    phase = angle_1 - angle_0 - phase_adv
    phase = phase - 2.0 * np.pi * jnp.round(phase / (2.0 * np.pi))
    phase = phase + phase_adv
    phase = jnp.concatenate([phase_0, phase[:, :-1, :]], axis=1)
    phase_acc = jnp.cumsum(phase, axis=1)
    mag = alphas * norm_1 + (1.0 - alphas) * norm_0
    return mag * jnp.cos(phase_acc), mag * jnp.sin(phase_acc)


def _resample(waveform, orig_freq, new_freq):
    """Banded sinc resample: ~taps (<= 2*width+1) multiply-adds per output
    sample instead of a dense (B*n_pos, ~4300) x (~4300, ~4000) matmul.  The
    gathered-taps tensor is built directly in (M, taps, new) order (no 4-D
    transpose / extra HBM round trip)."""
    k, c0, width, taps, orig, new, np_pad = _get_resample_consts(
        int(orig_freq), int(new_freq))
    B, L = waveform.shape
    padded = jnp.pad(waveform, ((0, 0), (width, width + orig)))
    n_pos = L // orig + 1
    M = B * n_pos
    Mp = _round_up(M, 8) if M <= 128 else _round_up(M, 128)
    # Gather the taps for every (block-position, tap, phase): (n_pos, taps, new)
    gidx = (np.arange(n_pos)[:, None, None] * orig
            + np.arange(taps)[None, :, None]
            + c0[None, None, :])
    g = padded[:, gidx]                                   # (B, n_pos, taps, new)
    g = g.reshape(M, taps, new)                           # no transpose needed
    g = jnp.pad(g, ((0, Mp - M), (0, 0), (0, np_pad - new)))
    out = _band_resample_pallas(g, k)                     # (Mp, np_pad) f32
    out = out[:M, :new].reshape(B, n_pos * new)
    target_length = int(math.ceil(new * L / orig))
    return out[:, :target_length]


@functools.partial(jax.jit, static_argnums=(1, 2, 3, 4, 5, 6))
def psm_pitch_shift(rec_audio, sample_rate, n_steps, bins_per_octave=12,
                    n_fft=512, hop_length=None, win_length=None):
    if hop_length is None:
        hop_length = n_fft // 4
    if win_length is None:
        win_length = n_fft
    rec_audio = jnp.asarray(rec_audio, jnp.float32)
    B, ori_len = rec_audio.shape
    stft_mat, istft_mat, window = _get_stft_consts(n_fft, win_length)
    rate = 2.0 ** (-float(n_steps) / bins_per_octave)
    n_freq = n_fft // 2 + 1

    # --- framing (center=True, reflect pad); no gather: n_fft/hop shifted
    #     slices of the non-overlapping (n_chunks, hop) view, concatenated ---
    padded = jnp.pad(rec_audio, ((0, 0), (n_fft // 2, n_fft // 2)), mode="reflect")
    P = padded.shape[1]
    n_frames = 1 + (P - n_fft) // hop_length
    if n_fft % hop_length == 0:
        ratio = n_fft // hop_length
        P_pad = _round_up(P, hop_length)
        chunks = jnp.pad(padded, ((0, 0), (0, P_pad - P))).reshape(
            B, P_pad // hop_length, hop_length)
        frames = jnp.concatenate(
            [chunks[:, c:c + n_frames, :] for c in range(ratio)], axis=-1)
    else:  # generic fallback (not hit with the module's defaults)
        fidx = np.arange(n_frames)[:, None] * hop_length + np.arange(n_fft)[None, :]
        frames = padded[:, fidx]
    frames = frames.reshape(B * n_frames, n_fft)

    # --- STFT as one single-K-block Pallas MXU matmul ---
    M = B * n_frames
    Mp = _pad_rows(M)
    frames = jnp.pad(frames, ((0, Mp - M), (0, 0))).astype(jnp.bfloat16)
    spec = _small_matmul(frames, stft_mat)                 # (Mp, 768) f32
    spec = spec[:M, :2 * n_freq].reshape(B, n_frames, 2 * n_freq)
    real = spec[..., :n_freq]                              # (B, F, freq)
    imag = spec[..., n_freq:]

    # --- phase-vocoder time stretch (elementwise + cumsum glue, lane-dense) ---
    s_real, s_imag = _phase_vocoder(real, imag, rate, hop_length)
    n_frames_s = s_real.shape[1]

    # --- ISTFT as one single-K-block Pallas matmul + dense overlap-add ---
    len_stretch = int(round(ori_len / rate))
    spec_cat = jnp.concatenate([s_real, s_imag], axis=-1)  # (B, Fs, 2*freq)
    spec_cat = spec_cat.reshape(B * n_frames_s, 2 * n_freq)
    M2 = B * n_frames_s
    Mp2 = _pad_rows(M2)
    Kp = istft_mat.shape[0]                                # 768 (pre-padded K)
    spec_cat = jnp.pad(spec_cat,
                       ((0, Mp2 - M2), (0, Kp - 2 * n_freq))).astype(jnp.bfloat16)
    time_frames = _small_matmul(spec_cat, istft_mat)[:M2]  # (M2, n_fft) f32
    time_frames = time_frames.reshape(B, n_frames_s, n_fft)

    expected_len = n_fft + hop_length * (n_frames_s - 1)
    if n_fft % hop_length == 0:
        # Overlap-add as n_fft/hop dense shifted adds (no scatter HLO).
        ratio = n_fft // hop_length
        ola = jnp.zeros((B, expected_len), jnp.float32)
        for c in range(ratio):
            slab = time_frames[:, :, c * hop_length:(c + 1) * hop_length]
            slab = slab.reshape(B, n_frames_s * hop_length)
            ola = ola + jnp.pad(
                slab, ((0, 0), (c * hop_length,
                                expected_len - (c + n_frames_s) * hop_length)))
    else:  # generic fallback
        oidx = (np.arange(n_frames_s)[:, None] * hop_length
                + np.arange(n_fft)[None, :]).reshape(-1)
        ola = jnp.zeros((B, expected_len), jnp.float32)
        ola = ola.at[:, oidx].add(time_frames.reshape(B, -1))

    env = np.zeros(expected_len, np.float64)
    w2 = window.astype(np.float64) ** 2
    for f in range(n_frames_s):
        env[f * hop_length:f * hop_length + n_fft] += w2
    env = np.maximum(env, 1e-10)          # tail guard (torchaudio-style floor)
    start = n_fft // 2
    end = min(start + len_stretch, expected_len)
    inv_env = jnp.asarray((1.0 / env[start:end]).astype(np.float32))
    wav = ola[:, start:end] * inv_env[None, :]
    if wav.shape[1] < len_stretch:
        wav = jnp.pad(wav, ((0, 0), (0, len_stretch - wav.shape[1])))

    # --- resample back to sample_rate (banded sinc conv in a Pallas kernel) ---
    wav = _resample(wav, int(sample_rate / rate), sample_rate)

    # --- fix length to the original length ---
    shift_len = wav.shape[1]
    if shift_len > ori_len:
        wav = wav[:, :ori_len]
    else:
        wav = jnp.pad(wav, ((0, 0), (0, ori_len - shift_len)))
    return wav


# ----------------------------------------------------------------------------
# PSM module equivalent
# ----------------------------------------------------------------------------
class PSM:
    def __init__(self, rate=(0.9, 1.1), test=None):
        self.sample_rate = 16000
        self.rate = list(rate)
        self.test = test

    def __call__(self, rec_audio):
        if self.test is None:
            # TODO(synk): the PyTorch module samples the rate unseeded each call;
            # numpy is seeded in __main__ for deterministic behavior here.
            rate = float(np.random.choice(self.rate, 1)[0])
        else:
            rate = self.test
            print(f'testing ps:{rate}')
        return psm_pitch_shift(rec_audio, self.sample_rate, 12.0 * (rate - 1.0))


if __name__ == "__main__":
    np.random.seed(0)                       # deterministic rate choice
    key = jax.random.PRNGKey(0)
    B, T = 2, 2048                          # small batch of mono audio clips
    rec_audio = 0.1 * jax.random.normal(key, (B, T), dtype=jnp.float32)

    psm = PSM()
    out = psm(rec_audio)
    out = jax.block_until_ready(out)
    assert out.shape == (B, T) and out.dtype == jnp.float32
    assert bool(jnp.all(jnp.isfinite(out)))
    print("KERNEL_OK")
</pallas_src>

<mosaic_0001>
module attributes {stable_mosaic.version = 11 : i64} {
  func.func @_matmul_kernel(%arg0: i32, %arg1: i32, %arg2: memref<48x512xbf16, #tpu.memory_space<vmem>>, %arg3: memref<512x384xbf16, #tpu.memory_space<vmem>>, %arg4: memref<48x384xf32, #tpu.memory_space<vmem>>) attributes {dimension_semantics = [#tpu.dimension_semantics<parallel>, #tpu.dimension_semantics<parallel>], iteration_bounds = array<i64: 1, 2>, scalar_prefetch = 0 : i64, scratch_operands = 0 : i64, tpu.core_type = #tpu.core_type<tc>, window_params = [{transform_indices = @transform_0, window_bounds = array<i64: 48, 512>}, {transform_indices = @transform_1, window_bounds = array<i64: 512, 384>}, {transform_indices = @transform_2, window_bounds = array<i64: 48, 384>}]} {
    %c0 = arith.constant 0 : index
    %c0_0 = arith.constant 0 : index
    %0 = vector.load %arg2[%c0, %c0_0] : memref<48x512xbf16, #tpu.memory_space<vmem>>, vector<48x512xbf16>
    %c0_1 = arith.constant 0 : index
    %c0_2 = arith.constant 0 : index
    %1 = vector.load %arg3[%c0_1, %c0_2] : memref<512x384xbf16, #tpu.memory_space<vmem>>, vector<512x384xbf16>
    %cst = arith.constant dense<0.000000e+00> : vector<48x384xf32>
    %2 = tpu.matmul %0, %1, %cst {dimension_numbers = #tpu.dot_dimension_numbers<[1], [0], [0], [1], [0, 0, 1, 1], [], []>} : vector<48x512xbf16>, vector<512x384xbf16>, vector<48x384xf32> -> vector<48x384xf32>
    %c0_3 = arith.constant 0 : index
    %c0_4 = arith.constant 0 : index
    %3 = vector.load %arg4[%c0_3, %c0_4] : memref<48x384xf32, #tpu.memory_space<vmem>>, vector<48x384xf32>
    tpu.vector_store %arg4[%c0_3, %c0_4], %2 {strides = array<i32>} : memref<48x384xf32, #tpu.memory_space<vmem>>, vector<48x384xf32>,
    return
  }
  func.func @transform_0(%arg0: i32, %arg1: i32) -> (i32, i32) {
    %c0_i32 = arith.constant 0 : i32
    %c0_i32_0 = arith.constant 0 : i32
    return %arg0, %c0_i32 : i32, i32
  }
  func.func @transform_1(%arg0: i32, %arg1: i32) -> (i32, i32) {
    %c0_i32 = arith.constant 0 : i32
    %c0_i32_0 = arith.constant 0 : i32
    return %c0_i32, %arg1 : i32, i32
  }
  func.func @transform_2(%arg0: i32, %arg1: i32) -> (i32, i32) {
    %c0_i32 = arith.constant 0 : i32
    return %arg0, %arg1 : i32, i32
  }
}

module attributes {stable_mosaic.version = 11 : i64} {
  func.func @_matmul_kernel(%arg0: i32, %arg1: i32, %arg2: memref<32x768xbf16, #tpu.memory_space<vmem>>, %arg3: memref<768x256xbf16, #tpu.memory_space<vmem>>, %arg4: memref<32x256xf32, #tpu.memory_space<vmem>>) attributes {dimension_semantics = [#tpu.dimension_semantics<parallel>, #tpu.dimension_semantics<parallel>], iteration_bounds = array<i64: 1, 2>, scalar_prefetch = 0 : i64, scratch_operands = 0 : i64, tpu.core_type = #tpu.core_type<tc>, window_params = [{transform_indices = @transform_0, window_bounds = array<i64: 32, 768>}, {transform_indices = @transform_1, window_bounds = array<i64: 768, 256>}, {transform_indices = @transform_2, window_bounds = array<i64: 32, 256>}]} {
    %c0 = arith.constant 0 : index
    %c0_0 = arith.constant 0 : index
    %0 = vector.load %arg2[%c0, %c0_0] : memref<32x768xbf16, #tpu.memory_space<vmem>>, vector<32x768xbf16>
    %c0_1 = arith.constant 0 : index
    %c0_2 = arith.constant 0 : index
    %1 = vector.load %arg3[%c0_1, %c0_2] : memref<768x256xbf16, #tpu.memory_space<vmem>>, vector<768x256xbf16>
    %cst = arith.constant dense<0.000000e+00> : vector<32x256xf32>
    %2 = tpu.matmul %0, %1, %cst {dimension_numbers = #tpu.dot_dimension_numbers<[1], [0], [0], [1], [0, 0, 1, 1], [], []>} : vector<32x768xbf16>, vector<768x256xbf16>, vector<32x256xf32> -> vector<32x256xf32>
    %c0_3 = arith.constant 0 : index
    %c0_4 = arith.constant 0 : index
    %3 = vector.load %arg4[%c0_3, %c0_4] : memref<32x256xf32, #tpu.memory_space<vmem>>, vector<32x256xf32>
    tpu.vector_store %arg4[%c0_3, %c0_4], %2 {strides = array<i32>} : memref<32x256xf32, #tpu.memory_space<vmem>>, vector<32x256xf32>,
    return
  }
  func.func @transform_0(%arg0: i32, %arg1: i32) -> (i32, i32) {
    %c0_i32 = arith.constant 0 : i32
    %c0_i32_0 = arith.constant 0 : i32
    return %arg0, %c0_i32 : i32, i32
  }
  func.func @transform_1(%arg0: i32, %arg1: i32) -> (i32, i32) {
    %c0_i32 = arith.constant 0 : i32
    %c0_i32_0 = arith.constant 0 : i32
    return %c0_i32, %arg1 : i32, i32
  }
  func.func @transform_2(%arg0: i32, %arg1: i32) -> (i32, i32) {
    %c0_i32 = arith.constant 0 : i32
    return %arg0, %arg1 : i32, i32
  }
}

module attributes {stable_mosaic.version = 11 : i64} {
  func.func @_band_resample_kernel(%arg0: i32, %arg1: i32, %arg2: memref<8x15x512xf32, #tpu.memory_space<vmem>>, %arg3: memref<1x15x512xf32, #tpu.memory_space<vmem>>, %arg4: memref<8x512xf32, #tpu.memory_space<vmem>>) attributes {dimension_semantics = [#tpu.dimension_semantics<parallel>, #tpu.dimension_semantics<parallel>], iteration_bounds = array<i64: 1, 2>, scalar_prefetch = 0 : i64, scratch_operands = 0 : i64, tpu.core_type = #tpu.core_type<tc>, window_params = [{transform_indices = @transform_0, window_bounds = array<i64: 8, 15, 512>}, {transform_indices = @transform_1, window_bounds = array<i64: 1, 15, 512>}, {transform_indices = @transform_2, window_bounds = array<i64: 8, 512>}]} {
    %c0 = arith.constant 0 : index
    %c0_0 = arith.constant 0 : index
    %c0_1 = arith.constant 0 : index
    %0 = vector.load %arg2[%c0, %c0_0, %c0_1] : memref<8x15x512xf32, #tpu.memory_space<vmem>>, vector<8x15x512xf32>
    %c0_2 = arith.constant 0 : index
    %c0_3 = arith.constant 0 : index
    %c0_4 = arith.constant 0 : index
    %1 = vector.load %arg3[%c0_2, %c0_3, %c0_4] : memref<1x15x512xf32, #tpu.memory_space<vmem>>, vector<1x15x512xf32>
    %2 = vector.broadcast %1 : vector<1x15x512xf32> to vector<8x15x512xf32>
    %3 = arith.mulf %0, %2 : vector<8x15x512xf32>
    %cst = arith.constant dense<0.000000e+00> : vector<8x512xf32>
    %4 = vector.multi_reduction <add>, %3, %cst [1] : vector<8x15x512xf32> to vector<8x512xf32>
    %c0_5 = arith.constant 0 : index
    %c0_6 = arith.constant 0 : index
    %5 = vector.load %arg4[%c0_5, %c0_6] : memref<8x512xf32, #tpu.memory_space<vmem>>, vector<8x512xf32>
    tpu.vector_store %arg4[%c0_5, %c0_6], %4 {strides = array<i32>} : memref<8x512xf32, #tpu.memory_space<vmem>>, vector<8x512xf32>,
    return
  }
  func.func @transform_0(%arg0: i32, %arg1: i32) -> (i32, i32, i32) {
    %c0_i32 = arith.constant 0 : i32
    %c0_i32_0 = arith.constant 0 : i32
    return %arg0, %c0_i32, %arg1 : i32, i32, i32
  }
  func.func @transform_1(%arg0: i32, %arg1: i32) -> (i32, i32, i32) {
    %c0_i32 = arith.constant 0 : i32
    %c0_i32_0 = arith.constant 0 : i32
    %c0_i32_1 = arith.constant 0 : i32
    return %c0_i32, %c0_i32_0, %arg1 : i32, i32, i32
  }
  func.func @transform_2(%arg0: i32, %arg1: i32) -> (i32, i32) {
    %c0_i32 = arith.constant 0 : i32
    return %arg0, %arg1 : i32, i32
  }
}

</mosaic_0001>

<bundles_post_ra>
// kernel: psm_pitch_shift.3
= control target key start
LH: loop header
LB: loop body
LE: loop exit
PB: predicated region body
PF: predicated region fallthrough
CT: control target
= control target key end

     0   :  { %s2157_s9 = smov 0   ;;  %s2159_s10 = smov 0   ;;  %s2689_s0 = inlined_call_operand.vmem [shape: bf16[48,512], index: 0, kind: input, shape index: {}]   ;;  %s2690_s1 = inlined_call_operand.vmem [shape: bf16[512,768], index: 1, kind: input, shape index: {}]   ;;  %s2691_s2 = inlined_call_operand.vmem [shape: f32[48,768], index: 2, kind: output, shape index: {}]  }
   0x1   :  { %s2161_s11 = smov 0   ;;  %s2163_s12 = smov 0  }
   0x2   :  { %s2165_s13 = smov 0  }
   0x3 LB: > { %s21_s14 = sadd.s32 1, %s2136_s12  ;;  %s1585_s15 = sadd.s32 4294967295, %s2140_s13   ;;  %s2140_s13 = sphi %s2165_s13, %s12_s13   ;;  %s2136_s12 = sphi %s2163_s12, %s2696_s12   ;;  %s2132_s11 = sphi %s2161_s11, %s2695_s11   ;;  %s2128_s10 = sphi %s2159_s10, %s2694_s10   ;;  %s2124_s9 = sphi %s2157_s9, %s2693_s9  }
   0x4   : > { %p22_p0 = scmp.ge.s32.totalorder %s21_s14, 2  ;;  %p64_p1 = scmp.ne.s32.totalorder %s2128_s10, %s2124_s9 }
   0x5   : > { %p65_p2 = scmp.eq.s32.totalorder %s2140_s13, 0  ;;  %p96_p4 = scmp.eq.s32.totalorder %s1585_s15, 1 }
   0x6   : > { %s2698_s14 = smov (%p22_p0, %s21_s14), 0  ;;  %s57_s17 = sadd.s32 1, %s2128_s10 }
   0x7   : > { %p66_p3 = por %p65_p2, %p64_p1  ;;  %s54_s16 = ssub.s32 %s2136_s12, %s2698_s14 }
   0x8   : > { %p55_p5 = scmp.eq.s32.totalorder %s54_s16, 0  ;;  %p2192_p6 = por %p96_p4, %p64_p1 }
   0x9   : > { %p1589_p7 = scmp.ge.s32.totalorder %s2140_s13, 2 }
   0xa   : > { %s2197_s19 = scalar_select %p55_p5, %s2128_s10, %s57_s17  }
   0xb   : > { %128 = sbr.rel (%p1589_p7) target bundleno = 97 (0x61), region = 20 }
  0x12   : > { %131 = sbr.rel (!%p66_p3) target bundleno = 97 (0x61), region = 24  ;;  %s133_s20 = sand.u32 (%p66_p3), 1, %s2128_s10  }
  0x13   : > { %s1831_s21 = smul.u32 (%p66_p3), 12, %s2136_s12 }
  0x14   : > { %s1913_s22 = smul.u32 (%p66_p3), 768, %s133_s20 }
  0x15   : > { %s2205_s25 = scalar_lea.vmem (%p66_p3), %s2690_s1, %s1831_s21 }
  0x16   : > { %v153_v0 = vld [vmem:[%s2205_s25] sm:$0xff] (%p66_p3)  ;;  %v155_v1 = vld [vmem:[%s2205_s25 + $0x18] sm:$0xff] (%p66_p3)  ;;  %v157_v2 = vld [vmem:[%s2205_s25 + $0x30] sm:$0xff] (%p66_p3)  ;;  %s2210_s26 = scalar_lea.vmem (%p66_p3), [#allocation2], %s1913_s22 }
  0x17   : > { %154 = vst [vmem:[%s2210_s26] sm:$0xff] (%p66_p3), %v153_v0  ;;  %156 = vst [vmem:[%s2210_s26 + $0xc] sm:$0xff] (%p66_p3), %v155_v1  ;;  %v159_v3 = vld [vmem:[%s2205_s25 + $0x48] sm:$0xff] (%p66_p3)  ;;  %v161_v4 = vld [vmem:[%s2205_s25 + $0x60] sm:$0xff] (%p66_p3) }
  0x18   : > { %158 = vst [vmem:[%s2210_s26 + $0x18] sm:$0xff] (%p66_p3), %v157_v2  ;;  %v163_v5 = vld [vmem:[%s2205_s25 + $0x78] sm:$0xff] (%p66_p3)  ;;  %160 = vst [vmem:[%s2210_s26 + $0x24] sm:$0xff] (%p66_p3), %v159_v3  ;;  %v165_v6 = vld [vmem:[%s2205_s25 + $0x90] sm:$0xff] (%p66_p3) }
  0x19   : > { %162 = vst [vmem:[%s2210_s26 + $0x30] sm:$0xff] %v161_v4  ;;  %164 = vst [vmem:[%s2210_s26 + $0x3c] sm:$0xff] %v163_v5  ;;  %v167_v7 = vld [vmem:[%s2205_s25 + $0xa8] sm:$0xff]  ;;  %v169_v8 = vld [vmem:[%s2205_s25 + $0xc0] sm:$0xff] }
  0x1a   : > { %166 = vst [vmem:[%s2210_s26 + $0x48] sm:$0xff] %v165_v6  ;;  %168 = vst [vmem:[%s2210_s26 + $0x54] sm:$0xff] %v167_v7  ;;  %v171_v9 = vld [vmem:[%s2205_s25 + $0xd8] sm:$0xff]  ;;  %v173_v10 = vld [vmem:[%s2205_s25 + $0xf0] sm:$0xff] }
  0x1b   : > { %170 = vst [vmem:[%s2210_s26 + $0x60] sm:$0xff] %v169_v8  ;;  %v175_v11 = vld [vmem:[%s2205_s25 + $0x108] sm:$0xff]  ;;  %172 = vst [vmem:[%s2210_s26 + $0x6c] sm:$0xff] %v171_v9  ;;  %v177_v12 = vld [vmem:[%s2205_s25 + $0x120] sm:$0xff] }
  0x1c   : > { %174 = vst [vmem:[%s2210_s26 + $0x78] sm:$0xff] %v173_v10  ;;  %176 = vst [vmem:[%s2210_s26 + $0x84] sm:$0xff] %v175_v11  ;;  %v179_v13 = vld [vmem:[%s2205_s25 + $0x138] sm:$0xff]  ;;  %v181_v14 = vld [vmem:[%s2205_s25 + $0x150] sm:$0xff] }
  0x1d   : > { %178 = vst [vmem:[%s2210_s26 + $0x90] sm:$0xff] %v177_v12  ;;  %180 = vst [vmem:[%s2210_s26 + $0x9c] sm:$0xff] %v179_v13  ;;  %v183_v15 = vld [vmem:[%s2205_s25 + $0x168] sm:$0xff]  ;;  %v185_v16 = vld [vmem:[%s2205_s25 + $0x180] sm:$0xff] }
  0x1e   : > { %182 = vst [vmem:[%s2210_s26 + $0xa8] sm:$0xff] %v181_v14  ;;  %v187_v17 = vld [vmem:[%s2205_s25 + $0x198] sm:$0xff]  ;;  %184 = vst [vmem:[%s2210_s26 + $0xb4] sm:$0xff] %v183_v15  ;;  %v189_v18 = vld [vmem:[%s2205_s25 + $0x1b0] sm:$0xff] }
  0x1f   : > { %186 = vst [vmem:[%s2210_s26 + $0xc0] sm:$0xff] %v185_v16  ;;  %188 = vst [vmem:[%s2210_s26 + $0xcc] sm:$0xff] %v187_v17  ;;  %v191_v19 = vld [vmem:[%s2205_s25 + $0x1c8] sm:$0xff]  ;;  %v193_v20 = vld [vmem:[%s2205_s25 + $0x1e0] sm:$0xff] }
  0x20   : > { %190 = vst [vmem:[%s2210_s26 + $0xd8] sm:$0xff] %v189_v18  ;;  %192 = vst [vmem:[%s2210_s26 + $0xe4] sm:$0xff] %v191_v19  ;;  %v195_v21 = vld [vmem:[%s2205_s25 + $0x1f8] sm:$0xff]  ;;  %v197_v22 = vld [vmem:[%s2205_s25 + $0x210] sm:$0xff] }
  0x21   : > { %194 = vst [vmem:[%s2210_s26 + $0xf0] sm:$0xff] %v193_v20  ;;  %v199_v23 = vld [vmem:[%s2205_s25 + $0x228] sm:$0xff]  ;;  %196 = vst [vmem:[%s2210_s26 + $0xfc] sm:$0xff] %v195_v21  ;;  %v201_v24 = vld [vmem:[%s2205_s25 + $0x240] sm:$0xff] }
  0x22   : > { %198 = vst [vmem:[%s2210_s26 + $0x108] sm:$0xff] %v197_v22  ;;  %200 = vst [vmem:[%s2210_s26 + $0x114] sm:$0xff] %v199_v23  ;;  %v203_v25 = vld [vmem:[%s2205_s25 + $0x258] sm:$0xff]  ;;  %v205_v26 = vld [vmem:[%s2205_s25 + $0x270] sm:$0xff] }
  0x23   : > { %202 = vst [vmem:[%s2210_s26 + $0x120] sm:$0xff] %v201_v24  ;;  %204 = vst [vmem:[%s2210_s26 + $0x12c] sm:$0xff] %v203_v25  ;;  %v207_v27 = vld [vmem:[%s2205_s25 + $0x288] sm:$0xff]  ;;  %v209_v28 = vld [vmem:[%s2205_s25 + $0x2a0] sm:$0xff] }
  0x24   : > { %206 = vst [vmem:[%s2210_s26 + $0x138] sm:$0xff] %v205_v26  ;;  %v211_v29 = vld [vmem:[%s2205_s25 + $0x2b8] sm:$0xff]  ;;  %208 = vst [vmem:[%s2210_s26 + $0x144] sm:$0xff] %v207_v27  ;;  %v213_v30 = vld [vmem:[%s2205_s25 + $0x2d0] sm:$0xff] }
  0x25   : > { %210 = vst [vmem:[%s2210_s26 + $0x150] sm:$0xff] %v209_v28  ;;  %212 = vst [vmem:[%s2210_s26 + $0x15c] sm:$0xff] %v211_v29  ;;  %v215_v31 = vld [vmem:[%s2205_s25 + $0x2e8] sm:$0xff]  ;;  %v217_v32 = vld [vmem:[%s2205_s25 + $0x300] sm:$0xff] }
  0x26   : > { %214 = vst [vmem:[%s2210_s26 + $0x168] sm:$0xff] %v213_v30  ;;  %216 = vst [vmem:[%s2210_s26 + $0x174] sm:$0xff] %v215_v31  ;;  %v219_v33 = vld [vmem:[%s2205_s25 + $0x318] sm:$0xff]  ;;  %v221_v34 = vld [vmem:[%s2205_s25 + $0x330] sm:$0xff] }
  0x27   : > { %218 = vst [vmem:[%s2210_s26 + $0x180] sm:$0xff] %v217_v32  ;;  %v223_v35 = vld [vmem:[%s2205_s25 + $0x348] sm:$0xff]  ;;  %220 = vst [vmem:[%s2210_s26 + $0x18c] sm:$0xff] %v219_v33  ;;  %v225_v36 = vld [vmem:[%s2205_s25 + $0x360] sm:$0xff] }
  0x28   : > { %222 = vst [vmem:[%s2210_s26 + $0x198] sm:$0xff] %v221_v34  ;;  %224 = vst [vmem:[%s2210_s26 + $0x1a4] sm:$0xff] %v223_v35  ;;  %v227_v37 = vld [vmem:[%s2205_s25 + $0x378] sm:$0xff]  ;;  %v229_v38 = vld [vmem:[%s2205_s25 + $0x390] sm:$0xff] }
  0x29   : > { %226 = vst [vmem:[%s2210_s26 + $0x1b0] sm:$0xff] %v225_v36  ;;  %228 = vst [vmem:[%s2210_s26 + $0x1bc] sm:$0xff] %v227_v37  ;;  %v231_v39 = vld [vmem:[%s2205_s25 + $0x3a8] sm:$0xff]  ;;  %v233_v40 = vld [vmem:[%s2205_s25 + $0x3c0] sm:$0xff] }
  0x2a   : > { %230 = vst [vmem:[%s2210_s26 + $0x1c8] sm:$0xff] %v229_v38  ;;  %v235_v41 = vld [vmem:[%s2205_s25 + $0x3d8] sm:$0xff]  ;;  %232 = vst [vmem:[%s2210_s26 + $0x1d4] sm:$0xff] %v231_v39  ;;  %v237_v42 = vld [vmem:[%s2205_s25 + $0x3f0] sm:$0xff] }
  0x2b   : > { %234 = vst [vmem:[%s2210_s26 + $0x1e0] sm:$0xff] %v233_v40  ;;  %236 = vst [vmem:[%s2210_s26 + $0x1ec] sm:$0xff] %v235_v41  ;;  %v239_v43 = vld [vmem:[%s2205_s25 + $0x408] sm:$0xff]  ;;  %v241_v44 = vld [vmem:[%s2205_s25 + $0x420] sm:$0xff] }
  0x2c   : > { %238 = vst [vmem:[%s2210_s26 + $0x1f8] sm:$0xff] %v237_v42  ;;  %240 = vst [vmem:[%s2210_s26 + $0x204] sm:$0xff] %v239_v43  ;;  %v243_v45 = vld [vmem:[%s2205_s25 + $0x438] sm:$0xff]  ;;  %v245_v46 = vld [vmem:[%s2205_s25 + $0x450] sm:$0xff] }
  0x2d   : > { %242 = vst [vmem:[%s2210_s26 + $0x210] sm:$0xff] %v241_v44  ;;  %v247_v47 = vld [vmem:[%s2205_s25 + $0x468] sm:$0xff]  ;;  %244 = vst [vmem:[%s2210_s26 + $0x21c] sm:$0xff] %v243_v45  ;;  %v249_v48 = vld [vmem:[%s2205_s25 + $0x480] sm:$0xff] }
  0x2e   : > { %246 = vst [vmem:[%s2210_s26 + $0x228] sm:$0xff] %v245_v46  ;;  %248 = vst [vmem:[%s2210_s26 + $0x234] sm:$0xff] %v247_v47  ;;  %v251_v49 = vld [vmem:[%s2205_s25 + $0x498] sm:$0xff]  ;;  %v253_v50 = vld [vmem:[%s2205_s25 + $0x4b0] sm:$0xff] }
  0x2f   : > { %250 = vst [vmem:[%s2210_s26 + $0x240] sm:$0xff] %v249_v48  ;;  %252 = vst [vmem:[%s2210_s26 + $0x24c] sm:$0xff] %v251_v49  ;;  %v255_v51 = vld [vmem:[%s2205_s25 + $0x4c8] sm:$0xff]  ;;  %v257_v52 = vld [vmem:[%s2205_s25 + $0x4e0] sm:$0xff] }
  0x30   : > { %254 = vst [vmem:[%s2210_s26 + $0x258] sm:$0xff] %v253_v50  ;;  %v259_v53 = vld [vmem:[%s2205_s25 + $0x4f8] sm:$0xff]  ;;  %256 = vst [vmem:[%s2210_s26 + $0x264] sm:$0xff] %v255_v51  ;;  %v261_v54 = vld [vmem:[%s2205_s25 + $0x510] sm:$0xff] }
  0x31   : > { %258 = vst [vmem:[%s2210_s26 + $0x270] sm:$0xff] %v257_v52  ;;  %260 = vst [vmem:[%s2210_s26 + $0x27c] sm:$0xff] %v259_v53  ;;  %v263_v55 = vld [vmem:[%s2205_s25 + $0x528] sm:$0xff]  ;;  %v265_v56 = vld [vmem:[%s2205_s25 + $0x540] sm:$0xff] }
  0x32   : > { %262 = vst [vmem:[%s2210_s26 + $0x288] sm:$0xff] %v261_v54  ;;  %264 = vst [vmem:[%s2210_s26 + $0x294] sm:$0xff] %v263_v55  ;;  %v267_v57 = vld [vmem:[%s2205_s25 + $0x558] sm:$0xff]  ;;  %v269_v58 = vld [vmem:[%s2205_s25 + $0x570] sm:$0xff] }
  0x33   : > { %266 = vst [vmem:[%s2210_s26 + $0x2a0] sm:$0xff] %v265_v56  ;;  %v271_v59 = vld [vmem:[%s2205_s25 + $0x588] sm:$0xff]  ;;  %268 = vst [vmem:[%s2210_s26 + $0x2ac] sm:$0xff] %v267_v57  ;;  %v273_v60 = vld [vmem:[%s2205_s25 + $0x5a0] sm:$0xff] }
  0x34   : > { %270 = vst [vmem:[%s2210_s26 + $0x2b8] sm:$0xff] %v269_v58  ;;  %272 = vst [vmem:[%s2210_s26 + $0x2c4] sm:$0xff] %v271_v59  ;;  %v275_v61 = vld [vmem:[%s2205_s25 + $0x5b8] sm:$0xff]  ;;  %v277_v62 = vld [vmem:[%s2205_s25 + $0x5d0] sm:$0xff] }
  0x35   : > { %274 = vst [vmem:[%s2210_s26 + $0x2d0] sm:$0xff] %v273_v60  ;;  %276 = vst [vmem:[%s2210_s26 + $0x2dc] sm:$0xff] %v275_v61  ;;  %v279_v63 = vld [vmem:[%s2205_s25 + $0x5e8] sm:$0xff]  ;;  %v1593_v1 = vld [vmem:[%s2205_s25 + $0x20] sm:$0xf] }
  0x36   : > { %278 = vst [vmem:[%s2210_s26 + $0x2e8] sm:$0xff] %v277_v62  ;;  %v1591_v0 = vld [vmem:[%s2205_s25 + $0x8] sm:$0xf]  ;;  %280 = vst [vmem:[%s2210_s26 + $0x2f4] sm:$0xff] %v279_v63  ;;  %v1595_v2 = vld [vmem:[%s2205_s25 + $0x38] sm:$0xf] }
  0x37   : > { %1592 = vst [vmem:[%s2210_s26 + $0x8] sm:$0xf] %v1591_v0  ;;  %1594 = vst [vmem:[%s2210_s26 + $0x14] sm:$0xf] %v1593_v1  ;;  %v1597_v3 = vld [vmem:[%s2205_s25 + $0x50] sm:$0xf] }
  0x38   : > { %v1599_v4 = vld [vmem:[%s2205_s25 + $0x68] sm:$0xf]  ;;  %1596 = vst [vmem:[%s2210_s26 + $0x20] sm:$0xf] %v1595_v2  ;;  %1598 = vst [vmem:[%s2210_s26 + $0x2c] sm:$0xf] %v1597_v3 }
  0x39   : > { %1600 = vst [vmem:[%s2210_s26 + $0x38] sm:$0xf] %v1599_v4  ;;  %v1601_v5 = vld [vmem:[%s2205_s25 + $0x80] sm:$0xf]  ;;  %v1603_v6 = vld [vmem:[%s2205_s25 + $0x98] sm:$0xf] }
  0x3a   : > { %v1605_v7 = vld [vmem:[%s2205_s25 + $0xb0] sm:$0xf]  ;;  %1602 = vst [vmem:[%s2210_s26 + $0x44] sm:$0xf] %v1601_v5  ;;  %1604 = vst [vmem:[%s2210_s26 + $0x50] sm:$0xf] %v1603_v6 }
  0x3b   : > { %1606 = vst [vmem:[%s2210_s26 + $0x5c] sm:$0xf] %v1605_v7  ;;  %v1607_v8 = vld [vmem:[%s2205_s25 + $0xc8] sm:$0xf]  ;;  %v1609_v9 = vld [vmem:[%s2205_s25 + $0xe0] sm:$0xf] }
  0x3c   : > { %v1611_v10 = vld [vmem:[%s2205_s25 + $0xf8] sm:$0xf]  ;;  %1608 = vst [vmem:[%s2210_s26 + $0x68] sm:$0xf] %v1607_v8  ;;  %1610 = vst [vmem:[%s2210_s26 + $0x74] sm:$0xf] %v1609_v9 }
  0x3d   : > { %1612 = vst [vmem:[%s2210_s26 + $0x80] sm:$0xf] %v1611_v10  ;;  %v1613_v11 = vld [vmem:[%s2205_s25 + $0x110] sm:$0xf]  ;;  %v1615_v12 = vld [vmem:[%s2205_s25 + $0x128] sm:$0xf] }
  0x3e   : > { %v1617_v13 = vld [vmem:[%s2205_s25 + $0x140] sm:$0xf]  ;;  %1614 = vst [vmem:[%s2210_s26 + $0x8c] sm:$0xf] %v1613_v11  ;;  %1616 = vst [vmem:[%s2210_s26 + $0x98] sm:$0xf] %v1615_v12 }
  0x3f   : > { %1618 = vst [vmem:[%s2210_s26 + $0xa4] sm:$0xf] %v1617_v13  ;;  %v1619_v14 = vld [vmem:[%s2205_s25 + $0x158] sm:$0xf]  ;;  %v1621_v15 = vld [vmem:[%s2205_s25 + $0x170] sm:$0xf] }
  0x40   : > { %v1623_v16 = vld [vmem:[%s2205_s25 + $0x188] sm:$0xf]  ;;  %1620 = vst [vmem:[%s2210_s26 + $0xb0] sm:$0xf] %v1619_v14  ;;  %1622 = vst [vmem:[%s2210_s26 + $0xbc] sm:$0xf] %v1621_v15 }
  0x41   : > { %1624 = vst [vmem:[%s2210_s26 + $0xc8] sm:$0xf] %v1623_v16  ;;  %v1625_v17 = vld [vmem:[%s2205_s25 + $0x1a0] sm:$0xf]  ;;  %v1627_v18 = vld [vmem:[%s2205_s25 + $0x1b8] sm:$0xf] }
  0x42   : > { %v1629_v19 = vld [vmem:[%s2205_s25 + $0x1d0] sm:$0xf]  ;;  %1626 = vst [vmem:[%s2210_s26 + $0xd4] sm:$0xf] %v1625_v17  ;;  %1628 = vst [vmem:[%s2210_s26 + $0xe0] sm:$0xf] %v1627_v18 }
  0x43   : > { %1630 = vst [vmem:[%s2210_s26 + $0xec] sm:$0xf] %v1629_v19  ;;  %v1631_v20 = vld [vmem:[%s2205_s25 + $0x1e8] sm:$0xf]  ;;  %v1633_v21 = vld [vmem:[%s2205_s25 + $0x200] sm:$0xf] }
  0x44   : > { %v1635_v22 = vld [vmem:[%s2205_s25 + $0x218] sm:$0xf]  ;;  %1632 = vst [vmem:[%s2210_s26 + $0xf8] sm:$0xf] %v1631_v20  ;;  %1634 = vst [vmem:[%s2210_s26 + $0x104] sm:$0xf] %v1633_v21 }
  0x45   : > { %1636 = vst [vmem:[%s2210_s26 + $0x110] sm:$0xf] %v1635_v22  ;;  %v1637_v23 = vld [vmem:[%s2205_s25 + $0x230] sm:$0xf]  ;;  %v1639_v24 = vld [vmem:[%s2205_s25 + $0x248] sm:$0xf] }
  0x46   : > { %v1641_v25 = vld [vmem:[%s2205_s25 + $0x260] sm:$0xf]  ;;  %1638 = vst [vmem:[%s2210_s26 + $0x11c] sm:$0xf] %v1637_v23  ;;  %1640 = vst [vmem:[%s2210_s26 + $0x128] sm:$0xf] %v1639_v24 }
  0x47   : > { %1642 = vst [vmem:[%s2210_s26 + $0x134] sm:$0xf] %v1641_v25  ;;  %v1643_v26 = vld [vmem:[%s2205_s25 + $0x278] sm:$0xf]  ;;  %v1645_v27 = vld [vmem:[%s2205_s25 + $0x290] sm:$0xf] }
  0x48   : > { %v1647_v28 = vld [vmem:[%s2205_s25 + $0x2a8] sm:$0xf]  ;;  %1644 = vst [vmem:[%s2210_s26 + $0x140] sm:$0xf] %v1643_v26  ;;  %1646 = vst [vmem:[%s2210_s26 + $0x14c] sm:$0xf] %v1645_v27 }
  0x49   : > { %1648 = vst [vmem:[%s2210_s26 + $0x158] sm:$0xf] %v1647_v28  ;;  %v1649_v29 = vld [vmem:[%s2205_s25 + $0x2c0] sm:$0xf]  ;;  %v1651_v30 = vld [vmem:[%s2205_s25 + $0x2d8] sm:$0xf] }
  0x4a   : > { %v1653_v31 = vld [vmem:[%s2205_s25 + $0x2f0] sm:$0xf]  ;;  %1650 = vst [vmem:[%s2210_s26 + $0x164] sm:$0xf] %v1649_v29  ;;  %1652 = vst [vmem:[%s2210_s26 + $0x170] sm:$0xf] %v1651_v30 }
  0x4b   : > { %1654 = vst [vmem:[%s2210_s26 + $0x17c] sm:$0xf] %v1653_v31  ;;  %v1655_v32 = vld [vmem:[%s2205_s25 + $0x308] sm:$0xf]  ;;  %v1657_v33 = vld [vmem:[%s2205_s25 + $0x320] sm:$0xf] }
  0x4c   : > { %v1659_v34 = vld [vmem:[%s2205_s25 + $0x338] sm:$0xf]  ;;  %1656 = vst [vmem:[%s2210_s26 + $0x188] sm:$0xf] %v1655_v32  ;;  %1658 = vst [vmem:[%s2210_s26 + $0x194] sm:$0xf] %v1657_v33 }
  0x4d   : > { %1660 = vst [vmem:[%s2210_s26 + $0x1a0] sm:$0xf] %v1659_v34  ;;  %v1661_v35 = vld [vmem:[%s2205_s25 + $0x350] sm:$0xf]  ;;  %v1663_v36 = vld [vmem:[%s2205_s25 + $0x368] sm:$0xf] }
  0x4e   : > { %v1665_v37 = vld [vmem:[%s2205_s25 + $0x380] sm:$0xf]  ;;  %1662 = vst [vmem:[%s2210_s26 + $0x1ac] sm:$0xf] %v1661_v35  ;;  %1664 = vst [vmem:[%s2210_s26 + $0x1b8] sm:$0xf] %v1663_v36 }
  0x4f   : > { %1666 = vst [vmem:[%s2210_s26 + $0x1c4] sm:$0xf] %v1665_v37  ;;  %v1667_v38 = vld [vmem:[%s2205_s25 + $0x398] sm:$0xf]  ;;  %v1669_v39 = vld [vmem:[%s2205_s25 + $0x3b0] sm:$0xf] }
  0x50   : > { %v1671_v40 = vld [vmem:[%s2205_s25 + $0x3c8] sm:$0xf]  ;;  %1668 = vst [vmem:[%s2210_s26 + $0x1d0] sm:$0xf] %v1667_v38  ;;  %1670 = vst [vmem:[%s2210_s26 + $0x1dc] sm:$0xf] %v1669_v39 }
  0x51   : > { %1672 = vst [vmem:[%s2210_s26 + $0x1e8] sm:$0xf] %v1671_v40  ;;  %v1673_v41 = vld [vmem:[%s2205_s25 + $0x3e0] sm:$0xf]  ;;  %v1675_v42 = vld [vmem:[%s2205_s25 + $0x3f8] sm:$0xf] }
  0x52   : > { %v1677_v43 = vld [vmem:[%s2205_s25 + $0x410] sm:$0xf]  ;;  %1674 = vst [vmem:[%s2210_s26 + $0x1f4] sm:$0xf] %v1673_v41  ;;  %1676 = vst [vmem:[%s2210_s26 + $0x200] sm:$0xf] %v1675_v42 }
  0x53   : > { %1678 = vst [vmem:[%s2210_s26 + $0x20c] sm:$0xf] %v1677_v43  ;;  %v1679_v44 = vld [vmem:[%s2205_s25 + $0x428] sm:$0xf]  ;;  %v1681_v45 = vld [vmem:[%s2205_s25 + $0x440] sm:$0xf] }
  0x54   : > { %v1683_v46 = vld [vmem:[%s2205_s25 + $0x458] sm:$0xf]  ;;  %1680 = vst [vmem:[%s2210_s26 + $0x218] sm:$0xf] %v1679_v44  ;;  %1682 = vst [vmem:[%s2210_s26 + $0x224] sm:$0xf] %v1681_v45 }
  0x55   : > { %1684 = vst [vmem:[%s2210_s26 + $0x230] sm:$0xf] %v1683_v46  ;;  %v1685_v47 = vld [vmem:[%s2205_s25 + $0x470] sm:$0xf]  ;;  %v1687_v48 = vld [vmem:[%s2205_s25 + $0x488] sm:$0xf] }
  0x56   : > { %v1689_v49 = vld [vmem:[%s2205_s25 + $0x4a0] sm:$0xf]  ;;  %1686 = vst [vmem:[%s2210_s26 + $0x23c] sm:$0xf] %v1685_v47  ;;  %1688 = vst [vmem:[%s2210_s26 + $0x248] sm:$0xf] %v1687_v48 }
  0x57   : > { %1690 = vst [vmem:[%s2210_s26 + $0x254] sm:$0xf] %v1689_v49  ;;  %v1691_v50 = vld [vmem:[%s2205_s25 + $0x4b8] sm:$0xf]  ;;  %v1693_v51 = vld [vmem:[%s2205_s25 + $0x4d0] sm:$0xf] }
  0x58   : > { %v1695_v52 = vld [vmem:[%s2205_s25 + $0x4e8] sm:$0xf]  ;;  %1692 = vst [vmem:[%s2210_s26 + $0x260] sm:$0xf] %v1691_v50  ;;  %1694 = vst [vmem:[%s2210_s26 + $0x26c] sm:$0xf] %v1693_v51 }
  0x59   : > { %1696 = vst [vmem:[%s2210_s26 + $0x278] sm:$0xf] %v1695_v52  ;;  %v1697_v53 = vld [vmem:[%s2205_s25 + $0x500] sm:$0xf]  ;;  %v1699_v54 = vld [vmem:[%s2205_s25 + $0x518] sm:$0xf] }
  0x5a   : > { %v1701_v55 = vld [vmem:[%s2205_s25 + $0x530] sm:$0xf]  ;;  %1698 = vst [vmem:[%s2210_s26 + $0x284] sm:$0xf] %v1697_v53  ;;  %1700 = vst [vmem:[%s2210_s26 + $0x290] sm:$0xf] %v1699_v54 }
  0x5b   : > { %1702 = vst [vmem:[%s2210_s26 + $0x29c] sm:$0xf] %v1701_v55  ;;  %v1703_v56 = vld [vmem:[%s2205_s25 + $0x548] sm:$0xf]  ;;  %v1705_v57 = vld [vmem:[%s2205_s25 + $0x560] sm:$0xf] }
  0x5c   : > { %v1707_v58 = vld [vmem:[%s2205_s25 + $0x578] sm:$0xf]  ;;  %1704 = vst [vmem:[%s2210_s26 + $0x2a8] sm:$0xf] %v1703_v56  ;;  %1706 = vst [vmem:[%s2210_s26 + $0x2b4] sm:$0xf] %v1705_v57 }
  0x5d   : > { %1708 = vst [vmem:[%s2210_s26 + $0x2c0] sm:$0xf] %v1707_v58  ;;  %v1709_v59 = vld [vmem:[%s2205_s25 + $0x590] sm:$0xf]  ;;  %v1711_v60 = vld [vmem:[%s2205_s25 + $0x5a8] sm:$0xf] }
  0x5e   : > { %v1713_v61 = vld [vmem:[%s2205_s25 + $0x5c0] sm:$0xf]  ;;  %1710 = vst [vmem:[%s2210_s26 + $0x2cc] sm:$0xf] %v1709_v59  ;;  %1712 = vst [vmem:[%s2210_s26 + $0x2d8] sm:$0xf] %v1711_v60 }
  0x5f   : > { %1714 = vst [vmem:[%s2210_s26 + $0x2e4] sm:$0xf] %v1713_v61  ;;  %v1715_v62 = vld [vmem:[%s2205_s25 + $0x5d8] sm:$0xf]  ;;  %v1717_v63 = vld [vmem:[%s2205_s25 + $0x5f0] sm:$0xf] }
  0x60   : > { %1716 = vst [vmem:[%s2210_s26 + $0x2f0] sm:$0xf] %v1715_v62  ;;  %1718 = vst [vmem:[%s2210_s26 + $0x2fc] sm:$0xf] %v1717_v63 }
  0x61 PF: > { %p1719_p8 = scmp.ge.s32.totalorder %s2140_s13, 1  ;;  %p420_p9 = scmp.lt.s32.totalorder %s2140_s13, 3 }
  0x63   : > { %p421_p10 = pnand %p1719_p8, %p420_p9 }
  0x64   : > { %s427_s27 = sand.u32 (!%p421_p10), 1, %s2124_s9   ;;  %v2019_v0 = vld [vmem:[%s2689_s0 + $0x4] ss:$16 sps:$4 sm:$0xff] (!%p421_p10)   ;;  %v2515_v38 = vld [vmem:[%s2689_s0] ss:$16 sps:$4 sm:$0xff] (!%p421_p10)  }
  0x65   : > { %424 = sbr.rel (%p421_p10) target bundleno = 474 (0x1da), region = 50  ;;  %1334 = vmatprep.mubr.bf16.mxu1 (!%p421_p10), %v2019_v0  ;;  %1208 = vmatprep.mubr.bf16.mxu0 (!%p421_p10), %v2019_v0  ;;  %v2522_v41 = vld [vmem:[%s2689_s0 + $0x24] ss:$16 sps:$4 sm:$0xff] (!%p421_p10)   ;;  %v2536_v49 = vld [vmem:[%s2689_s0 + $0x20] ss:$16 sps:$4 sm:$0xff] (!%p421_p10)  }
  0x66   : > { %s1914_s28 = smul.u32 (!%p421_p10), 768, %s427_s27  ;;  %v2542_v51 = vld [vmem:[%s2689_s0 + $0x44] ss:$16 sps:$4 sm:$0xff] (!%p421_p10)   ;;  %v2055_v60 = vld [vmem:[%s2689_s0 + $0x40] ss:$16 sps:$4 sm:$0xff] (!%p421_p10)  }
  0x68   : > { %s2473_s3 = scalar_lea.vmem (!%p421_p10), [#allocation2], %s1914_s28 }
  0x69   : > { %v1956_v1 = vld [vmem:[%s2473_s3 + $0x4] ss:$12 sps:$4 sm:$0xff] (!%p421_p10)   ;;  %v1958_v2 = vld [vmem:[%s2473_s3] ss:$12 sps:$4 sm:$0xff] (!%p421_p10)   ;;  %v1959_v3 = vld [vmem:[%s2473_s3 + $0x1c] ss:$12 sps:$4 sm:$0xff] (!%p421_p10)  }
  0x6a   : > { %1176 = vmatprep.subr.bf16.mxu0 (!%p421_p10), %v1956_v1  ;;  %v1961_v4 = vld [vmem:[%s2473_s3 + $0x18] ss:$12 sps:$4 sm:$0xff] (!%p421_p10)   ;;  %v1962_v5 = vld [vmem:[%s2473_s3 + $0x34] ss:$12 sps:$4 sm:$0xff] (!%p421_p10)   ;;  %v1964_v6 = vld [vmem:[%s2473_s3 + $0x30] ss:$12 sps:$4 sm:$0xff] (!%p421_p10)  }
  0x6b   : > { %1177 = vmatpush1.bf16.msra.mxu0 (!%p421_p10), %v1958_v2  ;;  %v1965_v7 = vld [vmem:[%s2473_s3 + $0x4c] ss:$12 sps:$4 sm:$0xff] (!%p421_p10)   ;;  %v1967_v8 = vld [vmem:[%s2473_s3 + $0x48] ss:$12 sps:$4 sm:$0xff] (!%p421_p10)   ;;  %v1968_v11 = vld [vmem:[%s2473_s3 + $0x64] ss:$12 sps:$4 sm:$0xff] (!%p421_p10)  }
  0x6c   : > { %1178 = vmatprep.subr.bf16.mxu0 %v1959_v3  ;;  %v1977_v9 = vld [vmem:[%s2473_s3 + $0xc8] ss:$12 sps:$4 sm:$0xff]   ;;  %v1982_v12 = vld [vmem:[%s2473_s3 + $0xe0] ss:$12 sps:$4 sm:$0xff]   ;;  %v1987_v16 = vld [vmem:[%s2473_s3 + $0xf8] ss:$12 sps:$4 sm:$0xff]  }
  0x6d   : > { %v1978_v10 = vld [vmem:[%s2473_s3 + $0x8] ss:$12 sps:$4 sm:$0xff]   ;;  %1833 = vmatprep.subr.bf16.mxu1 %v1977_v9  ;;  %v1983_v13 = vld [vmem:[%s2473_s3 + $0x20] ss:$12 sps:$4 sm:$0xff]   ;;  %v1988_v17 = vld [vmem:[%s2473_s3 + $0x38] ss:$12 sps:$4 sm:$0xff]  }
  0x6e   : > { %1834 = vmatpush3.bf16.msra.mxu1 %v1978_v10  ;;  %v1970_v14 = vld [vmem:[%s2473_s3 + $0x60] ss:$12 sps:$4 sm:$0xff]   ;;  %v1971_v15 = vld [vmem:[%s2473_s3 + $0x7c] ss:$12 sps:$4 sm:$0xff]   ;;  %v1973_v18 = vld [vmem:[%s2473_s3 + $0x78] ss:$12 sps:$4 sm:$0xff]  }
  0x6f   : > { %1179 = vmatpush1.bf16.msra.mxu0 %v1961_v4  ;;  %1835 = vmatprep.subr.bf16.mxu1 %v1982_v12  ;;  %v1974_v19 = vld [vmem:[%s2473_s3 + $0x94] ss:$12 sps:$4 sm:$0xff]   ;;  %v1992_v20 = vld [vmem:[%s2473_s3 + $0x110] ss:$12 sps:$4 sm:$0xff]   ;;  %v1979_v24 = vld [vmem:[%s2473_s3 + $0xac] ss:$12 sps:$4 sm:$0xff]  }
  0x70   : > { %1180 = vmatprep.subr.bf16.mxu0 %v1962_v5  ;;  %v1993_v21 = vld [vmem:[%s2473_s3 + $0x50] ss:$12 sps:$4 sm:$0xff]   ;;  %v1997_v23 = vld [vmem:[%s2473_s3 + $0x128] ss:$12 sps:$4 sm:$0xff]   ;;  %v2002_v26 = vld [vmem:[%s2473_s3 + $0x140] ss:$12 sps:$4 sm:$0xff]  }
  0x71   : > { %v1976_v22 = vld [vmem:[%s2473_s3 + $0x90] ss:$12 sps:$4 sm:$0xff]   ;;  %v1998_v25 = vld [vmem:[%s2473_s3 + $0x68] ss:$12 sps:$4 sm:$0xff]   ;;  %v2003_v29 = vld [vmem:[%s2473_s3 + $0x80] ss:$12 sps:$4 sm:$0xff]  }
  0x72   : > { %1836 = vmatpush3.bf16.msra.mxu1 %v1983_v13  ;;  %v1981_v27 = vld [vmem:[%s2473_s3 + $0xa8] ss:$12 sps:$4 sm:$0xff]   ;;  %v1984_v28 = vld [vmem:[%s2473_s3 + $0xc4] ss:$12 sps:$4 sm:$0xff]   ;;  %v1986_v31 = vld [vmem:[%s2473_s3 + $0xc0] ss:$12 sps:$4 sm:$0xff]  }
  0x73   : > { %1181 = vmatpush1.bf16.msra.mxu0 %v1964_v6  ;;  %1837 = vmatprep.subr.bf16.mxu1 %v1987_v16  ;;  %v2007_v30 = vld [vmem:[%s2473_s3 + $0x158] ss:$12 sps:$4 sm:$0xff]   ;;  %v1989_v32 = vld [vmem:[%s2473_s3 + $0xdc] ss:$12 sps:$4 sm:$0xff]   ;;  %v1994_v36 = vld [vmem:[%s2473_s3 + $0xf4] ss:$12 sps:$4 sm:$0xff]  }
  0x74   : > { %1182 = vmatprep.subr.bf16.mxu0 %v1965_v7  ;;  %v2008_v33 = vld [vmem:[%s2473_s3 + $0x98] ss:$12 sps:$4 sm:$0xff]   ;;  %v2012_v34 = vld [vmem:[%s2473_s3 + $0x170] ss:$12 sps:$4 sm:$0xff]   ;;  %v2020_v39 = vld [vmem:[%s2473_s3 + $0x248] ss:$12 sps:$4 sm:$0xff]  }
  0x75   : > { %v1991_v35 = vld [vmem:[%s2473_s3 + $0xd8] ss:$12 sps:$4 sm:$0xff]   ;;  %v2013_v37 = vld [vmem:[%s2473_s3 + $0xb0] ss:$12 sps:$4 sm:$0xff]   ;;  %v2021_v43 = vld [vmem:[%s2473_s3 + $0x188] ss:$12 sps:$4 sm:$0xff]  }
  0x76   : > { %1838 = vmatpush3.bf16.msra.mxu1 %v1988_v17  ;;  %v1996_v40 = vld [vmem:[%s2473_s3 + $0xf0] ss:$12 sps:$4 sm:$0xff]   ;;  %v1999_v42 = vld [vmem:[%s2473_s3 + $0x10c] ss:$12 sps:$4 sm:$0xff]   ;;  %v2001_v45 = vld [vmem:[%s2473_s3 + $0x108] ss:$12 sps:$4 sm:$0xff]  }
  0x77   : > { %1183 = vmatpush1.bf16.msra.mxu0 %v1967_v8  ;;  %1839 = vmatprep.subr.bf16.mxu1 %v1992_v20  ;;  %v2025_v44 = vld [vmem:[%s2473_s3 + $0x260] ss:$12 sps:$4 sm:$0xff]   ;;  %v2004_v46 = vld [vmem:[%s2473_s3 + $0x124] ss:$12 sps:$4 sm:$0xff]   ;;  %v2009_v52 = vld [vmem:[%s2473_s3 + $0x13c] ss:$12 sps:$4 sm:$0xff]  }
  0x78   : > { %1184 = vmatprep.subr.bf16.mxu0 %v1968_v11  ;;  %v2026_v47 = vld [vmem:[%s2473_s3 + $0x1a0] ss:$12 sps:$4 sm:$0xff]   ;;  %v2030_v48 = vld [vmem:[%s2473_s3 + $0x278] ss:$12 sps:$4 sm:$0xff]   ;;  %v2035_v54 = vld [vmem:[%s2473_s3 + $0x290] ss:$12 sps:$4 sm:$0xff]  }
  0x79   : > { %v2006_v50 = vld [vmem:[%s2473_s3 + $0x120] ss:$12 sps:$4 sm:$0xff]   ;;  %v2031_v53 = vld [vmem:[%s2473_s3 + $0x1b8] ss:$12 sps:$4 sm:$0xff]   ;;  %v2036_v57 = vld [vmem:[%s2473_s3 + $0x1d0] ss:$12 sps:$4 sm:$0xff]  }
  0x7a   : > { %1840 = vmatpush3.bf16.msra.mxu1 %v1993_v21  ;;  %v2011_v55 = vld [vmem:[%s2473_s3 + $0x138] ss:$12 sps:$4 sm:$0xff]   ;;  %v2014_v56 = vld [vmem:[%s2473_s3 + $0x154] ss:$12 sps:$4 sm:$0xff]   ;;  %v2016_v59 = vld [vmem:[%s2473_s3 + $0x150] ss:$12 sps:$4 sm:$0xff]  }
  0x7b   : > { %1185 = vmatpush1.bf16.msra.mxu0 %v1970_v14  ;;  %1841 = vmatprep.subr.bf16.mxu1 %v1997_v23  ;;  %v2043_v58 = vld [vmem:[%s2473_s3 + $0x2a8] ss:$12 sps:$4 sm:$0xff]   ;;  %v2022_v61 = vld [vmem:[%s2473_s3 + $0x16c] ss:$12 sps:$4 sm:$0xff]   ;;  %v2029_v1 = vld [vmem:[%s2473_s3 + $0x184] ss:$12 sps:$4 sm:$0xff]  }
  0x7c   : > { %1186 = vmatprep.subr.bf16.mxu0 %v1971_v15  ;;  %v2044_v62 = vld [vmem:[%s2473_s3 + $0x1e8] ss:$12 sps:$4 sm:$0xff]   ;;  %v2048_v63 = vld [vmem:[%s2473_s3 + $0x2c0] ss:$12 sps:$4 sm:$0xff]   ;;  %v2056_v3 = vld [vmem:[%s2473_s3 + $0x2d8] ss:$12 sps:$4 sm:$0xff]  }
  0x7d   : > { %v2024_v0 = vld [vmem:[%s2473_s3 + $0x168] ss:$12 sps:$4 sm:$0xff]   ;;  %v2049_v2 = vld [vmem:[%s2473_s3 + $0x200] ss:$12 sps:$4 sm:$0xff]   ;;  %v2057_v7 = vld [vmem:[%s2473_s3 + $0x218] ss:$12 sps:$4 sm:$0xff]  }
  0x7e   : > { %1842 = vmatpush3.bf16.msra.mxu1 %v1998_v25  ;;  %v2027_v4 = vld [vmem:[%s2473_s3 + $0x180] ss:$12 sps:$4 sm:$0xff]   ;;  %v2034_v6 = vld [vmem:[%s2473_s3 + $0x19c] ss:$12 sps:$4 sm:$0xff]   ;;  %v2032_v9 = vld [vmem:[%s2473_s3 + $0x198] ss:$12 sps:$4 sm:$0xff]  }
  0x7f   : > { %1187 = vmatpush1.bf16.msra.mxu0 %v1973_v18  ;;  %1843 = vmatprep.subr.bf16.mxu1 %v2002_v26  ;;  %v2068_v5 = vld [vmem:[%s2689_s0 + $0xc] ss:$16 sps:$4 sm:$0xff]   ;;  %v2039_v10 = vld [vmem:[%s2473_s3 + $0x1b4] ss:$12 sps:$4 sm:$0xff]   ;;  %v2581_v14 = vld [vmem:[%s2689_s0 + $0x8] ss:$16 sps:$4 sm:$0xff]  }
  0x80   : > { %1188 = vmatprep.subr.bf16.mxu0 %v1974_v19  ;;  %v2061_v8 = vld [vmem:[%s2473_s3 + $0x2f0] ss:$12 sps:$4 sm:$0xff]   ;;  %v2047_v13 = vld [vmem:[%s2473_s3 + $0x1cc] ss:$12 sps:$4 sm:$0xff]   ;;  %v2045_v16 = vld [vmem:[%s2473_s3 + $0x1c8] ss:$12 sps:$4 sm:$0xff]  }
  0x81   : > { %v2062_v11 = vld [vmem:[%s2473_s3 + $0x230] ss:$12 sps:$4 sm:$0xff]   ;;  %v2050_v18 = vld [vmem:[%s2473_s3 + $0x1e0] ss:$12 sps:$4 sm:$0xff]   ;;  %v2083_v20 = vld [vmem:[%s2689_s0 + $0x28] ss:$16 sps:$4 sm:$0xff]  }
  0x82   : > { %1844 = vmatpush3.bf16.msra.mxu1 %v2003_v29  ;;  %v2037_v12 = vld [vmem:[%s2473_s3 + $0x1b0] ss:$12 sps:$4 sm:$0xff]   ;;  %v2065_v23 = vld [vmem:[%s2473_s3 + $0x214] ss:$12 sps:$4 sm:$0xff]   ;;  %v2071_v25 = vld [vmem:[%s2473_s3 + $0x22c] ss:$12 sps:$4 sm:$0xff]  }
  0x83   : > { %1189 = vmatpush1.bf16.msra.mxu0 %v1976_v22  ;;  %1845 = vmatprep.subr.bf16.mxu1 %v2007_v30  ;;  %v2586_v15 = vld [vmem:[%s2689_s0 + $0x2c] ss:$16 sps:$4 sm:$0xff]   ;;  %v2052_v17 = vld [vmem:[%s2473_s3 + $0x1e4] ss:$12 sps:$4 sm:$0xff]   ;;  %v2092_v26 = vld [vmem:[%s2689_s0 + $0x48] ss:$16 sps:$4 sm:$0xff]  }
  0x84   : > { %1190 = vmatprep.subr.bf16.mxu0 %v1979_v24  ;;  %v2060_v19 = vld [vmem:[%s2473_s3 + $0x1fc] ss:$12 sps:$4 sm:$0xff]   ;;  %v2058_v22 = vld [vmem:[%s2473_s3 + $0x1f8] ss:$12 sps:$4 sm:$0xff]   ;;  %v2072_v29 = vld [vmem:[%s2473_s3 + $0x240] ss:$12 sps:$4 sm:$0xff]  }
  0x85   : > { %v2090_v21 = vld [vmem:[%s2689_s0 + $0x4c] ss:$16 sps:$4 sm:$0xff]   ;;  %s1832_s9 = smul.u32 (%p2192_p6), 24, %s2132_s11 }
  0x86   : > { %1846 = vmatpush3.bf16.msra.mxu1 %v2008_v33  ;;  %v2063_v24 = vld [vmem:[%s2473_s3 + $0x210] ss:$12 sps:$4 sm:$0xff]  }
  0x87   : > { %1191 = vmatpush1.bf16.msra.mxu0 %v1981_v27  ;;  %1847 = vmatprep.subr.bf16.mxu1 %v2012_v34  ;;  %v2069_v27 = vld [vmem:[%s2473_s3 + $0x228] ss:$12 sps:$4 sm:$0xff]   ;;  %v2078_v33 = vld [vmem:[%s2473_s3 + $0x270] ss:$12 sps:$4 sm:$0xff]   ;;  %v2086_v34 = vld [vmem:[%s2473_s3 + $0x28c] ss:$12 sps:$4 sm:$0xff]   ;;  %s1446_s15 = scalar_lea.vmem (%p2192_p6), %s2691_s2, %s1832_s9 }
  0x88   : > { %1192 = vmatprep.subr.bf16.mxu0 %v1984_v28  ;;  %v2074_v28 = vld [vmem:[%s2473_s3 + $0x244] ss:$12 sps:$4 sm:$0xff]   ;;  %v2077_v30 = vld [vmem:[%s2473_s3 + $0x25c] ss:$12 sps:$4 sm:$0xff]  }
  0x8a   : > { %1848 = vmatpush3.bf16.msra.mxu1 %v2013_v37  ;;  %v2087_v37 = vld [vmem:[%s2473_s3 + $0x2a0] ss:$12 sps:$4 sm:$0xff]  }
  0x8b   : > { %1193 = vmatpush1.bf16.msra.mxu0 %v1986_v31  ;;  %1867 = vmatprep.subr.bf16.mxu1 %v2020_v39  ;;  %v2075_v31 = vld [vmem:[%s2473_s3 + $0x258] ss:$12 sps:$4 sm:$0xff]  }
  0x8c   : > { %1194 = vmatprep.subr.bf16.mxu0 %v1989_v32  ;;  %v2080_v32 = vld [vmem:[%s2473_s3 + $0x274] ss:$12 sps:$4 sm:$0xff]   ;;  %v2093_v39 = vld [vmem:[%s2473_s3 + $0x2b8] ss:$12 sps:$4 sm:$0xff]  }
  0x8d   : > { %1335 = vmatmul.mubr.bf16.vlgmr.msra.gmra.mrb[0].mxu1 %v2515_v38 }
  0x8e   : > { %1868 = vmatpush3.bf16.msra.mxu1 %v2021_v43  ;;  %1342 = vmatprep.mubr.bf16.mxu1 %v2522_v41  ;;  %v2099_v43 = vld [vmem:[%s2473_s3 + $0x2e8] ss:$12 sps:$4 sm:$0xff]  }
  0x8f   : > { %1195 = vmatpush1.bf16.msra.mxu0 %v1991_v35  ;;  %1869 = vmatprep.subr.bf16.mxu1 %v2025_v44  ;;  %v2084_v35 = vld [vmem:[%s2473_s3 + $0x288] ss:$12 sps:$4 sm:$0xff]  }
  0x90   : > { %1196 = vmatprep.subr.bf16.mxu0 %v1994_v36  ;;  %v2089_v36 = vld [vmem:[%s2473_s3 + $0x2a4] ss:$12 sps:$4 sm:$0xff]  }
  0x92   : > { %1870 = vmatpush3.bf16.msra.mxu1 %v2026_v47 }
  0x93   : > { %1197 = vmatpush1.bf16.msra.mxu0 %v1996_v40  ;;  %1871 = vmatprep.subr.bf16.mxu1 %v2030_v48  ;;  %v2098_v40 = vld [vmem:[%s2473_s3 + $0x2d4] ss:$12 sps:$4 sm:$0xff]  }
  0x94   : > { %1198 = vmatprep.subr.bf16.mxu0 %v1999_v42  ;;  %v2101_v42 = vld [vmem:[%s2473_s3 + $0x2ec] ss:$12 sps:$4 sm:$0xff]  }
  0x95   : > { %1343 = vmatmul.mubr.bf16.gmra.mrb[4].mxu1 %v2536_v49 }
  0x96   : > { %1872 = vmatpush3.bf16.msra.mxu1 %v2031_v53  ;;  %1350 = vmatprep.mubr.bf16.mxu1 %v2542_v51 }
  0x97   : > { %1199 = vmatpush1.bf16.msra.mxu0 %v2001_v45  ;;  %1873 = vmatprep.subr.bf16.mxu1 %v2035_v54 }
  0x98   : > { %1200 = vmatprep.subr.bf16.mxu0 %v2004_v46 }
  0x9a   : > { %1874 = vmatpush3.bf16.msra.mxu1 %v2036_v57 }
  0x9b   : > { %1201 = vmatpush1.bf16.msra.mxu0 %v2006_v50  ;;  %1875 = vmatprep.subr.bf16.mxu1 %v2043_v58 }
  0x9c   : > { %1202 = vmatprep.subr.bf16.mxu0 %v2009_v52 }
  0x9d   : > { %1351 = vmatmul.mubr.bf16.gmra.mrb[8].mxu1 %v2055_v60 }
  0x9e   : > { %1876 = vmatpush3.bf16.msra.mxu1 %v2044_v62  ;;  %1391 = vmatprep.mubr.bf16.mxu1 %v2068_v5 }
  0x9f   : > { %1203 = vmatpush1.bf16.msra.mxu0 %v2011_v55  ;;  %1877 = vmatprep.subr.bf16.mxu1 %v2048_v63 }
  0xa0   : > { %1204 = vmatprep.subr.bf16.mxu0 %v2014_v56 }
  0xa2   : > { %1878 = vmatpush3.bf16.msra.mxu1 %v2049_v2 }
  0xa3   : > { %1205 = vmatpush1.bf16.msra.mxu0 %v2016_v59  ;;  %1879 = vmatprep.subr.bf16.mxu1 %v2056_v3 }
  0xa4   : > { %1206 = vmatprep.subr.bf16.mxu0 %v2022_v61 }
  0xa6   : > { %1880 = vmatpush3.bf16.msra.mxu1 %v2057_v7 }
  0xa7   : > { %1207 = vmatpush1.bf16.msra.mxu0 %v2024_v0  ;;  %1881 = vmatprep.subr.bf16.mxu1 %v2061_v8 }
  0xa8   : > { %1239 = vmatprep.subr.bf16.mxu0 %v2029_v1 }
  0xaa   : > { %1209 = vmatmul.mubr.bf16.vlgmr.msra.gmra.mrb[0].mxu0 %v2515_v38  ;;  %1882 = vmatpush3.bf16.msra.mxu1 %v2062_v11  ;;  %v2095_v38 = vld [vmem:[%s2473_s3 + $0x2bc] ss:$12 sps:$4 sm:$0xff]  }
  0xab   : > { %1240 = vmatpush1.bf16.msra.mxu0 %v2027_v4  ;;  %1218 = vmatprep.mubr.bf16.mxu0 %v2522_v41  ;;  %v2096_v41 = vld [vmem:[%s2473_s3 + $0x2d0] ss:$12 sps:$4 sm:$0xff]   ;;  %s1915_s3 = smul.u32 144, %s427_s27 }
  0xac   : > { %1241 = vmatprep.subr.bf16.mxu0 %v2034_v6 }
  0xad   : > { %1392 = vmatmul.mubr.bf16.vlgmr.msra.gmra.mrb[12].mxu1 %v2581_v14  ;;  %s2630_s8 = scalar_lea.vmem [#allocation3], %s1915_s3 }
  0xae   : > { %1399 = vmatprep.mubr.bf16.mxu1 %v2586_v15 }
  0xaf   : > { %1242 = vmatpush1.bf16.msra.mxu0 %v2032_v9 }
  0xb0   : > { %1243 = vmatprep.subr.bf16.mxu0 %v2039_v10 }
  0xb2   : > { %1219 = vmatmul.mubr.bf16.gmra.mrb[4].mxu0 %v2536_v49 }
  0xb3   : > { %1244 = vmatpush1.bf16.msra.mxu0 %v2037_v12  ;;  %1228 = vmatprep.mubr.bf16.mxu0 %v2542_v51 }
  0xb4   : > { %1245 = vmatprep.subr.bf16.mxu0 %v2047_v13 }
  0xb5   : > { %1400 = vmatmul.mubr.bf16.gmra.mrb[16].mxu1 %v2083_v20 }
  0xb6   : > { %1407 = vmatprep.mubr.bf16.mxu1 %v2090_v21 }
  0xb7   : > { %1246 = vmatpush1.bf16.msra.mxu0 %v2045_v16 }
  0xb8   : > { %1247 = vmatprep.subr.bf16.mxu0 %v2052_v17 }
  0xba   : > { %1229 = vmatmul.mubr.bf16.gmra.mrb[8].mxu0 %v2055_v60 }
  0xbb   : > { %1248 = vmatpush1.bf16.msra.mxu0 %v2050_v18  ;;  %1271 = vmatprep.mubr.bf16.mxu0 %v2068_v5 }
  0xbc   : > { %1249 = vmatprep.subr.bf16.mxu0 %v2060_v19 }
  0xbd   : > { %1408 = vmatmul.mubr.bf16.gmra.mrb[20].mxu1 %v2092_v26 }
  0xbf   : > { %1250 = vmatpush1.bf16.msra.mxu0 %v2058_v22 }
  0xc0   : > { %1251 = vmatprep.subr.bf16.mxu0 %v2065_v23 }
  0xc3   : > { %1252 = vmatpush1.bf16.msra.mxu0 %v2063_v24 }
  0xc4   : > { %1253 = vmatprep.subr.bf16.mxu0 %v2071_v25 }
  0xc7   : > { %1254 = vmatpush1.bf16.msra.mxu0 %v2069_v27 }
  0xc8   : > { %1255 = vmatprep.subr.bf16.mxu0 %v2074_v28 }
  0xcb   : > { %1256 = vmatpush1.bf16.msra.mxu0 %v2072_v29 }
  0xcc   : > { %1257 = vmatprep.subr.bf16.mxu0 %v2077_v30 }
  0xcf   : > { %1258 = vmatpush1.bf16.msra.mxu0 %v2075_v31 }
  0xd0   : > { %1259 = vmatprep.subr.bf16.mxu0 %v2080_v32 }
  0xd3   : > { %1260 = vmatpush1.bf16.msra.mxu0 %v2078_v33 }
  0xd4   : > { %1261 = vmatprep.subr.bf16.mxu0 %v2086_v34 }
  0xd7   : > { %1262 = vmatpush1.bf16.msra.mxu0 %v2084_v35 }
  0xd8   : > { %1263 = vmatprep.subr.bf16.mxu0 %v2089_v36 }
  0xdb   : > { %1264 = vmatpush1.bf16.msra.mxu0 %v2087_v37 }
  0xdc   : > { %1265 = vmatprep.subr.bf16.mxu0 %v2095_v38 }
  0xdf   : > { %1266 = vmatpush1.bf16.msra.mxu0 %v2093_v39 }
  0xe0   : > { %1267 = vmatprep.subr.bf16.mxu0 %v2098_v40 }
  0xe3   : > { %1268 = vmatpush1.bf16.msra.mxu0 %v2096_v41 }
  0xe4   : > { %1269 = vmatprep.subr.bf16.mxu0 %v2101_v42 }
  0xe7   : > { %1270 = vmatpush1.bf16.msra.mxu0 %v2099_v43 }
  0xea   : > { %1272 = vmatmul.mubr.bf16.vlgmr.msra.gmra.mrb[0].mxu0 %v2581_v14 }
  0xeb   : > { %1281 = vmatprep.mubr.bf16.mxu0 %v2586_v15 }
  0xf2   : > { %1282 = vmatmul.mubr.bf16.gmra.mrb[4].mxu0 %v2083_v20 }
  0xf3   : > { %1291 = vmatprep.mubr.bf16.mxu0 %v2090_v21 }
  0xfa   : > { %1292 = vmatmul.mubr.bf16.gmra.mrb[8].mxu0 %v2092_v26 }
 0x160   : > { %v1849_v44 = vpop.f32.mrb[0].mxu1 }
 0x161   : > { %v1850_v45 = vpop.f32.mrb[1].mxu1 }
 0x162   : > { %v1851_v46 = vadd.f32 %v1850_v45, %v1849_v44  ;;  %v1852_v47 = vpop.f32.mrb[2].mxu1 }
 0x163   : > { %v1853_v48 = vpop.f32.mrb[3].mxu1 }
 0x164   : > { %v1854_v49 = vadd.f32 %v1853_v48, %v1852_v47 }
 0x168   : > { %v1855_v50 = vpop.f32.mrb[4].mxu1 }
 0x169   : > { %v1856_v51 = vpop.f32.mrb[5].mxu1 }
 0x16a   : > { %v1857_v52 = vadd.f32 %v1856_v51, %v1855_v50  ;;  %v1858_v53 = vpop.f32.mrb[6].mxu1 }
 0x16b   : > { %v1859_v54 = vpop.f32.mrb[7].mxu1 }
 0x16c   : > { %v1860_v55 = vadd.f32 %v1859_v54, %v1858_v53 }
 0x170   : > { %v1861_v56 = vpop.f32.mrb[8].mxu1 }
 0x171   : > { %v1862_v57 = vpop.f32.mrb[9].mxu1 }
 0x172   : > { %v1863_v58 = vadd.f32 %v1862_v57, %v1861_v56  ;;  %v1864_v59 = vpop.f32.mrb[10].mxu1 }
 0x173   : > { %v1865_v60 = vpop.f32.mrb[11].mxu1 }
 0x174   : > { %v1866_v61 = vadd.f32 %v1865_v60, %v1864_v59 }
 0x180   : > { %v1883_v62 = vpop.f32.mrb[12].mxu1 }
 0x181   : > { %v1884_v63 = vpop.f32.mrb[13].mxu1 }
 0x182   : > { %v1885_v0 = vadd.f32 %v1884_v63, %v1883_v62  ;;  %v1886_v1 = vpop.f32.mrb[14].mxu1 }
 0x183   : > { %v1887_v2 = vpop.f32.mrb[15].mxu1 }
 0x184   : > { %v1394_v3 = vadd.f32 %v1885_v0, %v1851_v46  ;;  %v1888_v4 = vadd.f32 %v1887_v2, %v1886_v1 }
 0x186   : > { %1418 = vst [vmem:[%s2630_s8 + $0x10] sm:$0xff] %v1394_v3  ;;  %v1397_v5 = vadd.f32 %v1888_v4, %v1854_v49 }
 0x188   : > { %1421 = vst [vmem:[%s2630_s8 + $0x28] sm:$0xff] %v1397_v5  ;;  %v1889_v6 = vpop.f32.mrb[16].mxu1 }
 0x189   : > { %v1890_v7 = vpop.f32.mrb[17].mxu1 }
 0x18a   : > { %v1891_v8 = vadd.f32 %v1890_v7, %v1889_v6  ;;  %v1892_v9 = vpop.f32.mrb[18].mxu1 }
 0x18b   : > { %v1893_v10 = vpop.f32.mrb[19].mxu1 }
 0x18c   : > { %v1402_v11 = vadd.f32 %v1891_v8, %v1857_v52  ;;  %v1894_v12 = vadd.f32 %v1893_v10, %v1892_v9 }
 0x18d   : > { %v1463_v36 = vld [vmem:[%s2630_s8 + $0x10] sm:$0xff] (%p2192_p6) }
 0x18e   : > { %1424 = vst [vmem:[%s2630_s8 + $0x40] sm:$0xff] %v1402_v11  ;;  %v1405_v13 = vadd.f32 %v1894_v12, %v1860_v55  ;;  %1464 = vst [vmem:[%s1446_s15 + $0x10] sm:$0xff] (%p2192_p6), %v1463_v36 }
 0x18f   : > { %v1469_v39 = vld [vmem:[%s2630_s8 + $0x28] sm:$0xff] (%p2192_p6) }
 0x190   : > { %1427 = vst [vmem:[%s2630_s8 + $0x58] sm:$0xff] %v1405_v13  ;;  %v1895_v14 = vpop.f32.mrb[20].mxu1  ;;  %1470 = vst [vmem:[%s1446_s15 + $0x40] sm:$0xff] (%p2192_p6), %v1469_v39 }
 0x191   : > { %v1896_v15 = vpop.f32.mrb[21].mxu1 }
 0x192   : > { %v1897_v16 = vadd.f32 %v1896_v15, %v1895_v14  ;;  %v1898_v17 = vpop.f32.mrb[22].mxu1 }
 0x193   : > { %v1899_v18 = vpop.f32.mrb[23].mxu1 }
 0x194   : > { %v1410_v19 = vadd.f32 %v1897_v16, %v1863_v58  ;;  %v1900_v20 = vadd.f32 %v1899_v18, %v1898_v17 }
 0x195   : > { %v1475_v42 = vld [vmem:[%s2630_s8 + $0x40] sm:$0xff] (%p2192_p6) }
 0x196   : > { %1430 = vst [vmem:[%s2630_s8 + $0x70] sm:$0xff] %v1410_v19  ;;  %v1413_v21 = vadd.f32 %v1900_v20, %v1866_v61  ;;  %1476 = vst [vmem:[%s1446_s15 + $0x70] sm:$0xff] (%p2192_p6), %v1475_v42 }
 0x197   : > { %v1481_v45 = vld [vmem:[%s2630_s8 + $0x58] sm:$0xff] (%p2192_p6) }
 0x198   : > { %1433 = vst [vmem:[%s2630_s8 + $0x88] sm:$0xff] %v1413_v21  ;;  %1482 = vst [vmem:[%s1446_s15 + $0xa0] sm:$0xff] (%p2192_p6), %v1481_v45 }
 0x19d   : > { %v1487_v48 = vld [vmem:[%s2630_s8 + $0x70] sm:$0xff] (%p2192_p6) }
 0x19e   : > { %1488 = vst [vmem:[%s1446_s15 + $0xd0] sm:$0xff] (%p2192_p6), %v1487_v48 }
 0x19f   : > { %v1493_v51 = vld [vmem:[%s2630_s8 + $0x88] sm:$0xff] (%p2192_p6) }
 0x1a0   : > { %1494 = vst [vmem:[%s1446_s15 + $0x100] sm:$0xff] (%p2192_p6), %v1493_v51 }
 0x1bd   : > { %v1273_v22 = vpop.f32.mrb[0].mxu0 }
 0x1be   : > { %1416 = vst [vmem:[%s2630_s8] sm:$0xff] %v1273_v22  ;;  %v1275_v23 = vpop.f32.mrb[1].mxu0 }
 0x1bf   : > { %1417 = vst [vmem:[%s2630_s8 + $0x8] sm:$0xff] %v1275_v23  ;;  %v1277_v24 = vpop.f32.mrb[2].mxu0 }
 0x1c0   : > { %1419 = vst [vmem:[%s2630_s8 + $0x18] sm:$0xff] %v1277_v24  ;;  %v1279_v25 = vpop.f32.mrb[3].mxu0 }
 0x1c1   : > { %1420 = vst [vmem:[%s2630_s8 + $0x20] sm:$0xff] %v1279_v25 }
 0x1c5   : > { %v1283_v26 = vpop.f32.mrb[4].mxu0  ;;  %v1459_v34 = vld [vmem:[%s2630_s8] sm:$0xff] (%p2192_p6) }
 0x1c6   : > { %1422 = vst [vmem:[%s2630_s8 + $0x30] sm:$0xff] %v1283_v26  ;;  %v1285_v27 = vpop.f32.mrb[5].mxu0  ;;  %v1461_v35 = vld [vmem:[%s2630_s8 + $0x8] sm:$0xff] (%p2192_p6)  ;;  %1460 = vst [vmem:[%s1446_s15] sm:$0xff] (%p2192_p6), %v1459_v34 }
 0x1c7   : > { %1423 = vst [vmem:[%s2630_s8 + $0x38] sm:$0xff] %v1285_v27  ;;  %v1287_v28 = vpop.f32.mrb[6].mxu0  ;;  %v1465_v37 = vld [vmem:[%s2630_s8 + $0x18] sm:$0xff] (%p2192_p6)  ;;  %1462 = vst [vmem:[%s1446_s15 + $0x8] sm:$0xff] (%p2192_p6), %v1461_v35 }
 0x1c8   : > { %1425 = vst [vmem:[%s2630_s8 + $0x48] sm:$0xff] %v1287_v28  ;;  %v1289_v29 = vpop.f32.mrb[7].mxu0  ;;  %v1467_v38 = vld [vmem:[%s2630_s8 + $0x20] sm:$0xff] (%p2192_p6)  ;;  %1466 = vst [vmem:[%s1446_s15 + $0x30] sm:$0xff] (%p2192_p6), %v1465_v37 }
 0x1c9   : > { %1426 = vst [vmem:[%s2630_s8 + $0x50] sm:$0xff] %v1289_v29  ;;  %1468 = vst [vmem:[%s1446_s15 + $0x38] sm:$0xff] (%p2192_p6), %v1467_v38 }
 0x1cb   : > { %1440 = sbr.rel (!%p2192_p6) target bundleno = 474 (0x1da), region = 58 }
 0x1cd   : > { %v1293_v30 = vpop.f32.mrb[8].mxu0  ;;  %v1471_v40 = vld [vmem:[%s2630_s8 + $0x30] sm:$0xff] (%p2192_p6) }
 0x1ce   : > { %1428 = vst [vmem:[%s2630_s8 + $0x60] sm:$0xff] %v1293_v30  ;;  %v1295_v31 = vpop.f32.mrb[9].mxu0  ;;  %v1473_v41 = vld [vmem:[%s2630_s8 + $0x38] sm:$0xff] (%p2192_p6)  ;;  %1472 = vst [vmem:[%s1446_s15 + $0x60] sm:$0xff] (%p2192_p6), %v1471_v40 }
 0x1cf   : > { %1429 = vst [vmem:[%s2630_s8 + $0x68] sm:$0xff] %v1295_v31  ;;  %v1297_v32 = vpop.f32.mrb[10].mxu0  ;;  %1474 = vst [vmem:[%s1446_s15 + $0x68] sm:$0xff] (%p2192_p6), %v1473_v41  ;;  %v1477_v43 = vld [vmem:[%s2630_s8 + $0x48] sm:$0xff] (%p2192_p6) }
 0x1d0   : > { %1431 = vst [vmem:[%s2630_s8 + $0x78] sm:$0xff] %v1297_v32  ;;  %v1299_v33 = vpop.f32.mrb[11].mxu0  ;;  %v1479_v44 = vld [vmem:[%s2630_s8 + $0x50] sm:$0xff] (%p2192_p6)  ;;  %1478 = vst [vmem:[%s1446_s15 + $0x90] sm:$0xff] (%p2192_p6), %v1477_v43 }
 0x1d1   : > { %1432 = vst [vmem:[%s2630_s8 + $0x80] sm:$0xff] %v1299_v33  ;;  %1480 = vst [vmem:[%s1446_s15 + $0x98] sm:$0xff] (%p2192_p6), %v1479_v44 }
 0x1d5   : > { %v1483_v46 = vld [vmem:[%s2630_s8 + $0x60] sm:$0xff] }
 0x1d6   : > { %v1485_v47 = vld [vmem:[%s2630_s8 + $0x68] sm:$0xff]  ;;  %1484 = vst [vmem:[%s1446_s15 + $0xc0] sm:$0xff] %v1483_v46 }
 0x1d7   : > { %1486 = vst [vmem:[%s1446_s15 + $0xc8] sm:$0xff] %v1485_v47  ;;  %v1489_v49 = vld [vmem:[%s2630_s8 + $0x78] sm:$0xff] }
 0x1d8   : > { %v1491_v50 = vld [vmem:[%s2630_s8 + $0x80] sm:$0xff]  ;;  %1490 = vst [vmem:[%s1446_s15 + $0xf0] sm:$0xff] %v1489_v49 }
 0x1d9   : > { %1492 = vst [vmem:[%s1446_s15 + $0xf8] sm:$0xff] %v1491_v50 }
 0x1da PF: > { %s12_s13 = sadd.s32 1, %s2140_s13   ;;  %s2693_s9 = smov %s2128_s10 }
 0x1db   : > { %p9_p11 = scmp.ge.s32.totalorder %s12_s13, 4   ;;  %s2694_s10 = smov %s2197_s19 }
 0x1dc   : > { %s2695_s11 = smov %s2136_s12  ;;  %s2696_s12 = smov %s2698_s14 }
 0x1dd   :  { %11 = sbr.rel (!%p9_p11) target bundleno = 3 (0x3), region = 121 }

// kernel: psm_pitch_shift.4
= control target key start
LH: loop header
LB: loop body
LE: loop exit
PB: predicated region body
PF: predicated region fallthrough
CT: control target
= control target key end

     0   :  { %s1968_s9 = smov 0   ;;  %s1970_s10 = smov 0   ;;  %s2392_s0 = inlined_call_operand.vmem [shape: bf16[32,768], index: 0, kind: input, shape index: {}]   ;;  %s2393_s1 = inlined_call_operand.vmem [shape: bf16[768,512], index: 1, kind: input, shape index: {}]   ;;  %s2394_s2 = inlined_call_operand.vmem [shape: f32[32,512], index: 2, kind: output, shape index: {}]  }
   0x1   :  { %s1972_s11 = smov 0   ;;  %s1974_s12 = smov 0  }
   0x2   :  { %s1976_s13 = smov 0  }
   0x3 LB: > { %s21_s14 = sadd.s32 1, %s1947_s12  ;;  %s1537_s15 = sadd.s32 4294967295, %s1951_s13   ;;  %s1951_s13 = sphi %s1976_s13, %s12_s13   ;;  %s1947_s12 = sphi %s1974_s12, %s2399_s12   ;;  %s1943_s11 = sphi %s1972_s11, %s2398_s11   ;;  %s1939_s10 = sphi %s1970_s10, %s2397_s10   ;;  %s1935_s9 = sphi %s1968_s9, %s2396_s9  }
   0x4   : > { %p22_p0 = scmp.ge.s32.totalorder %s21_s14, 2  ;;  %p64_p1 = scmp.ne.s32.totalorder %s1939_s10, %s1935_s9 }
   0x5   : > { %p65_p2 = scmp.eq.s32.totalorder %s1951_s13, 0  ;;  %p96_p4 = scmp.eq.s32.totalorder %s1537_s15, 1 }
   0x6   : > { %s2401_s14 = smov (%p22_p0, %s21_s14), 0  ;;  %s57_s17 = sadd.s32 1, %s1939_s10 }
   0x7   : > { %p66_p3 = por %p65_p2, %p64_p1  ;;  %s54_s16 = ssub.s32 %s1947_s12, %s2401_s14 }
   0x8   : > { %p55_p5 = scmp.eq.s32.totalorder %s54_s16, 0  ;;  %p2003_p6 = por %p96_p4, %p64_p1 }
   0x9   : > { %p1541_p7 = scmp.ge.s32.totalorder %s1951_s13, 2 }
   0xa   : > { %s2008_s19 = scalar_select %p55_p5, %s1939_s10, %s57_s17  }
   0xb   : > { %128 = sbr.rel (%p1541_p7) target bundleno = 70 (0x46), region = 20 }
  0x12   : > { %131 = sbr.rel (!%p66_p3) target bundleno = 70 (0x46), region = 24  ;;  %s133_s20 = sand.u32 (%p66_p3), 1, %s1939_s10  }
  0x13   : > { %s1659_s21 = sshll.u32 (%p66_p3), %s1947_s12, 3  ;;  %s1709_s22 = smul.u32 (%p66_p3), 768, %s133_s20 }
  0x14   : > { %s2016_s25 = scalar_lea.vmem (%p66_p3), %s2393_s1, %s1659_s21 }
  0x15   : > { %v356_v0 = vld [vmem:[%s2016_s25] sm:$0xff] (%p66_p3)  ;;  %v358_v1 = vld [vmem:[%s2016_s25 + $0x10] sm:$0xff] (%p66_p3)  ;;  %s2024_s26 = scalar_lea.vmem (%p66_p3), [#allocation2], %s1709_s22 }
  0x16   : > { %v360_v2 = vld [vmem:[%s2016_s25 + $0x20] sm:$0xff] (%p66_p3)  ;;  %v362_v3 = vld [vmem:[%s2016_s25 + $0x30] sm:$0xff] (%p66_p3)  ;;  %357 = vst [vmem:[%s2024_s26] sm:$0xff] (%p66_p3), %v356_v0  ;;  %359 = vst [vmem:[%s2024_s26 + $0x8] sm:$0xff] (%p66_p3), %v358_v1 }
  0x17   : > { %v364_v4 = vld [vmem:[%s2016_s25 + $0x40] sm:$0xff] (%p66_p3)  ;;  %v366_v5 = vld [vmem:[%s2016_s25 + $0x50] sm:$0xff] (%p66_p3)  ;;  %361 = vst [vmem:[%s2024_s26 + $0x10] sm:$0xff] (%p66_p3), %v360_v2  ;;  %363 = vst [vmem:[%s2024_s26 + $0x18] sm:$0xff] (%p66_p3), %v362_v3 }
  0x18   : > { %365 = vst [vmem:[%s2024_s26 + $0x20] sm:$0xff] (%p66_p3), %v364_v4  ;;  %367 = vst [vmem:[%s2024_s26 + $0x28] sm:$0xff] (%p66_p3), %v366_v5  ;;  %v368_v6 = vld [vmem:[%s2016_s25 + $0x60] sm:$0xff] (%p66_p3)  ;;  %v370_v7 = vld [vmem:[%s2016_s25 + $0x70] sm:$0xff] (%p66_p3) }
  0x19   : > { %v372_v8 = vld [vmem:[%s2016_s25 + $0x80] sm:$0xff]  ;;  %369 = vst [vmem:[%s2024_s26 + $0x30] sm:$0xff] %v368_v6  ;;  %371 = vst [vmem:[%s2024_s26 + $0x38] sm:$0xff] %v370_v7  ;;  %v374_v9 = vld [vmem:[%s2016_s25 + $0x90] sm:$0xff] }
  0x1a   : > { %373 = vst [vmem:[%s2024_s26 + $0x40] sm:$0xff] %v372_v8  ;;  %v376_v10 = vld [vmem:[%s2016_s25 + $0xa0] sm:$0xff]  ;;  %v378_v11 = vld [vmem:[%s2016_s25 + $0xb0] sm:$0xff]  ;;  %375 = vst [vmem:[%s2024_s26 + $0x48] sm:$0xff] %v374_v9 }
  0x1b   : > { %377 = vst [vmem:[%s2024_s26 + $0x50] sm:$0xff] %v376_v10  ;;  %379 = vst [vmem:[%s2024_s26 + $0x58] sm:$0xff] %v378_v11  ;;  %v380_v12 = vld [vmem:[%s2016_s25 + $0xc0] sm:$0xff]  ;;  %v382_v13 = vld [vmem:[%s2016_s25 + $0xd0] sm:$0xff] }
  0x1c   : > { %v384_v14 = vld [vmem:[%s2016_s25 + $0xe0] sm:$0xff]  ;;  %381 = vst [vmem:[%s2024_s26 + $0x60] sm:$0xff] %v380_v12  ;;  %383 = vst [vmem:[%s2024_s26 + $0x68] sm:$0xff] %v382_v13  ;;  %v386_v15 = vld [vmem:[%s2016_s25 + $0xf0] sm:$0xff] }
  0x1d   : > { %385 = vst [vmem:[%s2024_s26 + $0x70] sm:$0xff] %v384_v14  ;;  %v388_v16 = vld [vmem:[%s2016_s25 + $0x100] sm:$0xff]  ;;  %v390_v17 = vld [vmem:[%s2016_s25 + $0x110] sm:$0xff]  ;;  %387 = vst [vmem:[%s2024_s26 + $0x78] sm:$0xff] %v386_v15 }
  0x1e   : > { %389 = vst [vmem:[%s2024_s26 + $0x80] sm:$0xff] %v388_v16  ;;  %391 = vst [vmem:[%s2024_s26 + $0x88] sm:$0xff] %v390_v17  ;;  %v392_v18 = vld [vmem:[%s2016_s25 + $0x120] sm:$0xff]  ;;  %v394_v19 = vld [vmem:[%s2016_s25 + $0x130] sm:$0xff] }
  0x1f   : > { %v396_v20 = vld [vmem:[%s2016_s25 + $0x140] sm:$0xff]  ;;  %393 = vst [vmem:[%s2024_s26 + $0x90] sm:$0xff] %v392_v18  ;;  %395 = vst [vmem:[%s2024_s26 + $0x98] sm:$0xff] %v394_v19  ;;  %v398_v21 = vld [vmem:[%s2016_s25 + $0x150] sm:$0xff] }
  0x20   : > { %397 = vst [vmem:[%s2024_s26 + $0xa0] sm:$0xff] %v396_v20  ;;  %v400_v22 = vld [vmem:[%s2016_s25 + $0x160] sm:$0xff]  ;;  %v402_v23 = vld [vmem:[%s2016_s25 + $0x170] sm:$0xff]  ;;  %399 = vst [vmem:[%s2024_s26 + $0xa8] sm:$0xff] %v398_v21 }
  0x21   : > { %401 = vst [vmem:[%s2024_s26 + $0xb0] sm:$0xff] %v400_v22  ;;  %403 = vst [vmem:[%s2024_s26 + $0xb8] sm:$0xff] %v402_v23  ;;  %v404_v24 = vld [vmem:[%s2016_s25 + $0x180] sm:$0xff]  ;;  %v406_v25 = vld [vmem:[%s2016_s25 + $0x190] sm:$0xff] }
  0x22   : > { %v408_v26 = vld [vmem:[%s2016_s25 + $0x1a0] sm:$0xff]  ;;  %405 = vst [vmem:[%s2024_s26 + $0xc0] sm:$0xff] %v404_v24  ;;  %407 = vst [vmem:[%s2024_s26 + $0xc8] sm:$0xff] %v406_v25  ;;  %v410_v27 = vld [vmem:[%s2016_s25 + $0x1b0] sm:$0xff] }
  0x23   : > { %409 = vst [vmem:[%s2024_s26 + $0xd0] sm:$0xff] %v408_v26  ;;  %v412_v28 = vld [vmem:[%s2016_s25 + $0x1c0] sm:$0xff]  ;;  %v414_v29 = vld [vmem:[%s2016_s25 + $0x1d0] sm:$0xff]  ;;  %411 = vst [vmem:[%s2024_s26 + $0xd8] sm:$0xff] %v410_v27 }
  0x24   : > { %413 = vst [vmem:[%s2024_s26 + $0xe0] sm:$0xff] %v412_v28  ;;  %415 = vst [vmem:[%s2024_s26 + $0xe8] sm:$0xff] %v414_v29  ;;  %v416_v30 = vld [vmem:[%s2016_s25 + $0x1e0] sm:$0xff]  ;;  %v418_v31 = vld [vmem:[%s2016_s25 + $0x1f0] sm:$0xff] }
  0x25   : > { %v420_v32 = vld [vmem:[%s2016_s25 + $0x200] sm:$0xff]  ;;  %417 = vst [vmem:[%s2024_s26 + $0xf0] sm:$0xff] %v416_v30  ;;  %419 = vst [vmem:[%s2024_s26 + $0xf8] sm:$0xff] %v418_v31  ;;  %v422_v33 = vld [vmem:[%s2016_s25 + $0x210] sm:$0xff] }
  0x26   : > { %421 = vst [vmem:[%s2024_s26 + $0x100] sm:$0xff] %v420_v32  ;;  %v424_v34 = vld [vmem:[%s2016_s25 + $0x220] sm:$0xff]  ;;  %v426_v35 = vld [vmem:[%s2016_s25 + $0x230] sm:$0xff]  ;;  %423 = vst [vmem:[%s2024_s26 + $0x108] sm:$0xff] %v422_v33 }
  0x27   : > { %425 = vst [vmem:[%s2024_s26 + $0x110] sm:$0xff] %v424_v34  ;;  %427 = vst [vmem:[%s2024_s26 + $0x118] sm:$0xff] %v426_v35  ;;  %v428_v36 = vld [vmem:[%s2016_s25 + $0x240] sm:$0xff]  ;;  %v430_v37 = vld [vmem:[%s2016_s25 + $0x250] sm:$0xff] }
  0x28   : > { %v432_v38 = vld [vmem:[%s2016_s25 + $0x260] sm:$0xff]  ;;  %429 = vst [vmem:[%s2024_s26 + $0x120] sm:$0xff] %v428_v36  ;;  %431 = vst [vmem:[%s2024_s26 + $0x128] sm:$0xff] %v430_v37  ;;  %v434_v39 = vld [vmem:[%s2016_s25 + $0x270] sm:$0xff] }
  0x29   : > { %433 = vst [vmem:[%s2024_s26 + $0x130] sm:$0xff] %v432_v38  ;;  %v436_v40 = vld [vmem:[%s2016_s25 + $0x280] sm:$0xff]  ;;  %v438_v41 = vld [vmem:[%s2016_s25 + $0x290] sm:$0xff]  ;;  %435 = vst [vmem:[%s2024_s26 + $0x138] sm:$0xff] %v434_v39 }
  0x2a   : > { %437 = vst [vmem:[%s2024_s26 + $0x140] sm:$0xff] %v436_v40  ;;  %439 = vst [vmem:[%s2024_s26 + $0x148] sm:$0xff] %v438_v41  ;;  %v440_v42 = vld [vmem:[%s2016_s25 + $0x2a0] sm:$0xff]  ;;  %v442_v43 = vld [vmem:[%s2016_s25 + $0x2b0] sm:$0xff] }
  0x2b   : > { %v444_v44 = vld [vmem:[%s2016_s25 + $0x2c0] sm:$0xff]  ;;  %441 = vst [vmem:[%s2024_s26 + $0x150] sm:$0xff] %v440_v42  ;;  %443 = vst [vmem:[%s2024_s26 + $0x158] sm:$0xff] %v442_v43  ;;  %v446_v45 = vld [vmem:[%s2016_s25 + $0x2d0] sm:$0xff] }
  0x2c   : > { %445 = vst [vmem:[%s2024_s26 + $0x160] sm:$0xff] %v444_v44  ;;  %v448_v46 = vld [vmem:[%s2016_s25 + $0x2e0] sm:$0xff]  ;;  %v450_v47 = vld [vmem:[%s2016_s25 + $0x2f0] sm:$0xff]  ;;  %447 = vst [vmem:[%s2024_s26 + $0x168] sm:$0xff] %v446_v45 }
  0x2d   : > { %449 = vst [vmem:[%s2024_s26 + $0x170] sm:$0xff] %v448_v46  ;;  %451 = vst [vmem:[%s2024_s26 + $0x178] sm:$0xff] %v450_v47  ;;  %v452_v48 = vld [vmem:[%s2016_s25 + $0x300] sm:$0xff]  ;;  %v454_v49 = vld [vmem:[%s2016_s25 + $0x310] sm:$0xff] }
  0x2e   : > { %v456_v50 = vld [vmem:[%s2016_s25 + $0x320] sm:$0xff]  ;;  %453 = vst [vmem:[%s2024_s26 + $0x180] sm:$0xff] %v452_v48  ;;  %455 = vst [vmem:[%s2024_s26 + $0x188] sm:$0xff] %v454_v49  ;;  %v458_v51 = vld [vmem:[%s2016_s25 + $0x330] sm:$0xff] }
  0x2f   : > { %457 = vst [vmem:[%s2024_s26 + $0x190] sm:$0xff] %v456_v50  ;;  %v460_v52 = vld [vmem:[%s2016_s25 + $0x340] sm:$0xff]  ;;  %v462_v53 = vld [vmem:[%s2016_s25 + $0x350] sm:$0xff]  ;;  %459 = vst [vmem:[%s2024_s26 + $0x198] sm:$0xff] %v458_v51 }
  0x30   : > { %461 = vst [vmem:[%s2024_s26 + $0x1a0] sm:$0xff] %v460_v52  ;;  %463 = vst [vmem:[%s2024_s26 + $0x1a8] sm:$0xff] %v462_v53  ;;  %v464_v54 = vld [vmem:[%s2016_s25 + $0x360] sm:$0xff]  ;;  %v466_v55 = vld [vmem:[%s2016_s25 + $0x370] sm:$0xff] }
  0x31   : > { %v468_v56 = vld [vmem:[%s2016_s25 + $0x380] sm:$0xff]  ;;  %465 = vst [vmem:[%s2024_s26 + $0x1b0] sm:$0xff] %v464_v54  ;;  %467 = vst [vmem:[%s2024_s26 + $0x1b8] sm:$0xff] %v466_v55  ;;  %v470_v57 = vld [vmem:[%s2016_s25 + $0x390] sm:$0xff] }
  0x32   : > { %469 = vst [vmem:[%s2024_s26 + $0x1c0] sm:$0xff] %v468_v56  ;;  %v472_v58 = vld [vmem:[%s2016_s25 + $0x3a0] sm:$0xff]  ;;  %v474_v59 = vld [vmem:[%s2016_s25 + $0x3b0] sm:$0xff]  ;;  %471 = vst [vmem:[%s2024_s26 + $0x1c8] sm:$0xff] %v470_v57 }
  0x33   : > { %473 = vst [vmem:[%s2024_s26 + $0x1d0] sm:$0xff] %v472_v58  ;;  %475 = vst [vmem:[%s2024_s26 + $0x1d8] sm:$0xff] %v474_v59  ;;  %v476_v60 = vld [vmem:[%s2016_s25 + $0x3c0] sm:$0xff]  ;;  %v478_v61 = vld [vmem:[%s2016_s25 + $0x3d0] sm:$0xff] }
  0x34   : > { %v480_v62 = vld [vmem:[%s2016_s25 + $0x3e0] sm:$0xff]  ;;  %477 = vst [vmem:[%s2024_s26 + $0x1e0] sm:$0xff] %v476_v60  ;;  %479 = vst [vmem:[%s2024_s26 + $0x1e8] sm:$0xff] %v478_v61  ;;  %v482_v63 = vld [vmem:[%s2016_s25 + $0x3f0] sm:$0xff] }
  0x35   : > { %481 = vst [vmem:[%s2024_s26 + $0x1f0] sm:$0xff] %v480_v62  ;;  %v484_v0 = vld [vmem:[%s2016_s25 + $0x400] sm:$0xff]  ;;  %v486_v1 = vld [vmem:[%s2016_s25 + $0x410] sm:$0xff]  ;;  %483 = vst [vmem:[%s2024_s26 + $0x1f8] sm:$0xff] %v482_v63 }
  0x36   : > { %485 = vst [vmem:[%s2024_s26 + $0x200] sm:$0xff] %v484_v0  ;;  %487 = vst [vmem:[%s2024_s26 + $0x208] sm:$0xff] %v486_v1  ;;  %v488_v2 = vld [vmem:[%s2016_s25 + $0x420] sm:$0xff]  ;;  %v490_v3 = vld [vmem:[%s2016_s25 + $0x430] sm:$0xff] }
  0x37   : > { %v492_v4 = vld [vmem:[%s2016_s25 + $0x440] sm:$0xff]  ;;  %489 = vst [vmem:[%s2024_s26 + $0x210] sm:$0xff] %v488_v2  ;;  %491 = vst [vmem:[%s2024_s26 + $0x218] sm:$0xff] %v490_v3  ;;  %v494_v5 = vld [vmem:[%s2016_s25 + $0x450] sm:$0xff] }
  0x38   : > { %493 = vst [vmem:[%s2024_s26 + $0x220] sm:$0xff] %v492_v4  ;;  %v496_v6 = vld [vmem:[%s2016_s25 + $0x460] sm:$0xff]  ;;  %v498_v7 = vld [vmem:[%s2016_s25 + $0x470] sm:$0xff]  ;;  %495 = vst [vmem:[%s2024_s26 + $0x228] sm:$0xff] %v494_v5 }
  0x39   : > { %497 = vst [vmem:[%s2024_s26 + $0x230] sm:$0xff] %v496_v6  ;;  %499 = vst [vmem:[%s2024_s26 + $0x238] sm:$0xff] %v498_v7  ;;  %v500_v8 = vld [vmem:[%s2016_s25 + $0x480] sm:$0xff]  ;;  %v502_v9 = vld [vmem:[%s2016_s25 + $0x490] sm:$0xff] }
  0x3a   : > { %v504_v10 = vld [vmem:[%s2016_s25 + $0x4a0] sm:$0xff]  ;;  %501 = vst [vmem:[%s2024_s26 + $0x240] sm:$0xff] %v500_v8  ;;  %503 = vst [vmem:[%s2024_s26 + $0x248] sm:$0xff] %v502_v9  ;;  %v506_v11 = vld [vmem:[%s2016_s25 + $0x4b0] sm:$0xff] }
  0x3b   : > { %505 = vst [vmem:[%s2024_s26 + $0x250] sm:$0xff] %v504_v10  ;;  %v508_v12 = vld [vmem:[%s2016_s25 + $0x4c0] sm:$0xff]  ;;  %v510_v13 = vld [vmem:[%s2016_s25 + $0x4d0] sm:$0xff]  ;;  %507 = vst [vmem:[%s2024_s26 + $0x258] sm:$0xff] %v506_v11 }
  0x3c   : > { %509 = vst [vmem:[%s2024_s26 + $0x260] sm:$0xff] %v508_v12  ;;  %511 = vst [vmem:[%s2024_s26 + $0x268] sm:$0xff] %v510_v13  ;;  %v512_v14 = vld [vmem:[%s2016_s25 + $0x4e0] sm:$0xff]  ;;  %v514_v15 = vld [vmem:[%s2016_s25 + $0x4f0] sm:$0xff] }
  0x3d   : > { %v516_v16 = vld [vmem:[%s2016_s25 + $0x500] sm:$0xff]  ;;  %513 = vst [vmem:[%s2024_s26 + $0x270] sm:$0xff] %v512_v14  ;;  %515 = vst [vmem:[%s2024_s26 + $0x278] sm:$0xff] %v514_v15  ;;  %v518_v17 = vld [vmem:[%s2016_s25 + $0x510] sm:$0xff] }
  0x3e   : > { %517 = vst [vmem:[%s2024_s26 + $0x280] sm:$0xff] %v516_v16  ;;  %v520_v18 = vld [vmem:[%s2016_s25 + $0x520] sm:$0xff]  ;;  %v522_v19 = vld [vmem:[%s2016_s25 + $0x530] sm:$0xff]  ;;  %519 = vst [vmem:[%s2024_s26 + $0x288] sm:$0xff] %v518_v17 }
  0x3f   : > { %521 = vst [vmem:[%s2024_s26 + $0x290] sm:$0xff] %v520_v18  ;;  %523 = vst [vmem:[%s2024_s26 + $0x298] sm:$0xff] %v522_v19  ;;  %v524_v20 = vld [vmem:[%s2016_s25 + $0x540] sm:$0xff]  ;;  %v526_v21 = vld [vmem:[%s2016_s25 + $0x550] sm:$0xff] }
  0x40   : > { %v528_v22 = vld [vmem:[%s2016_s25 + $0x560] sm:$0xff]  ;;  %525 = vst [vmem:[%s2024_s26 + $0x2a0] sm:$0xff] %v524_v20  ;;  %527 = vst [vmem:[%s2024_s26 + $0x2a8] sm:$0xff] %v526_v21  ;;  %v530_v23 = vld [vmem:[%s2016_s25 + $0x570] sm:$0xff] }
  0x41   : > { %529 = vst [vmem:[%s2024_s26 + $0x2b0] sm:$0xff] %v528_v22  ;;  %v532_v24 = vld [vmem:[%s2016_s25 + $0x580] sm:$0xff]  ;;  %v534_v25 = vld [vmem:[%s2016_s25 + $0x590] sm:$0xff]  ;;  %531 = vst [vmem:[%s2024_s26 + $0x2b8] sm:$0xff] %v530_v23 }
  0x42   : > { %533 = vst [vmem:[%s2024_s26 + $0x2c0] sm:$0xff] %v532_v24  ;;  %535 = vst [vmem:[%s2024_s26 + $0x2c8] sm:$0xff] %v534_v25  ;;  %v536_v26 = vld [vmem:[%s2016_s25 + $0x5a0] sm:$0xff]  ;;  %v538_v27 = vld [vmem:[%s2016_s25 + $0x5b0] sm:$0xff] }
  0x43   : > { %v540_v28 = vld [vmem:[%s2016_s25 + $0x5c0] sm:$0xff]  ;;  %537 = vst [vmem:[%s2024_s26 + $0x2d0] sm:$0xff] %v536_v26  ;;  %539 = vst [vmem:[%s2024_s26 + $0x2d8] sm:$0xff] %v538_v27  ;;  %v542_v29 = vld [vmem:[%s2016_s25 + $0x5d0] sm:$0xff] }
  0x44   : > { %541 = vst [vmem:[%s2024_s26 + $0x2e0] sm:$0xff] %v540_v28  ;;  %v544_v30 = vld [vmem:[%s2016_s25 + $0x5e0] sm:$0xff]  ;;  %v546_v31 = vld [vmem:[%s2016_s25 + $0x5f0] sm:$0xff]  ;;  %543 = vst [vmem:[%s2024_s26 + $0x2e8] sm:$0xff] %v542_v29 }
  0x45   : > { %545 = vst [vmem:[%s2024_s26 + $0x2f0] sm:$0xff] %v544_v30  ;;  %547 = vst [vmem:[%s2024_s26 + $0x2f8] sm:$0xff] %v546_v31 }
  0x46 PF: > { %p1544_p8 = scmp.ge.s32.totalorder %s1951_s13, 1  ;;  %p552_p9 = scmp.lt.s32.totalorder %s1951_s13, 3 }
  0x48   : > { %p553_p10 = pnand %p1544_p8, %p552_p9 }
  0x49   : > { %s559_s27 = sand.u32 (!%p553_p10), 1, %s1935_s9   ;;  %v1849_v32 = vld [vmem:[%s2392_s0 + $0x4] ss:$24 sps:$4 sm:$0xff] (!%p553_p10)  }
  0x4a   : > { %556 = sbr.rel (%p553_p10) target bundleno = 434 (0x1b2), region = 62  ;;  %v1852_v33 = vld [vmem:[%s2392_s0 + $0xc] ss:$24 sps:$4 sm:$0xff] (!%p553_p10)   ;;  %1275 = vmatprep.mubr.bf16.mxu1 (!%p553_p10), %v1849_v32 }
  0x4b   : > { %s1710_s28 = smul.u32 (!%p553_p10), 768, %s559_s27  ;;  %1328 = vmatprep.mubr.bf16.mxu0 (!%p553_p10), %v1852_v33 }
  0x4d   : > { %s2223_s5 = scalar_lea.vmem (!%p553_p10), [#allocation2], %s1710_s28 }
  0x4e   : > { %v1751_v34 = vld [vmem:[%s2223_s5 + $0x4] ss:$8 sps:$4 sm:$0xff] (!%p553_p10)   ;;  %v1755_v36 = vld [vmem:[%s2223_s5] ss:$8 sps:$4 sm:$0xff] (!%p553_p10)   ;;  %v1757_v38 = vld [vmem:[%s2223_s5 + $0x14] ss:$8 sps:$4 sm:$0xff] (!%p553_p10)  }
  0x4f   : > { %v1753_v35 = vld [vmem:[%s2223_s5 + $0x104] ss:$8 sps:$4 sm:$0xff] (!%p553_p10)   ;;  %1243 = vmatprep.subr.bf16.mxu1 (!%p553_p10), %v1751_v34  ;;  %v1756_v37 = vld [vmem:[%s2223_s5 + $0x100] ss:$8 sps:$4 sm:$0xff] (!%p553_p10)   ;;  %v1759_v39 = vld [vmem:[%s2223_s5 + $0x114] ss:$8 sps:$4 sm:$0xff] (!%p553_p10)  }
  0x50   : > { %1296 = vmatprep.subr.bf16.mxu0 (!%p553_p10), %v1753_v35  ;;  %1244 = vmatpush1.bf16.msra.mxu1 (!%p553_p10), %v1755_v36  ;;  %v1761_v40 = vld [vmem:[%s2223_s5 + $0x10] ss:$8 sps:$4 sm:$0xff] (!%p553_p10)   ;;  %v1763_v42 = vld [vmem:[%s2223_s5 + $0x24] ss:$8 sps:$4 sm:$0xff] (!%p553_p10)   ;;  %v1767_v44 = vld [vmem:[%s2223_s5 + $0x20] ss:$8 sps:$4 sm:$0xff] (!%p553_p10)  }
  0x51   : > { %1297 = vmatpush1.bf16.msra.mxu0 %v1756_v37  ;;  %1245 = vmatprep.subr.bf16.mxu1 %v1757_v38  ;;  %v1762_v41 = vld [vmem:[%s2223_s5 + $0x110] ss:$8 sps:$4 sm:$0xff]   ;;  %v1765_v43 = vld [vmem:[%s2223_s5 + $0x124] ss:$8 sps:$4 sm:$0xff]   ;;  %v1768_v45 = vld [vmem:[%s2223_s5 + $0x120] ss:$8 sps:$4 sm:$0xff]  }
  0x52   : > { %1298 = vmatprep.subr.bf16.mxu0 %v1759_v39  ;;  %v1769_v46 = vld [vmem:[%s2223_s5 + $0x34] ss:$8 sps:$4 sm:$0xff]   ;;  %v1773_v48 = vld [vmem:[%s2223_s5 + $0x30] ss:$8 sps:$4 sm:$0xff]   ;;  %v1775_v50 = vld [vmem:[%s2223_s5 + $0x44] ss:$8 sps:$4 sm:$0xff]  }
  0x53   : > { %v1771_v47 = vld [vmem:[%s2223_s5 + $0x134] ss:$8 sps:$4 sm:$0xff]   ;;  %v1774_v49 = vld [vmem:[%s2223_s5 + $0x130] ss:$8 sps:$4 sm:$0xff]   ;;  %v1777_v51 = vld [vmem:[%s2223_s5 + $0x144] ss:$8 sps:$4 sm:$0xff]  }
  0x54   : > { %1246 = vmatpush1.bf16.msra.mxu1 %v1761_v40  ;;  %v1779_v52 = vld [vmem:[%s2223_s5 + $0x40] ss:$8 sps:$4 sm:$0xff]   ;;  %v1781_v54 = vld [vmem:[%s2223_s5 + $0x54] ss:$8 sps:$4 sm:$0xff]   ;;  %v1785_v56 = vld [vmem:[%s2223_s5 + $0x50] ss:$8 sps:$4 sm:$0xff]  }
  0x55   : > { %1299 = vmatpush1.bf16.msra.mxu0 %v1762_v41  ;;  %1247 = vmatprep.subr.bf16.mxu1 %v1763_v42  ;;  %v1780_v53 = vld [vmem:[%s2223_s5 + $0x140] ss:$8 sps:$4 sm:$0xff]   ;;  %v1783_v55 = vld [vmem:[%s2223_s5 + $0x154] ss:$8 sps:$4 sm:$0xff]   ;;  %v1786_v57 = vld [vmem:[%s2223_s5 + $0x150] ss:$8 sps:$4 sm:$0xff]  }
  0x56   : > { %1300 = vmatprep.subr.bf16.mxu0 %v1765_v43  ;;  %v1787_v58 = vld [vmem:[%s2223_s5 + $0x64] ss:$8 sps:$4 sm:$0xff]   ;;  %v1791_v60 = vld [vmem:[%s2223_s5 + $0x60] ss:$8 sps:$4 sm:$0xff]   ;;  %v1793_v62 = vld [vmem:[%s2223_s5 + $0x74] ss:$8 sps:$4 sm:$0xff]  }
  0x57   : > { %v1789_v59 = vld [vmem:[%s2223_s5 + $0x164] ss:$8 sps:$4 sm:$0xff]   ;;  %v1792_v61 = vld [vmem:[%s2223_s5 + $0x160] ss:$8 sps:$4 sm:$0xff]   ;;  %v1795_v63 = vld [vmem:[%s2223_s5 + $0x174] ss:$8 sps:$4 sm:$0xff]  }
  0x58   : > { %1248 = vmatpush1.bf16.msra.mxu1 %v1767_v44  ;;  %v1797_v0 = vld [vmem:[%s2223_s5 + $0x70] ss:$8 sps:$4 sm:$0xff]   ;;  %v1799_v2 = vld [vmem:[%s2223_s5 + $0x84] ss:$8 sps:$4 sm:$0xff]   ;;  %v1803_v4 = vld [vmem:[%s2223_s5 + $0x80] ss:$8 sps:$4 sm:$0xff]  }
  0x59   : > { %1301 = vmatpush1.bf16.msra.mxu0 %v1768_v45  ;;  %1249 = vmatprep.subr.bf16.mxu1 %v1769_v46  ;;  %v1798_v1 = vld [vmem:[%s2223_s5 + $0x170] ss:$8 sps:$4 sm:$0xff]   ;;  %v1801_v3 = vld [vmem:[%s2223_s5 + $0x184] ss:$8 sps:$4 sm:$0xff]   ;;  %v1804_v5 = vld [vmem:[%s2223_s5 + $0x180] ss:$8 sps:$4 sm:$0xff]  }
  0x5a   : > { %1302 = vmatprep.subr.bf16.mxu0 %v1771_v47  ;;  %v1805_v6 = vld [vmem:[%s2223_s5 + $0x94] ss:$8 sps:$4 sm:$0xff]   ;;  %v1809_v8 = vld [vmem:[%s2223_s5 + $0x90] ss:$8 sps:$4 sm:$0xff]   ;;  %v1811_v10 = vld [vmem:[%s2223_s5 + $0xa4] ss:$8 sps:$4 sm:$0xff]  }
  0x5b   : > { %v1807_v7 = vld [vmem:[%s2223_s5 + $0x194] ss:$8 sps:$4 sm:$0xff]   ;;  %v1810_v9 = vld [vmem:[%s2223_s5 + $0x190] ss:$8 sps:$4 sm:$0xff]   ;;  %v1813_v11 = vld [vmem:[%s2223_s5 + $0x1a4] ss:$8 sps:$4 sm:$0xff]  }
  0x5c   : > { %1250 = vmatpush1.bf16.msra.mxu1 %v1773_v48  ;;  %v1815_v12 = vld [vmem:[%s2223_s5 + $0xa0] ss:$8 sps:$4 sm:$0xff]   ;;  %v1817_v14 = vld [vmem:[%s2223_s5 + $0xb4] ss:$8 sps:$4 sm:$0xff]   ;;  %v1821_v16 = vld [vmem:[%s2223_s5 + $0xb0] ss:$8 sps:$4 sm:$0xff]  }
  0x5d   : > { %1303 = vmatpush1.bf16.msra.mxu0 %v1774_v49  ;;  %1251 = vmatprep.subr.bf16.mxu1 %v1775_v50  ;;  %v1816_v13 = vld [vmem:[%s2223_s5 + $0x1a0] ss:$8 sps:$4 sm:$0xff]   ;;  %v1819_v15 = vld [vmem:[%s2223_s5 + $0x1b4] ss:$8 sps:$4 sm:$0xff]   ;;  %v1822_v17 = vld [vmem:[%s2223_s5 + $0x1b0] ss:$8 sps:$4 sm:$0xff]  }
  0x5e   : > { %1304 = vmatprep.subr.bf16.mxu0 %v1777_v51  ;;  %v1823_v18 = vld [vmem:[%s2223_s5 + $0xc4] ss:$8 sps:$4 sm:$0xff]   ;;  %v1827_v20 = vld [vmem:[%s2223_s5 + $0xc0] ss:$8 sps:$4 sm:$0xff]   ;;  %v1829_v22 = vld [vmem:[%s2223_s5 + $0xd4] ss:$8 sps:$4 sm:$0xff]  }
  0x5f   : > { %v1825_v19 = vld [vmem:[%s2223_s5 + $0x1c4] ss:$8 sps:$4 sm:$0xff]   ;;  %v1828_v21 = vld [vmem:[%s2223_s5 + $0x1c0] ss:$8 sps:$4 sm:$0xff]   ;;  %v1831_v23 = vld [vmem:[%s2223_s5 + $0x1d4] ss:$8 sps:$4 sm:$0xff]  }
  0x60   : > { %1252 = vmatpush1.bf16.msra.mxu1 %v1779_v52  ;;  %v1833_v24 = vld [vmem:[%s2223_s5 + $0xd0] ss:$8 sps:$4 sm:$0xff]   ;;  %v1835_v26 = vld [vmem:[%s2223_s5 + $0xe4] ss:$8 sps:$4 sm:$0xff]   ;;  %v1839_v28 = vld [vmem:[%s2223_s5 + $0xe0] ss:$8 sps:$4 sm:$0xff]  }
  0x61   : > { %1305 = vmatpush1.bf16.msra.mxu0 %v1780_v53  ;;  %1253 = vmatprep.subr.bf16.mxu1 %v1781_v54  ;;  %v1834_v25 = vld [vmem:[%s2223_s5 + $0x1d0] ss:$8 sps:$4 sm:$0xff]   ;;  %v1837_v27 = vld [vmem:[%s2223_s5 + $0x1e4] ss:$8 sps:$4 sm:$0xff]   ;;  %v1840_v29 = vld [vmem:[%s2223_s5 + $0x1e0] ss:$8 sps:$4 sm:$0xff]  }
  0x62   : > { %1306 = vmatprep.subr.bf16.mxu0 %v1783_v55  ;;  %v1841_v30 = vld [vmem:[%s2223_s5 + $0xf4] ss:$8 sps:$4 sm:$0xff]   ;;  %v1845_v32 = vld [vmem:[%s2223_s5 + $0xf0] ss:$8 sps:$4 sm:$0xff]   ;;  %v1855_v34 = vld [vmem:[%s2223_s5 + $0x204] ss:$8 sps:$4 sm:$0xff]  }
  0x63   : > { %v1843_v31 = vld [vmem:[%s2223_s5 + $0x1f4] ss:$8 sps:$4 sm:$0xff]   ;;  %v1846_v33 = vld [vmem:[%s2223_s5 + $0x1f0] ss:$8 sps:$4 sm:$0xff]   ;;  %v1850_v36 = vld [vmem:[%s2392_s0 + $0x8] ss:$24 sps:$4 sm:$0xff]  }
  0x64   : > { %1254 = vmatpush1.bf16.msra.mxu1 %v1785_v56  ;;  %v1847_v35 = vld [vmem:[%s2392_s0] ss:$24 sps:$4 sm:$0xff]   ;;  %v1858_v38 = vld [vmem:[%s2223_s5 + $0x214] ss:$8 sps:$4 sm:$0xff]   ;;  %v1861_v42 = vld [vmem:[%s2223_s5 + $0x224] ss:$8 sps:$4 sm:$0xff]  }
  0x65   : > { %1307 = vmatpush1.bf16.msra.mxu0 %v1786_v57  ;;  %1255 = vmatprep.subr.bf16.mxu1 %v1787_v58  ;;  %v1853_v37 = vld [vmem:[%s2223_s5 + $0x200] ss:$8 sps:$4 sm:$0xff]   ;;  %v1892_v39 = vld [vmem:[%s2392_s0 + $0x34] ss:$24 sps:$4 sm:$0xff]   ;;  %v1856_v41 = vld [vmem:[%s2223_s5 + $0x210] ss:$8 sps:$4 sm:$0xff]  }
  0x66   : > { %1308 = vmatprep.subr.bf16.mxu0 %v1789_v59  ;;  %v1894_v40 = vld [vmem:[%s2392_s0 + $0x3c] ss:$24 sps:$4 sm:$0xff]   ;;  %v1899_v43 = vld [vmem:[%s2392_s0 + $0x30] ss:$24 sps:$4 sm:$0xff]   ;;  %v1867_v50 = vld [vmem:[%s2223_s5 + $0x244] ss:$8 sps:$4 sm:$0xff]  }
  0x67   : > { %v1900_v44 = vld [vmem:[%s2392_s0 + $0x38] ss:$24 sps:$4 sm:$0xff]   ;;  %v1859_v45 = vld [vmem:[%s2223_s5 + $0x220] ss:$8 sps:$4 sm:$0xff]   ;;  %v1864_v46 = vld [vmem:[%s2223_s5 + $0x234] ss:$8 sps:$4 sm:$0xff]  }
  0x68   : > { %1256 = vmatpush1.bf16.msra.mxu1 %v1791_v60  ;;  %v1909_v47 = vld [vmem:[%s2392_s0 + $0x14] ss:$24 sps:$4 sm:$0xff]   ;;  %v1912_v48 = vld [vmem:[%s2392_s0 + $0x44] ss:$24 sps:$4 sm:$0xff]   ;;  %v1862_v49 = vld [vmem:[%s2223_s5 + $0x230] ss:$8 sps:$4 sm:$0xff]  }
  0x69   : > { %1309 = vmatpush1.bf16.msra.mxu0 %v1792_v61  ;;  %1257 = vmatprep.subr.bf16.mxu1 %v1793_v62  ;;  %v1865_v51 = vld [vmem:[%s2223_s5 + $0x240] ss:$8 sps:$4 sm:$0xff]   ;;  %v1870_v52 = vld [vmem:[%s2223_s5 + $0x254] ss:$8 sps:$4 sm:$0xff]   ;;  %v1868_v53 = vld [vmem:[%s2223_s5 + $0x250] ss:$8 sps:$4 sm:$0xff]  }
  0x6a   : > { %1310 = vmatprep.subr.bf16.mxu0 %v1795_v63  ;;  %v1873_v54 = vld [vmem:[%s2223_s5 + $0x264] ss:$8 sps:$4 sm:$0xff]   ;;  %v1871_v55 = vld [vmem:[%s2223_s5 + $0x260] ss:$8 sps:$4 sm:$0xff]   ;;  %v1876_v56 = vld [vmem:[%s2223_s5 + $0x274] ss:$8 sps:$4 sm:$0xff]  }
  0x6b   : > { %v1874_v57 = vld [vmem:[%s2223_s5 + $0x270] ss:$8 sps:$4 sm:$0xff]   ;;  %v1879_v58 = vld [vmem:[%s2223_s5 + $0x284] ss:$8 sps:$4 sm:$0xff]   ;;  %v1877_v59 = vld [vmem:[%s2223_s5 + $0x280] ss:$8 sps:$4 sm:$0xff]  }
  0x6c   : > { %1258 = vmatpush1.bf16.msra.mxu1 %v1797_v0  ;;  %v1882_v60 = vld [vmem:[%s2223_s5 + $0x294] ss:$8 sps:$4 sm:$0xff]   ;;  %v1880_v61 = vld [vmem:[%s2223_s5 + $0x290] ss:$8 sps:$4 sm:$0xff]   ;;  %v1885_v62 = vld [vmem:[%s2223_s5 + $0x2a4] ss:$8 sps:$4 sm:$0xff]  }
  0x6d   : > { %1311 = vmatpush1.bf16.msra.mxu0 %v1798_v1  ;;  %1259 = vmatprep.subr.bf16.mxu1 %v1799_v2  ;;  %v1883_v63 = vld [vmem:[%s2223_s5 + $0x2a0] ss:$8 sps:$4 sm:$0xff]   ;;  %v1888_v0 = vld [vmem:[%s2223_s5 + $0x2b4] ss:$8 sps:$4 sm:$0xff]   ;;  %v1886_v1 = vld [vmem:[%s2223_s5 + $0x2b0] ss:$8 sps:$4 sm:$0xff]  }
  0x6e   : > { %1312 = vmatprep.subr.bf16.mxu0 %v1801_v3  ;;  %v1891_v2 = vld [vmem:[%s2223_s5 + $0x2c4] ss:$8 sps:$4 sm:$0xff]   ;;  %v1889_v3 = vld [vmem:[%s2223_s5 + $0x2c0] ss:$8 sps:$4 sm:$0xff]   ;;  %s1660_s9 = sshll.u32 (%p2003_p6), %s1943_s11, 4 }
  0x6f   : > { %s1422_s16 = scalar_lea.vmem (%p2003_p6), %s2394_s2, %s1660_s9 }
  0x70   : > { %1260 = vmatpush1.bf16.msra.mxu1 %v1803_v4  ;;  %v1898_v4 = vld [vmem:[%s2223_s5 + $0x2d4] ss:$8 sps:$4 sm:$0xff]  }
  0x71   : > { %1313 = vmatpush1.bf16.msra.mxu0 %v1804_v5  ;;  %1261 = vmatprep.subr.bf16.mxu1 %v1805_v6  ;;  %v1896_v5 = vld [vmem:[%s2223_s5 + $0x2d0] ss:$8 sps:$4 sm:$0xff]   ;;  %v1903_v6 = vld [vmem:[%s2223_s5 + $0x2e4] ss:$8 sps:$4 sm:$0xff]  }
  0x72   : > { %1314 = vmatprep.subr.bf16.mxu0 %v1807_v7  ;;  %v1901_v7 = vld [vmem:[%s2223_s5 + $0x2e0] ss:$8 sps:$4 sm:$0xff]  }
  0x74   : > { %1262 = vmatpush1.bf16.msra.mxu1 %v1809_v8  ;;  %v1906_v8 = vld [vmem:[%s2223_s5 + $0x2f4] ss:$8 sps:$4 sm:$0xff]  }
  0x75   : > { %1315 = vmatpush1.bf16.msra.mxu0 %v1810_v9  ;;  %1263 = vmatprep.subr.bf16.mxu1 %v1811_v10  ;;  %v1904_v9 = vld [vmem:[%s2223_s5 + $0x2f0] ss:$8 sps:$4 sm:$0xff]   ;;  %s1545_s5 = sshll.u32 %s559_s27, 6 }
  0x76   : > { %1316 = vmatprep.subr.bf16.mxu0 %v1813_v11  ;;  %v1907_v10 = vld [vmem:[%s2392_s0 + $0x10] ss:$24 sps:$4 sm:$0xff]   ;;  %v1910_v11 = vld [vmem:[%s2392_s0 + $0x40] ss:$24 sps:$4 sm:$0xff]   ;;  %s2353_s8 = scalar_lea.vmem [#allocation3], %s1545_s5 }
  0x78   : > { %1264 = vmatpush1.bf16.msra.mxu1 %v1815_v12 }
  0x79   : > { %1317 = vmatpush1.bf16.msra.mxu0 %v1816_v13  ;;  %1265 = vmatprep.subr.bf16.mxu1 %v1817_v14 }
  0x7a   : > { %1318 = vmatprep.subr.bf16.mxu0 %v1819_v15 }
  0x7c   : > { %1266 = vmatpush1.bf16.msra.mxu1 %v1821_v16 }
  0x7d   : > { %1319 = vmatpush1.bf16.msra.mxu0 %v1822_v17  ;;  %1267 = vmatprep.subr.bf16.mxu1 %v1823_v18 }
  0x7e   : > { %1320 = vmatprep.subr.bf16.mxu0 %v1825_v19 }
  0x80   : > { %1268 = vmatpush1.bf16.msra.mxu1 %v1827_v20 }
  0x81   : > { %1321 = vmatpush1.bf16.msra.mxu0 %v1828_v21  ;;  %1269 = vmatprep.subr.bf16.mxu1 %v1829_v22 }
  0x82   : > { %1322 = vmatprep.subr.bf16.mxu0 %v1831_v23 }
  0x84   : > { %1270 = vmatpush1.bf16.msra.mxu1 %v1833_v24 }
  0x85   : > { %1323 = vmatpush1.bf16.msra.mxu0 %v1834_v25  ;;  %1271 = vmatprep.subr.bf16.mxu1 %v1835_v26 }
  0x86   : > { %1324 = vmatprep.subr.bf16.mxu0 %v1837_v27 }
  0x88   : > { %1272 = vmatpush1.bf16.msra.mxu1 %v1839_v28 }
  0x89   : > { %1325 = vmatpush1.bf16.msra.mxu0 %v1840_v29  ;;  %1273 = vmatprep.subr.bf16.mxu1 %v1841_v30 }
  0x8a   : > { %1326 = vmatprep.subr.bf16.mxu0 %v1843_v31 }
  0x8c   : > { %1274 = vmatpush1.bf16.msra.mxu1 %v1845_v32 }
  0x8d   : > { %1327 = vmatpush1.bf16.msra.mxu0 %v1846_v33  ;;  %1661 = vmatprep.subr.bf16.mxu1 %v1855_v34 }
  0x8e   : > { %1349 = vmatprep.subr.bf16.mxu0 %v1855_v34 }
  0x8f   : > { %1276 = vmatmul.mubr.bf16.vlgmr.msra.gmra.mrb[0].mxu1 %v1847_v35 }
  0x90   : > { %1329 = vmatmul.mubr.bf16.vlgmr.msra.gmra.mrb[0].mxu0 %v1850_v36  ;;  %1677 = vmatpush1.bf16.msra.mxu1 %v1853_v37 }
  0x91   : > { %1350 = vmatpush1.bf16.msra.mxu0 %v1853_v37  ;;  %1662 = vmatprep.subr.bf16.mxu1 %v1858_v38 }
  0x92   : > { %1351 = vmatprep.subr.bf16.mxu0 %v1858_v38  ;;  %1285 = vmatprep.mubr.bf16.mxu1 %v1892_v39 }
  0x93   : > { %1338 = vmatprep.mubr.bf16.mxu0 %v1894_v40 }
  0x94   : > { %1678 = vmatpush1.bf16.msra.mxu1 %v1856_v41 }
  0x95   : > { %1352 = vmatpush1.bf16.msra.mxu0 %v1856_v41  ;;  %1663 = vmatprep.subr.bf16.mxu1 %v1861_v42 }
  0x96   : > { %1353 = vmatprep.subr.bf16.mxu0 %v1861_v42 }
  0x97   : > { %1286 = vmatmul.mubr.bf16.gmra.mrb[4].mxu1 %v1899_v43 }
  0x98   : > { %1339 = vmatmul.mubr.bf16.gmra.mrb[4].mxu0 %v1900_v44  ;;  %1679 = vmatpush1.bf16.msra.mxu1 %v1859_v45 }
  0x99   : > { %1354 = vmatpush1.bf16.msra.mxu0 %v1859_v45  ;;  %1664 = vmatprep.subr.bf16.mxu1 %v1864_v46 }
  0x9a   : > { %1355 = vmatprep.subr.bf16.mxu0 %v1864_v46  ;;  %1381 = vmatprep.mubr.bf16.mxu0 %v1909_v47 }
  0x9b   : > { %1391 = vmatprep.mubr.bf16.mxu1 %v1912_v48 }
  0x9c   : > { %1680 = vmatpush1.bf16.msra.mxu1 %v1862_v49 }
  0x9d   : > { %1356 = vmatpush1.bf16.msra.mxu0 %v1862_v49  ;;  %1665 = vmatprep.subr.bf16.mxu1 %v1867_v50 }
  0x9e   : > { %1357 = vmatprep.subr.bf16.mxu0 %v1867_v50 }
  0xa0   : > { %1681 = vmatpush1.bf16.msra.mxu1 %v1865_v51 }
  0xa1   : > { %1358 = vmatpush1.bf16.msra.mxu0 %v1865_v51  ;;  %1666 = vmatprep.subr.bf16.mxu1 %v1870_v52 }
  0xa2   : > { %1359 = vmatprep.subr.bf16.mxu0 %v1870_v52 }
  0xa4   : > { %1682 = vmatpush1.bf16.msra.mxu1 %v1868_v53 }
  0xa5   : > { %1360 = vmatpush1.bf16.msra.mxu0 %v1868_v53  ;;  %1667 = vmatprep.subr.bf16.mxu1 %v1873_v54 }
  0xa6   : > { %1361 = vmatprep.subr.bf16.mxu0 %v1873_v54 }
  0xa8   : > { %1683 = vmatpush1.bf16.msra.mxu1 %v1871_v55 }
  0xa9   : > { %1362 = vmatpush1.bf16.msra.mxu0 %v1871_v55  ;;  %1668 = vmatprep.subr.bf16.mxu1 %v1876_v56 }
  0xaa   : > { %1363 = vmatprep.subr.bf16.mxu0 %v1876_v56 }
  0xac   : > { %1684 = vmatpush1.bf16.msra.mxu1 %v1874_v57 }
  0xad   : > { %1364 = vmatpush1.bf16.msra.mxu0 %v1874_v57  ;;  %1669 = vmatprep.subr.bf16.mxu1 %v1879_v58 }
  0xae   : > { %1365 = vmatprep.subr.bf16.mxu0 %v1879_v58 }
  0xb0   : > { %1685 = vmatpush1.bf16.msra.mxu1 %v1877_v59 }
  0xb1   : > { %1366 = vmatpush1.bf16.msra.mxu0 %v1877_v59  ;;  %1670 = vmatprep.subr.bf16.mxu1 %v1882_v60 }
  0xb2   : > { %1367 = vmatprep.subr.bf16.mxu0 %v1882_v60 }
  0xb4   : > { %1686 = vmatpush1.bf16.msra.mxu1 %v1880_v61 }
  0xb5   : > { %1368 = vmatpush1.bf16.msra.mxu0 %v1880_v61  ;;  %1671 = vmatprep.subr.bf16.mxu1 %v1885_v62 }
  0xb6   : > { %1369 = vmatprep.subr.bf16.mxu0 %v1885_v62 }
  0xb8   : > { %1687 = vmatpush1.bf16.msra.mxu1 %v1883_v63 }
  0xb9   : > { %1370 = vmatpush1.bf16.msra.mxu0 %v1883_v63  ;;  %1672 = vmatprep.subr.bf16.mxu1 %v1888_v0 }
  0xba   : > { %1371 = vmatprep.subr.bf16.mxu0 %v1888_v0 }
  0xbc   : > { %1688 = vmatpush1.bf16.msra.mxu1 %v1886_v1 }
  0xbd   : > { %1372 = vmatpush1.bf16.msra.mxu0 %v1886_v1  ;;  %1673 = vmatprep.subr.bf16.mxu1 %v1891_v2 }
  0xbe   : > { %1373 = vmatprep.subr.bf16.mxu0 %v1891_v2 }
  0xc0   : > { %1689 = vmatpush1.bf16.msra.mxu1 %v1889_v3 }
  0xc1   : > { %1374 = vmatpush1.bf16.msra.mxu0 %v1889_v3  ;;  %1674 = vmatprep.subr.bf16.mxu1 %v1898_v4 }
  0xc2   : > { %1375 = vmatprep.subr.bf16.mxu0 %v1898_v4 }
  0xc4   : > { %1690 = vmatpush1.bf16.msra.mxu1 %v1896_v5 }
  0xc5   : > { %1376 = vmatpush1.bf16.msra.mxu0 %v1896_v5  ;;  %1675 = vmatprep.subr.bf16.mxu1 %v1903_v6 }
  0xc6   : > { %1377 = vmatprep.subr.bf16.mxu0 %v1903_v6 }
  0xc8   : > { %1691 = vmatpush1.bf16.msra.mxu1 %v1901_v7 }
  0xc9   : > { %1378 = vmatpush1.bf16.msra.mxu0 %v1901_v7  ;;  %1676 = vmatprep.subr.bf16.mxu1 %v1906_v8 }
  0xca   : > { %1379 = vmatprep.subr.bf16.mxu0 %v1906_v8 }
  0xcc   : > { %1692 = vmatpush1.bf16.msra.mxu1 %v1904_v9 }
  0xcd   : > { %1380 = vmatpush1.bf16.msra.mxu0 %v1904_v9 }
  0xcf   : > { %1392 = vmatmul.mubr.bf16.vlgmr.msra.gmra.mrb[8].mxu1 %v1910_v11 }
  0xd0   : > { %1382 = vmatmul.mubr.bf16.vlgmr.msra.gmra.mrb[0].mxu0 %v1907_v10 }
 0x162   : > { %v1277_v12 = vpop.f32.mrb[0].mxu1 }
 0x163   : > { %v1279_v13 = vpop.f32.mrb[1].mxu1 }
 0x164   : > { %v1281_v14 = vpop.f32.mrb[2].mxu1 }
 0x165   : > { %v1283_v15 = vpop.f32.mrb[3].mxu1 }
 0x16a   : > { %v1287_v16 = vpop.f32.mrb[4].mxu1 }
 0x16b   : > { %v1340_v17 = vpop.f32.mrb[4].mxu0  ;;  %v1289_v19 = vpop.f32.mrb[5].mxu1 }
 0x16c   : > { %v1341_v18 = vadd.f32 %v1340_v17, %v1287_v16  ;;  %v1342_v20 = vpop.f32.mrb[5].mxu0  ;;  %v1291_v22 = vpop.f32.mrb[6].mxu1 }
 0x16d   : > { %v1343_v21 = vadd.f32 %v1342_v20, %v1289_v19  ;;  %v1344_v23 = vpop.f32.mrb[6].mxu0  ;;  %v1293_v25 = vpop.f32.mrb[7].mxu1 }
 0x16e   : > { %v1345_v24 = vadd.f32 %v1344_v23, %v1291_v22  ;;  %v1346_v26 = vpop.f32.mrb[7].mxu0 }
 0x16f   : > { %v1347_v27 = vadd.f32 %v1346_v26, %v1293_v25 }
 0x1a2   : > { %v1393_v29 = vpop.f32.mrb[8].mxu1 }
 0x1a3   : > { %v1383_v28 = vpop.f32.mrb[0].mxu0  ;;  %v1394_v31 = vadd.f32 %v1393_v29, %v1341_v18  ;;  %v1395_v33 = vpop.f32.mrb[9].mxu1  ;;  %1416 = sbr.rel (!%p2003_p6) target bundleno = 434 (0x1b2), region = 70 }
 0x1a4   : > { %v1693_v30 = vadd.f32 %v1383_v28, %v1277_v12  ;;  %v1385_v32 = vpop.f32.mrb[1].mxu0  ;;  %v1396_v35 = vadd.f32 %v1395_v33, %v1343_v21  ;;  %v1397_v37 = vpop.f32.mrb[10].mxu1 }
 0x1a5   : > { %v1694_v34 = vadd.f32 %v1385_v32, %v1279_v13  ;;  %v1387_v36 = vpop.f32.mrb[2].mxu0  ;;  %1406 = vst [vmem:[%s2353_s8 + $0x20] sm:$0xff] %v1394_v31  ;;  %v1398_v39 = vadd.f32 %v1397_v37, %v1345_v24  ;;  %v1399_v41 = vpop.f32.mrb[11].mxu1 }
 0x1a6   : > { %1402 = vst [vmem:[%s2353_s8] sm:$0xff] %v1693_v30  ;;  %v1695_v38 = vadd.f32 %v1387_v36, %v1281_v14  ;;  %v1389_v40 = vpop.f32.mrb[3].mxu0  ;;  %1407 = vst [vmem:[%s2353_s8 + $0x28] sm:$0xff] %v1396_v35  ;;  %v1400_v43 = vadd.f32 %v1399_v41, %v1347_v27 }
 0x1a7   : > { %1403 = vst [vmem:[%s2353_s8 + $0x8] sm:$0xff] %v1694_v34  ;;  %v1696_v42 = vadd.f32 %v1389_v40, %v1283_v15  ;;  %1408 = vst [vmem:[%s2353_s8 + $0x30] sm:$0xff] %v1398_v39 }
 0x1a8   : > { %1404 = vst [vmem:[%s2353_s8 + $0x10] sm:$0xff] %v1695_v38  ;;  %1409 = vst [vmem:[%s2353_s8 + $0x38] sm:$0xff] %v1400_v43 }
 0x1a9   : > { %1405 = vst [vmem:[%s2353_s8 + $0x18] sm:$0xff] %v1696_v42 }
 0x1ac   : > { %v1443_v48 = vld [vmem:[%s2353_s8 + $0x20] sm:$0xff] }
 0x1ad   : > { %v1435_v44 = vld [vmem:[%s2353_s8] sm:$0xff]  ;;  %v1445_v49 = vld [vmem:[%s2353_s8 + $0x28] sm:$0xff]  ;;  %1444 = vst [vmem:[%s1422_s16 + $0x40] sm:$0xff] %v1443_v48 }
 0x1ae   : > { %v1437_v45 = vld [vmem:[%s2353_s8 + $0x8] sm:$0xff]  ;;  %1436 = vst [vmem:[%s1422_s16] sm:$0xff] %v1435_v44  ;;  %1446 = vst [vmem:[%s1422_s16 + $0x48] sm:$0xff] %v1445_v49  ;;  %v1447_v50 = vld [vmem:[%s2353_s8 + $0x30] sm:$0xff] }
 0x1af   : > { %v1439_v46 = vld [vmem:[%s2353_s8 + $0x10] sm:$0xff]  ;;  %1438 = vst [vmem:[%s1422_s16 + $0x8] sm:$0xff] %v1437_v45  ;;  %v1449_v51 = vld [vmem:[%s2353_s8 + $0x38] sm:$0xff]  ;;  %1448 = vst [vmem:[%s1422_s16 + $0x60] sm:$0xff] %v1447_v50 }
 0x1b0   : > { %v1441_v47 = vld [vmem:[%s2353_s8 + $0x18] sm:$0xff]  ;;  %1440 = vst [vmem:[%s1422_s16 + $0x20] sm:$0xff] %v1439_v46  ;;  %1450 = vst [vmem:[%s1422_s16 + $0x68] sm:$0xff] %v1449_v51 }
 0x1b1   : > { %1442 = vst [vmem:[%s1422_s16 + $0x28] sm:$0xff] %v1441_v47 }
 0x1b2 PF: > { %s12_s13 = sadd.s32 1, %s1951_s13   ;;  %s2396_s9 = smov %s1939_s10 }
 0x1b3   : > { %p9_p11 = scmp.ge.s32.totalorder %s12_s13, 4   ;;  %s2397_s10 = smov %s2008_s19 }
 0x1b4   : > { %s2398_s11 = smov %s1947_s12  ;;  %s2399_s12 = smov %s2401_s14 }
 0x1b5   :  { %11 = sbr.rel (!%p9_p11) target bundleno = 3 (0x3), region = 127 }

// kernel: psm_pitch_shift.5
= control target key start
LH: loop header
LB: loop body
LE: loop exit
PB: predicated region body
PF: predicated region fallthrough
CT: control target
= control target key end

     0   :  { %s1065_s9 = smov 0   ;;  %s1067_s10 = smov 0   ;;  %s1758_s0 = inlined_call_operand.vmem [shape: f32[8,15,1024], index: 0, kind: input, shape index: {}]   ;;  %s1759_s1 = inlined_call_operand.vmem [shape: f32[1,15,1024], index: 1, kind: input, shape index: {}]   ;;  %s1760_s2 = inlined_call_operand.vmem [shape: f32[8,1024], index: 2, kind: output, shape index: {}]  }
   0x1   :  { %s1069_s11 = smov 0   ;;  %s1071_s12 = smov 0  }
   0x2   :  { %s1073_s13 = smov 0  }
   0x3 LB: > { %s21_s14 = sadd.s32 1, %s1044_s12  ;;  %p40_p1 = scmp.ne.s32.totalorder %s1036_s10, %s1032_s9  ;;  %s1048_s13 = sphi %s1073_s13, %s12_s13   ;;  %s1044_s12 = sphi %s1071_s12, %s1806_s12   ;;  %s1040_s11 = sphi %s1069_s11, %s1805_s11   ;;  %s1036_s10 = sphi %s1067_s10, %s1804_s10   ;;  %s1032_s9 = sphi %s1065_s9, %s1803_s9  }
   0x4   : > { %p22_p0 = scmp.ge.s32.totalorder %s21_s14, 2  ;;  %p41_p2 = scmp.eq.s32.totalorder %s1048_s13, 0 }
   0x5   : > { %s33_s17 = sadd.s32 1, %s1036_s10  ;;  %p954_p5 = scmp.ge.s32.totalorder %s1048_s13, 2 }
   0x6   : > { %s1808_s14 = smov (%p22_p0, %s21_s14), 0  ;;  %p1096_p3 = por %p41_p2, %p40_p1 }
   0x7   : > { %s29_s16 = ssub.s32 %s1044_s12, %s1808_s14  ;;  %120 = sbr.rel (%p954_p5) target bundleno = 58 (0x3a), region = 16 }
   0x8   : > { %p31_p4 = scmp.eq.s32.totalorder %s29_s16, 0 }
   0xa   : > { %s1104_s18 = scalar_select %p31_p4, %s1036_s10, %s33_s17  }
   0xe   : > { %123 = sbr.rel (!%p1096_p3) target bundleno = 50 (0x32), region = 20  ;;  %s125_s19 = sand.u32 (%p1096_p3), 1, %s1036_s10  }
   0xf   : > { %s968_s20 = sshll.u32 (%p1096_p3), %s1044_s12, 5  ;;  %s955_s21 = sshll.u32 (%p1096_p3), %s125_s19, 9 }
  0x10   : > { %s1114_s24 = scalar_lea.vmem (%p1096_p3), %s1758_s0, %s968_s20  ;;  %s1119_s25 = scalar_lea.vmem (%p1096_p3), [#allocation2], %s955_s21 }
  0x11   : > { %v146_v0 = vld [vmem:[%s1114_s24] sm:$0xff] (%p1096_p3)  ;;  %v148_v1 = vld [vmem:[%s1114_s24 + $0x8] sm:$0xff] (%p1096_p3)  ;;  %v150_v2 = vld [vmem:[%s1114_s24 + $0x10] sm:$0xff] (%p1096_p3) }
  0x12   : > { %147 = vst [vmem:[%s1119_s25] sm:$0xff] (%p1096_p3), %v146_v0  ;;  %149 = vst [vmem:[%s1119_s25 + $0x8] sm:$0xff] (%p1096_p3), %v148_v1  ;;  %v152_v3 = vld [vmem:[%s1114_s24 + $0x18] sm:$0xff] (%p1096_p3)  ;;  %v154_v4 = vld [vmem:[%s1114_s24 + $0x40] sm:$0xff] (%p1096_p3) }
  0x13   : > { %151 = vst [vmem:[%s1119_s25 + $0x10] sm:$0xff] (%p1096_p3), %v150_v2  ;;  %v156_v5 = vld [vmem:[%s1114_s24 + $0x48] sm:$0xff] (%p1096_p3)  ;;  %153 = vst [vmem:[%s1119_s25 + $0x18] sm:$0xff] (%p1096_p3), %v152_v3  ;;  %v158_v6 = vld [vmem:[%s1114_s24 + $0x50] sm:$0xff] (%p1096_p3) }
  0x14   : > { %155 = vst [vmem:[%s1119_s25 + $0x20] sm:$0xff] (%p1096_p3), %v154_v4  ;;  %157 = vst [vmem:[%s1119_s25 + $0x28] sm:$0xff] (%p1096_p3), %v156_v5  ;;  %v160_v7 = vld [vmem:[%s1114_s24 + $0x58] sm:$0xff] (%p1096_p3)  ;;  %v162_v8 = vld [vmem:[%s1114_s24 + $0x80] sm:$0xff] (%p1096_p3) }
  0x15   : > { %159 = vst [vmem:[%s1119_s25 + $0x30] sm:$0xff] %v158_v6  ;;  %161 = vst [vmem:[%s1119_s25 + $0x38] sm:$0xff] %v160_v7  ;;  %v164_v9 = vld [vmem:[%s1114_s24 + $0x88] sm:$0xff]  ;;  %v166_v10 = vld [vmem:[%s1114_s24 + $0x90] sm:$0xff] }
  0x16   : > { %163 = vst [vmem:[%s1119_s25 + $0x40] sm:$0xff] %v162_v8  ;;  %v168_v11 = vld [vmem:[%s1114_s24 + $0x98] sm:$0xff]  ;;  %165 = vst [vmem:[%s1119_s25 + $0x48] sm:$0xff] %v164_v9  ;;  %v170_v12 = vld [vmem:[%s1114_s24 + $0xc0] sm:$0xff] }
  0x17   : > { %167 = vst [vmem:[%s1119_s25 + $0x50] sm:$0xff] %v166_v10  ;;  %169 = vst [vmem:[%s1119_s25 + $0x58] sm:$0xff] %v168_v11  ;;  %v172_v13 = vld [vmem:[%s1114_s24 + $0xc8] sm:$0xff]  ;;  %v174_v14 = vld [vmem:[%s1114_s24 + $0xd0] sm:$0xff] }
  0x18   : > { %171 = vst [vmem:[%s1119_s25 + $0x60] sm:$0xff] %v170_v12  ;;  %173 = vst [vmem:[%s1119_s25 + $0x68] sm:$0xff] %v172_v13  ;;  %v176_v15 = vld [vmem:[%s1114_s24 + $0xd8] sm:$0xff]  ;;  %v178_v16 = vld [vmem:[%s1114_s24 + $0x100] sm:$0xff] }
  0x19   : > { %175 = vst [vmem:[%s1119_s25 + $0x70] sm:$0xff] %v174_v14  ;;  %v180_v17 = vld [vmem:[%s1114_s24 + $0x108] sm:$0xff]  ;;  %177 = vst [vmem:[%s1119_s25 + $0x78] sm:$0xff] %v176_v15  ;;  %v182_v18 = vld [vmem:[%s1114_s24 + $0x110] sm:$0xff] }
  0x1a   : > { %179 = vst [vmem:[%s1119_s25 + $0x80] sm:$0xff] %v178_v16  ;;  %181 = vst [vmem:[%s1119_s25 + $0x88] sm:$0xff] %v180_v17  ;;  %v184_v19 = vld [vmem:[%s1114_s24 + $0x118] sm:$0xff]  ;;  %v186_v20 = vld [vmem:[%s1114_s24 + $0x140] sm:$0xff] }
  0x1b   : > { %183 = vst [vmem:[%s1119_s25 + $0x90] sm:$0xff] %v182_v18  ;;  %185 = vst [vmem:[%s1119_s25 + $0x98] sm:$0xff] %v184_v19  ;;  %v188_v21 = vld [vmem:[%s1114_s24 + $0x148] sm:$0xff]  ;;  %v190_v22 = vld [vmem:[%s1114_s24 + $0x150] sm:$0xff] }
  0x1c   : > { %187 = vst [vmem:[%s1119_s25 + $0xa0] sm:$0xff] %v186_v20  ;;  %v192_v23 = vld [vmem:[%s1114_s24 + $0x158] sm:$0xff]  ;;  %189 = vst [vmem:[%s1119_s25 + $0xa8] sm:$0xff] %v188_v21  ;;  %v194_v24 = vld [vmem:[%s1114_s24 + $0x180] sm:$0xff] }
  0x1d   : > { %191 = vst [vmem:[%s1119_s25 + $0xb0] sm:$0xff] %v190_v22  ;;  %193 = vst [vmem:[%s1119_s25 + $0xb8] sm:$0xff] %v192_v23  ;;  %v196_v25 = vld [vmem:[%s1114_s24 + $0x188] sm:$0xff]  ;;  %v198_v26 = vld [vmem:[%s1114_s24 + $0x190] sm:$0xff] }
  0x1e   : > { %195 = vst [vmem:[%s1119_s25 + $0xc0] sm:$0xff] %v194_v24  ;;  %197 = vst [vmem:[%s1119_s25 + $0xc8] sm:$0xff] %v196_v25  ;;  %v200_v27 = vld [vmem:[%s1114_s24 + $0x198] sm:$0xff]  ;;  %v202_v28 = vld [vmem:[%s1114_s24 + $0x1c0] sm:$0xff] }
  0x1f   : > { %199 = vst [vmem:[%s1119_s25 + $0xd0] sm:$0xff] %v198_v26  ;;  %v204_v29 = vld [vmem:[%s1114_s24 + $0x1c8] sm:$0xff]  ;;  %201 = vst [vmem:[%s1119_s25 + $0xd8] sm:$0xff] %v200_v27  ;;  %v206_v30 = vld [vmem:[%s1114_s24 + $0x1d0] sm:$0xff] }
  0x20   : > { %203 = vst [vmem:[%s1119_s25 + $0xe0] sm:$0xff] %v202_v28  ;;  %205 = vst [vmem:[%s1119_s25 + $0xe8] sm:$0xff] %v204_v29  ;;  %v208_v31 = vld [vmem:[%s1114_s24 + $0x1d8] sm:$0xff]  ;;  %v210_v32 = vld [vmem:[%s1114_s24 + $0x200] sm:$0xff] }
  0x21   : > { %207 = vst [vmem:[%s1119_s25 + $0xf0] sm:$0xff] %v206_v30  ;;  %209 = vst [vmem:[%s1119_s25 + $0xf8] sm:$0xff] %v208_v31  ;;  %v212_v33 = vld [vmem:[%s1114_s24 + $0x208] sm:$0xff]  ;;  %v214_v34 = vld [vmem:[%s1114_s24 + $0x210] sm:$0xff] }
  0x22   : > { %211 = vst [vmem:[%s1119_s25 + $0x100] sm:$0xff] %v210_v32  ;;  %v216_v35 = vld [vmem:[%s1114_s24 + $0x218] sm:$0xff]  ;;  %213 = vst [vmem:[%s1119_s25 + $0x108] sm:$0xff] %v212_v33  ;;  %v218_v36 = vld [vmem:[%s1114_s24 + $0x240] sm:$0xff] }
  0x23   : > { %215 = vst [vmem:[%s1119_s25 + $0x110] sm:$0xff] %v214_v34  ;;  %217 = vst [vmem:[%s1119_s25 + $0x118] sm:$0xff] %v216_v35  ;;  %v220_v37 = vld [vmem:[%s1114_s24 + $0x248] sm:$0xff]  ;;  %v222_v38 = vld [vmem:[%s1114_s24 + $0x250] sm:$0xff] }
  0x24   : > { %219 = vst [vmem:[%s1119_s25 + $0x120] sm:$0xff] %v218_v36  ;;  %221 = vst [vmem:[%s1119_s25 + $0x128] sm:$0xff] %v220_v37  ;;  %v224_v39 = vld [vmem:[%s1114_s24 + $0x258] sm:$0xff]  ;;  %v226_v40 = vld [vmem:[%s1114_s24 + $0x280] sm:$0xff] }
  0x25   : > { %223 = vst [vmem:[%s1119_s25 + $0x130] sm:$0xff] %v222_v38  ;;  %v228_v41 = vld [vmem:[%s1114_s24 + $0x288] sm:$0xff]  ;;  %225 = vst [vmem:[%s1119_s25 + $0x138] sm:$0xff] %v224_v39  ;;  %v230_v42 = vld [vmem:[%s1114_s24 + $0x290] sm:$0xff] }
  0x26   : > { %227 = vst [vmem:[%s1119_s25 + $0x140] sm:$0xff] %v226_v40  ;;  %229 = vst [vmem:[%s1119_s25 + $0x148] sm:$0xff] %v228_v41  ;;  %v232_v43 = vld [vmem:[%s1114_s24 + $0x298] sm:$0xff]  ;;  %v234_v44 = vld [vmem:[%s1114_s24 + $0x2c0] sm:$0xff] }
  0x27   : > { %231 = vst [vmem:[%s1119_s25 + $0x150] sm:$0xff] %v230_v42  ;;  %233 = vst [vmem:[%s1119_s25 + $0x158] sm:$0xff] %v232_v43  ;;  %v236_v45 = vld [vmem:[%s1114_s24 + $0x2c8] sm:$0xff]  ;;  %v238_v46 = vld [vmem:[%s1114_s24 + $0x2d0] sm:$0xff] }
  0x28   : > { %235 = vst [vmem:[%s1119_s25 + $0x160] sm:$0xff] %v234_v44  ;;  %v240_v47 = vld [vmem:[%s1114_s24 + $0x2d8] sm:$0xff]  ;;  %237 = vst [vmem:[%s1119_s25 + $0x168] sm:$0xff] %v236_v45  ;;  %v242_v48 = vld [vmem:[%s1114_s24 + $0x300] sm:$0xff] }
  0x29   : > { %239 = vst [vmem:[%s1119_s25 + $0x170] sm:$0xff] %v238_v46  ;;  %241 = vst [vmem:[%s1119_s25 + $0x178] sm:$0xff] %v240_v47  ;;  %v244_v49 = vld [vmem:[%s1114_s24 + $0x308] sm:$0xff]  ;;  %v246_v50 = vld [vmem:[%s1114_s24 + $0x310] sm:$0xff] }
  0x2a   : > { %243 = vst [vmem:[%s1119_s25 + $0x180] sm:$0xff] %v242_v48  ;;  %245 = vst [vmem:[%s1119_s25 + $0x188] sm:$0xff] %v244_v49  ;;  %v248_v51 = vld [vmem:[%s1114_s24 + $0x318] sm:$0xff]  ;;  %v250_v52 = vld [vmem:[%s1114_s24 + $0x340] sm:$0xff] }
  0x2b   : > { %247 = vst [vmem:[%s1119_s25 + $0x190] sm:$0xff] %v246_v50  ;;  %v252_v53 = vld [vmem:[%s1114_s24 + $0x348] sm:$0xff]  ;;  %249 = vst [vmem:[%s1119_s25 + $0x198] sm:$0xff] %v248_v51  ;;  %v254_v54 = vld [vmem:[%s1114_s24 + $0x350] sm:$0xff] }
  0x2c   : > { %251 = vst [vmem:[%s1119_s25 + $0x1a0] sm:$0xff] %v250_v52  ;;  %253 = vst [vmem:[%s1119_s25 + $0x1a8] sm:$0xff] %v252_v53  ;;  %v256_v55 = vld [vmem:[%s1114_s24 + $0x358] sm:$0xff]  ;;  %v258_v56 = vld [vmem:[%s1114_s24 + $0x380] sm:$0xff] }
  0x2d   : > { %255 = vst [vmem:[%s1119_s25 + $0x1b0] sm:$0xff] %v254_v54  ;;  %257 = vst [vmem:[%s1119_s25 + $0x1b8] sm:$0xff] %v256_v55  ;;  %v260_v57 = vld [vmem:[%s1114_s24 + $0x388] sm:$0xff]  ;;  %v262_v58 = vld [vmem:[%s1114_s24 + $0x390] sm:$0xff] }
  0x2e   : > { %259 = vst [vmem:[%s1119_s25 + $0x1c0] sm:$0xff] %v258_v56  ;;  %v264_v59 = vld [vmem:[%s1114_s24 + $0x398] sm:$0xff]  ;;  %261 = vst [vmem:[%s1119_s25 + $0x1c8] sm:$0xff] %v260_v57  ;;  %v266_v60 = vld [vmem:[%s1114_s24 + $0x3c0] sm:$0xff] }
  0x2f   : > { %263 = vst [vmem:[%s1119_s25 + $0x1d0] sm:$0xff] %v262_v58  ;;  %265 = vst [vmem:[%s1119_s25 + $0x1d8] sm:$0xff] %v264_v59  ;;  %v268_v61 = vld [vmem:[%s1114_s24 + $0x3c8] sm:$0xff]  ;;  %v270_v62 = vld [vmem:[%s1114_s24 + $0x3d0] sm:$0xff] }
  0x30   : > { %267 = vst [vmem:[%s1119_s25 + $0x1e0] sm:$0xff] %v266_v60  ;;  %269 = vst [vmem:[%s1119_s25 + $0x1e8] sm:$0xff] %v268_v61  ;;  %v272_v63 = vld [vmem:[%s1114_s24 + $0x3d8] sm:$0xff] }
  0x31   : > { %271 = vst [vmem:[%s1119_s25 + $0x1f0] sm:$0xff] %v270_v62  ;;  %273 = vst [vmem:[%s1119_s25 + $0x1f8] sm:$0xff] %v272_v63 }
  0x32 PF: > { %279 = sbr.rel (!%p1096_p3) target bundleno = 58 (0x3a), region = 43  ;;  %s281_s26 = sand.u32 (%p1096_p3), 1, %s1036_s10  }
  0x33   : > { %s969_s27 = sshll.u32 (%p1096_p3), %s1044_s12, 5  ;;  %s958_s28 = sshll.u32 (%p1096_p3), %s281_s26, 6 }
  0x34   : > { %s286_s3 = scalar_lea.vmem (%p1096_p3), %s1759_s1, %s969_s27  ;;  %s283_s4 = scalar_lea.vmem (%p1096_p3), [#allocation3], %s958_s28 }
  0x35   : > { %v299_v0 = vld [vmem:[%s286_s3] sm:$0xff] (%p1096_p3)  ;;  %v301_v1 = vld [vmem:[%s286_s3 + $0x8] sm:$0xff] (%p1096_p3)  ;;  %v303_v2 = vld [vmem:[%s286_s3 + $0x10] sm:$0xff] (%p1096_p3) }
  0x36   : > { %300 = vst [vmem:[%s283_s4] sm:$0xff] (%p1096_p3), %v299_v0  ;;  %302 = vst [vmem:[%s283_s4 + $0x8] sm:$0xff] (%p1096_p3), %v301_v1  ;;  %v305_v3 = vld [vmem:[%s286_s3 + $0x18] sm:$0xff] (%p1096_p3)  ;;  %v307_v4 = vld [vmem:[%s286_s3 + $0x40] sm:$0xff] (%p1096_p3) }
  0x37   : > { %304 = vst [vmem:[%s283_s4 + $0x10] sm:$0xff] (%p1096_p3), %v303_v2  ;;  %v309_v5 = vld [vmem:[%s286_s3 + $0x48] sm:$0xff] (%p1096_p3)  ;;  %306 = vst [vmem:[%s283_s4 + $0x18] sm:$0xff] (%p1096_p3), %v305_v3  ;;  %v311_v6 = vld [vmem:[%s286_s3 + $0x50] sm:$0xff] (%p1096_p3) }
  0x38   : > { %308 = vst [vmem:[%s283_s4 + $0x20] sm:$0xff] (%p1096_p3), %v307_v4  ;;  %310 = vst [vmem:[%s283_s4 + $0x28] sm:$0xff] (%p1096_p3), %v309_v5  ;;  %v313_v7 = vld [vmem:[%s286_s3 + $0x58] sm:$0xff] (%p1096_p3) }
  0x39   : > { %312 = vst [vmem:[%s283_s4 + $0x30] sm:$0xff] %v311_v6  ;;  %314 = vst [vmem:[%s283_s4 + $0x38] sm:$0xff] %v313_v7 }
  0x3a PF: > { %p961_p6 = scmp.ge.s32.totalorder %s1048_s13, 1  ;;  %p319_p7 = scmp.lt.s32.totalorder %s1048_s13, 3 }
  0x3c   : > { %p320_p8 = pnand %p961_p6, %p319_p7 }
  0x3e   : > { %323 = sbr.rel (%p320_p8) target bundleno = 171 (0xab), region = 66 }
  0x45   : > { %s326_s5 = sand.u32 1, %s1032_s9   ;;  %vm511_vm0 = vcmask 1046528   ;;  %vm800_vm1 = vcmask 1041409   ;;  %s964_s15 = sshll.u32 %s1040_s11, 2  ;;  %vm802_vm2 = vcmask 1042434   ;;  %vm804_vm3 = vcmask 1043459  }
  0x46   : > { %s962_s6 = sshll.u32 %s326_s5, 9  ;;  %s963_s7 = sshll.u32 %s326_s5, 6  ;;  %vm806_vm4 = vcmask 1044484   ;;  %vm808_vm5 = vcmask 1045509   ;;  %vm810_vm6 = vcmask 1046534   ;;  %vm812_vm7 = vcmask 1047559  }
  0x47   : > { %s1256_s8 = scalar_lea.vmem [#allocation2], %s962_s6  ;;  %s335_s9 = scalar_lea.vmem [#allocation3], %s963_s7 }
  0x48   : > { %v375_v8 = vld [vmem:[%s1256_s8] sm:$0xff]  ;;  %v376_v9 = vld [vmem:[%s1256_s8 + $0x8] sm:$0xff]  ;;  %v377_v10 = vld [vmem:[%s1256_s8 + $0x10] sm:$0xff]  ;;  %p1677_p9 = scmp.lt.s32.totalorder %s964_s15, 7 }
  0x49   : > { %v378_v11 = vld [vmem:[%s1256_s8 + $0x18] sm:$0xff]  ;;  %v379_v12 = vld [vmem:[%s1256_s8 + $0x20] sm:$0x7f]  ;;  %v380_v14 = vld [vmem:[%s1256_s8 + $0x28] sm:$0x7f] }
  0x4a   : > { %v383_v13 = vld [vmem:[%s1256_s8 + $0x40] sm:$0xff]  ;;  %v381_v15 = vld [vmem:[%s1256_s8 + $0x30] sm:$0x7f]  ;;  %v382_v16 = vld [vmem:[%s1256_s8 + $0x38] sm:$0x7f]  ;;  %s1810_s15 = smov (!%p1677_p9, %s964_s15), 7 }
  0x4b   : > { %v384_v17 = vld [vmem:[%s1256_s8 + $0x48] sm:$0xff]  ;;  %v385_v18 = vld [vmem:[%s1256_s8 + $0x50] sm:$0xff]  ;;  %v386_v19 = vld [vmem:[%s1256_s8 + $0x58] sm:$0xff]  ;;  %s965_s11 = sshll.u32 %s1810_s15, 3 }
  0x4c   : > { %v387_v20 = vld [vmem:[%s1256_s8 + $0x60] sm:$0x7f]  ;;  %v388_v21 = vld [vmem:[%s1256_s8 + $0x68] sm:$0x7f]  ;;  %v389_v22 = vld [vmem:[%s1256_s8 + $0x70] sm:$0x7f]  ;;  %s373_s20 = scalar_lea.vmem %s1760_s2, %s965_s11 }
  0x4d   : > { %v390_v23 = vld [vmem:[%s1256_s8 + $0x78] sm:$0x7f]  ;;  %v391_v24 = vld [vmem:[%s1256_s8 + $0x80] sm:$0xff]  ;;  %v392_v25 = vld [vmem:[%s1256_s8 + $0x88] sm:$0xff] }
  0x4e   : > { %v393_v26 = vld [vmem:[%s1256_s8 + $0x90] sm:$0xff]  ;;  %v394_v27 = vld [vmem:[%s1256_s8 + $0x98] sm:$0xff]  ;;  %v1278_v28 = vld [vmem:[%s335_s9] sm:$0xff] }
  0x4f   : > { %v1280_v29 = vld [vmem:[%s335_s9 + $0x8] sm:$0xff]  ;;  %v395_v30 = vld [vmem:[%s1256_s8 + $0xa0] sm:$0x7f]  ;;  %v397_v32 = vld [vmem:[%s1256_s8 + $0xb0] sm:$0x7f]  ;;  %v1293_v37 = vmul.f32 %v1278_v28, %v375_v8  ;;  %v1299_v39 = vmul.f32 %v1278_v28, %v383_v13  ;;  %v1363_v8 = vmul.f32 %v1278_v28, %v391_v24 }
  0x50   : > { %v396_v31 = vld [vmem:[%s1256_s8 + $0xa8] sm:$0x7f]  ;;  %v398_v33 = vld [vmem:[%s1256_s8 + $0xb8] sm:$0x7f]  ;;  %v1286_v34 = vld [vmem:[%s335_s9 + $0x10] sm:$0xff]  ;;  %v1296_v38 = vmul.f32 %v1280_v29, %v376_v9  ;;  %v1302_v40 = vmul.f32 %v1280_v29, %v384_v17  ;;  %v1366_v9 = vmul.f32 %v1280_v29, %v392_v25 }
  0x51   : > { %v1288_v35 = vld [vmem:[%s335_s9 + $0x18] sm:$0xff]  ;;  %v1290_v36 = vld [vmem:[%s335_s9 + $0x20] sm:$0x7f]  ;;  %v400_v42 = vld [vmem:[%s1256_s8 + $0xc8] sm:$0xff]  ;;  %v1315_v48 = vmul.f32 %v1286_v34, %v377_v10  ;;  %v1324_v51 = vmul.f32 %v1286_v34, %v385_v18  ;;  %v1369_v10 = vmul.f32 %v1286_v34, %v393_v26 }
  0x52   : > { %v399_v41 = vld [vmem:[%s1256_s8 + $0xc0] sm:$0xff]  ;;  %v401_v43 = vld [vmem:[%s1256_s8 + $0xd0] sm:$0xff]  ;;  %v402_v44 = vld [vmem:[%s1256_s8 + $0xd8] sm:$0xff]  ;;  %v1318_v49 = vmul.f32 %v1288_v35, %v378_v11  ;;  %v1321_v50 = vmul.f32 %v1290_v36, %v379_v12  ;;  %v1340_v59 = vmul.f32 %v1288_v35, %v386_v19  ;;  %v1347_v0 = vmul.f32 %v1290_v36, %v387_v20 }
  0x53   : > { %v1308_v45 = vld [vmem:[%s335_s9 + $0x28] sm:$0x7f]  ;;  %v1310_v46 = vld [vmem:[%s335_s9 + $0x30] sm:$0x7f]  ;;  %v1312_v47 = vld [vmem:[%s335_s9 + $0x38] sm:$0x7f]  ;;  %v1372_v11 = vmul.f32 %v1288_v35, %v394_v27  ;;  %v1399_v24 = vmul.f32 %v1286_v34, %v401_v43  ;;  %v1402_v25 = vmul.f32 %v1288_v35, %v402_v44 }
  0x54   : > { %v403_v52 = vld [vmem:[%s1256_s8 + $0xe0] sm:$0x7f]  ;;  %v404_v53 = vld [vmem:[%s1256_s8 + $0xe8] sm:$0x7f]  ;;  %v405_v54 = vld [vmem:[%s1256_s8 + $0xf0] sm:$0x7f]  ;;  %v1331_v56 = vmul.f32 %v1308_v45, %v380_v14  ;;  %v1334_v57 = vmul.f32 %v1310_v46, %v381_v15  ;;  %v1337_v58 = vmul.f32 %v1312_v47, %v382_v16  ;;  %v1350_v1 = vmul.f32 %v1308_v45, %v388_v21 }
  0x55   : > { %v406_v55 = vld [vmem:[%s1256_s8 + $0xf8] sm:$0x7f]  ;;  %v407_v60 = vld [vmem:[%s1256_s8 + $0x100] sm:$0xff]  ;;  %v408_v61 = vld [vmem:[%s1256_s8 + $0x108] sm:$0xff]  ;;  %v1353_v2 = vmul.f32 %v1310_v46, %v389_v22  ;;  %v1356_v3 = vmul.f32 %v1312_v47, %v390_v23  ;;  %v1378_v15 = vmul.f32 %v1290_v36, %v395_v30  ;;  %v1381_v16 = vmul.f32 %v1308_v45, %v396_v31  ;;  %1764 = vst [vmem:[#allocation6_spill] sm:$0xff] %v1399_v24 }
  0x56   : > { %v409_v62 = vld [vmem:[%s1256_s8 + $0x110] sm:$0xff]  ;;  %v410_v63 = vld [vmem:[%s1256_s8 + $0x118] sm:$0xff]  ;;  %v411_v4 = vld [vmem:[%s1256_s8 + $0x120] sm:$0x7f]  ;;  %v1384_v17 = vmul.f32 %v1310_v46, %v397_v32  ;;  %v1387_v18 = vmul.f32 %v1312_v47, %v398_v33  ;;  %v1393_v22 = vmul.f32 %v1278_v28, %v399_v41  ;;  %v1396_v23 = vmul.f32 %v1280_v29, %v400_v42  ;;  %1765 = vst [vmem:[#allocation7_spill] sm:$0xff] %v1402_v25 }
  0x57   : > { %v412_v5 = vld [vmem:[%s1256_s8 + $0x128] sm:$0x7f]  ;;  %v413_v6 = vld [vmem:[%s1256_s8 + $0x130] sm:$0x7f]  ;;  %v414_v7 = vld [vmem:[%s1256_s8 + $0x138] sm:$0x7f]  ;;  %v1408_v31 = vmul.f32 %v1290_v36, %v403_v52  ;;  %v1411_v32 = vmul.f32 %v1308_v45, %v404_v53  ;;  %v1414_v33 = vmul.f32 %v1310_v46, %v405_v54  ;;  %v1417_v41 = vmul.f32 %v1312_v47, %v406_v55 }
  0x58   : > { %v415_v12 = vld [vmem:[%s1256_s8 + $0x140] sm:$0xff]  ;;  %v416_v13 = vld [vmem:[%s1256_s8 + $0x148] sm:$0xff]  ;;  %v417_v14 = vld [vmem:[%s1256_s8 + $0x150] sm:$0xff]  ;;  %1762 = vst [vmem:[#allocation4_spill] sm:$0xff] %v1393_v22  ;;  %v1423_v25 = vmul.f32 %v1278_v28, %v407_v60  ;;  %v1426_v52 = vmul.f32 %v1280_v29, %v408_v61  ;;  %v1429_v53 = vmul.f32 %v1286_v34, %v409_v62  ;;  %v1432_v54 = vmul.f32 %v1288_v35, %v410_v63 }
  0x59   : > { %v418_v19 = vld [vmem:[%s1256_s8 + $0x158] sm:$0xff]  ;;  %v419_v20 = vld [vmem:[%s1256_s8 + $0x160] sm:$0x7f]  ;;  %v420_v21 = vld [vmem:[%s1256_s8 + $0x168] sm:$0x7f]  ;;  %1763 = vst [vmem:[#allocation5_spill] sm:$0xff] %v1396_v23  ;;  %v1438_v22 = vmul.f32 %v1290_v36, %v411_v4  ;;  %v1441_v60 = vmul.f32 %v1308_v45, %v412_v5  ;;  %v1444_v61 = vmul.f32 %v1310_v46, %v413_v6  ;;  %v1447_v62 = vmul.f32 %v1312_v47, %v414_v7 }
  0x5a   : > { %v421_v26 = vld [vmem:[%s1256_s8 + $0x170] sm:$0x7f]  ;;  %v422_v27 = vld [vmem:[%s1256_s8 + $0x178] sm:$0x7f]  ;;  %v423_v30 = vld [vmem:[%s1256_s8 + $0x180] sm:$0xff]  ;;  %1766 = vst [vmem:[#allocation8_spill] sm:$0xff] %v1423_v25  ;;  %v1456_v4 = vmul.f32 %v1280_v29, %v416_v13  ;;  %v1459_v5 = vmul.f32 %v1286_v34, %v417_v14  ;;  %v1462_v6 = vmul.f32 %v1288_v35, %v418_v19 }
  0x5b   : > { %v424_v42 = vld [vmem:[%s1256_s8 + $0x188] sm:$0xff]  ;;  %v425_v43 = vld [vmem:[%s1256_s8 + $0x190] sm:$0xff]  ;;  %v426_v44 = vld [vmem:[%s1256_s8 + $0x198] sm:$0xff]  ;;  %1767 = vst [vmem:[#allocation9_spill] sm:$0xff] %v1426_v52  ;;  %v1453_v52 = vmul.f32 %v1278_v28, %v415_v12  ;;  %v1474_v12 = vmul.f32 %v1310_v46, %v421_v26  ;;  %v1477_v13 = vmul.f32 %v1312_v47, %v422_v27  ;;  %v1483_v19 = vmul.f32 %v1278_v28, %v423_v30 }
  0x5c   : > { %1768 = vst [vmem:[#allocation10_spill] sm:$0xff] %v1429_v53  ;;  %1769 = vst [vmem:[#allocation11_spill] sm:$0xff] %v1432_v54  ;;  %v427_v55 = vld [vmem:[%s1256_s8 + $0x1a0] sm:$0x7f]  ;;  %v428_v24 = vld [vmem:[%s1256_s8 + $0x1a8] sm:$0x7f] }
  0x5d   : > { %v429_v23 = vld [vmem:[%s1256_s8 + $0x1b0] sm:$0x7f]  ;;  %1770 = vst [vmem:[#allocation12_spill] sm:$0xff] %v1441_v60  ;;  %1771 = vst [vmem:[#allocation13_spill] sm:$0xff] %v1444_v61  ;;  %v430_v63 = vld [vmem:[%s1256_s8 + $0x1b8] sm:$0x7f]  ;;  %v1468_v61 = vmul.f32 %v1290_v36, %v419_v20  ;;  %v1471_v60 = vmul.f32 %v1308_v45, %v420_v21  ;;  %v1489_v20 = vmul.f32 %v1286_v34, %v425_v43 }
  0x5e   : > { %1772 = vst [vmem:[#allocation14_spill] sm:$0xff] %v1447_v62  ;;  %v431_v54 = vld [vmem:[%s1256_s8 + $0x1c0] sm:$0xff]  ;;  %v432_v53 = vld [vmem:[%s1256_s8 + $0x1c8] sm:$0xff]  ;;  %1773 = vst [vmem:[#allocation15_spill] sm:$0xff] %v1453_v52  ;;  %v1492_v21 = vmul.f32 %v1288_v35, %v426_v44  ;;  %v1495_v26 = vmul.f32 %v1290_v36, %v427_v55  ;;  %v1498_v27 = vmul.f32 %v1308_v45, %v428_v24 }
  0x5f   : > { %1774 = vst [vmem:[#allocation16_spill] sm:$0xff] %v1456_v4  ;;  %1775 = vst [vmem:[#allocation17_spill] sm:$0xff] %v1459_v5  ;;  %v433_v25 = vld [vmem:[%s1256_s8 + $0x1d0] sm:$0xff]  ;;  %v434_v7 = vld [vmem:[%s1256_s8 + $0x1d8] sm:$0xff]  ;;  %v1501_v52 = vmul.f32 %v1310_v46, %v429_v23  ;;  %v1504_v30 = vmul.f32 %v1312_v47, %v430_v63  ;;  %v1510_v43 = vmul.f32 %v1280_v29, %v432_v53 }
  0x60   : > { %1776 = vst [vmem:[#allocation18_spill] sm:$0xff] %v1462_v6  ;;  %v435_v62 = vld [vmem:[%s1256_s8 + $0x1e0] sm:$0x7f]  ;;  %v436_v14 = vld [vmem:[%s1256_s8 + $0x1e8] sm:$0x7f]  ;;  %v1486_v6 = vmul.f32 %v1280_v29, %v424_v42  ;;  %v1507_v42 = vmul.f32 %v1278_v28, %v431_v54  ;;  %v1513_v44 = vmul.f32 %v1286_v34, %v433_v25  ;;  %v1516_v55 = vmul.f32 %v1288_v35, %v434_v7 }
  0x61   : > { %v437_v5 = vld [vmem:[%s1256_s8 + $0x1f0] sm:$0x7f]  ;;  %v438_v4 = vld [vmem:[%s1256_s8 + $0x1f8] sm:$0x7f]  ;;  %1778 = vst [vmem:[#allocation20_spill] sm:$0xff] %v1510_v43  ;;  %v1519_v24 = vmul.f32 %v1290_v36, %v435_v62  ;;  %v1522_v23 = vmul.f32 %v1308_v45, %v436_v14  ;;  %v512_v29 = vsel %vm511_vm0, %v1321_v50, 0.0 }
  0x62   : > { %1777 = vst [vmem:[#allocation19_spill] sm:$0xff] %v1507_v42  ;;  %1779 = vst [vmem:[#allocation21_spill] sm:$0xff] %v1513_v44  ;;  %v1525_v63 = vmul.f32 %v1310_v46, %v437_v5  ;;  %v1528_v28 = vmul.f32 %v1312_v47, %v438_v4  ;;  %v520_v34 = vsel %vm511_vm0, %v1331_v56, 0.0  ;;  %v528_v35 = vsel %vm511_vm0, %v1334_v57, 0.0 }
  0x63   : > { %1780 = vst [vmem:[#allocation22_spill] sm:$0xff] %v1516_v55  ;;  %v536_v36 = vsel %vm511_vm0, %v1337_v58, 0.0  ;;  %v513_v45 = vadd.f32 %v512_v29, %v1293_v37  ;;  %v521_v46 = vadd.f32 %v520_v34, %v1296_v38  ;;  %v529_v25 = vadd.f32 %v528_v35, %v1315_v48 }
  0x64   : > { %1781 = vst [vmem:[#allocation23_spill] sm:$0xff] %v1528_v28  ;;  %v537_v47 = vadd.f32 %v536_v36, %v1318_v49  ;;  %v544_v50 = vsel %vm511_vm0, %v1347_v0, 0.0  ;;  %v552_v56 = vsel %vm511_vm0, %v1350_v1, 0.0  ;;  %v560_v57 = vsel %vm511_vm0, %v1353_v2, 0.0 }
  0x65   : > { %v568_v58 = vsel %vm511_vm0, %v1356_v3, 0.0  ;;  %v514_v53 = vrot.slane %v513_v45, 4  ;;  %v522_v37 = vrot.slane %v521_v46, 4  ;;  %v530_v54 = vrot.slane %v529_v25, 4 }
  0x66   : > { %v538_v38 = vrot.slane %v537_v47, 4  ;;  %v545_v48 = vadd.f32 %v544_v50, %v1299_v39  ;;  %v553_v49 = vadd.f32 %v552_v56, %v1302_v40  ;;  %v561_v62 = vadd.f32 %v560_v57, %v1324_v51 }
  0x67   : > { %v569_v0 = vadd.f32 %v568_v58, %v1340_v59  ;;  %v515_v4 = vadd.f32 %v514_v53, %v513_v45  ;;  %v523_v1 = vadd.f32 %v522_v37, %v521_v46  ;;  %v531_v5 = vadd.f32 %v530_v54, %v529_v25 }
  0x68   : > { %v539_v7 = vadd.f32 %v538_v38, %v537_v47  ;;  %v546_v2 = vrot.slane %v545_v48, 4  ;;  %v554_v14 = vrot.slane %v553_v49, 4  ;;  %v562_v29 = vrot.slane %v561_v62, 4 }
  0x69   : > { %v570_v3 = vrot.slane %v569_v0, 4  ;;  %v516_v34 = vrot.slane %v515_v4, 2  ;;  %v524_v35 = vrot.slane %v523_v1, 2  ;;  %v532_v36 = vrot.slane %v531_v5, 2 }
  0x6a   : > { %v540_v55 = vrot.slane %v539_v7, 2  ;;  %v547_v44 = vadd.f32 %v546_v2, %v545_v48  ;;  %v555_v39 = vadd.f32 %v554_v14, %v553_v49  ;;  %v563_v50 = vadd.f32 %v562_v29, %v561_v62 }
  0x6b   : > { %v571_v40 = vadd.f32 %v570_v3, %v569_v0  ;;  %v517_v56 = vadd.f32 %v516_v34, %v515_v4  ;;  %v525_v51 = vadd.f32 %v524_v35, %v523_v1  ;;  %v533_v57 = vadd.f32 %v532_v36, %v531_v5 }
  0x6c   : > { %v541_v59 = vadd.f32 %v540_v55, %v539_v7  ;;  %v548_v45 = vrot.slane %v547_v44, 2  ;;  %v556_v46 = vrot.slane %v555_v39, 2  ;;  %v564_v25 = vrot.slane %v563_v50, 2 }
  0x6d   : > { %v572_v47 = vrot.slane %v571_v40, 2  ;;  %v518_v58 = vrot.slane %v517_v56, 1  ;;  %v526_v53 = vrot.slane %v525_v51, 1  ;;  %v534_v37 = vrot.slane %v533_v57, 1 }
  0x6e   : > { %v542_v54 = vrot.slane %v541_v59, 1  ;;  %v549_v38 = vadd.f32 %v548_v45, %v547_v44  ;;  %v557_v43 = vadd.f32 %v556_v46, %v555_v39  ;;  %v565_v42 = vadd.f32 %v564_v25, %v563_v50 }
  0x6f   : > { %v573_v28 = vadd.f32 %v572_v47, %v571_v40  ;;  %v1554_v48 = vadd.f32 %v518_v58, %v517_v56  ;;  %v1556_v49 = vadd.f32 %v526_v53, %v525_v51  ;;  %v1558_v62 = vadd.f32 %v534_v37, %v533_v57  ;;  %v1782_v40 = vld [vmem:[#allocation4_spill] sm:$0xff]  ;;  %v1783_v56 = vld [vmem:[#allocation5_spill] sm:$0xff]  ;;  %v1784_v51 = vld [vmem:[#allocation6_spill] sm:$0xff] }
  0x70   : > { %v1560_v0 = vadd.f32 %v542_v54, %v541_v59  ;;  %v550_v55 = vrot.slane %v549_v38, 1  ;;  %v558_v4 = vrot.slane %v557_v43, 1  ;;  %v566_v1 = vrot.slane %v565_v42, 1 }
  0x71   : > { %v574_v5 = vrot.slane %v573_v28, 1  ;;  %v576_v7 = vsel %vm511_vm0, %v1378_v15, 0.0  ;;  %v584_v44 = vsel %vm511_vm0, %v1381_v16, 0.0  ;;  %v592_v2 = vsel %vm511_vm0, %v1384_v17, 0.0 }
  0x72   : > { %v600_v14 = vsel %vm511_vm0, %v1387_v18, 0.0  ;;  %v1570_v29 = vadd.f32 %v550_v55, %v549_v38  ;;  %v1572_v3 = vadd.f32 %v558_v4, %v557_v43  ;;  %v1574_v34 = vadd.f32 %v566_v1, %v565_v42 }
  0x73   : > { %v1576_v35 = vadd.f32 %v574_v5, %v573_v28  ;;  %v577_v36 = vadd.f32 %v576_v7, %v1363_v8  ;;  %v585_v15 = vadd.f32 %v584_v44, %v1366_v9  ;;  %v593_v16 = vadd.f32 %v592_v2, %v1369_v10 }
  0x74   : > { %v601_v39 = vadd.f32 %v600_v14, %v1372_v11  ;;  %v608_v17 = vsel %vm511_vm0, %v1408_v31, 0.0  ;;  %v616_v18 = vsel %vm511_vm0, %v1411_v32, 0.0  ;;  %v624_v42 = vsel %vm511_vm0, %v1414_v33, 0.0  ;;  %v1785_v31 = vld [vmem:[#allocation7_spill] sm:$0xff] }
  0x75   : > { %v632_v43 = vsel %vm511_vm0, %v1417_v41, 0.0  ;;  %v578_v28 = vrot.slane %v577_v36, 4  ;;  %v586_v8 = vrot.slane %v585_v15, 4  ;;  %v594_v50 = vrot.slane %v593_v16, 4 }
  0x76   : > { %v602_v9 = vrot.slane %v601_v39, 4  ;;  %v609_v10 = vadd.f32 %v608_v17, %v1782_v40  ;;  %v617_v11 = vadd.f32 %v616_v18, %v1783_v56  ;;  %v625_v57 = vadd.f32 %v624_v42, %v1784_v51 }
  0x77   : > { %v633_v59 = vadd.f32 %v632_v43, %v1785_v31  ;;  %v579_v45 = vadd.f32 %v578_v28, %v577_v36  ;;  %v587_v32 = vadd.f32 %v586_v8, %v585_v15  ;;  %v595_v46 = vadd.f32 %v594_v50, %v593_v16 }
  0x78   : > { %v603_v25 = vadd.f32 %v602_v9, %v601_v39  ;;  %v610_v33 = vrot.slane %v609_v10, 4  ;;  %v618_v47 = vrot.slane %v617_v11, 4  ;;  %v626_v58 = vrot.slane %v625_v57, 4 }
  0x79   : > { %v634_v41 = vrot.slane %v633_v59, 4  ;;  %v580_v53 = vrot.slane %v579_v45, 2  ;;  %v588_v37 = vrot.slane %v587_v32, 2  ;;  %v596_v54 = vrot.slane %v595_v46, 2 }
  0x7a   : > { %v604_v38 = vrot.slane %v603_v25, 2  ;;  %v611_v55 = vadd.f32 %v610_v33, %v609_v10  ;;  %v619_v4 = vadd.f32 %v618_v47, %v617_v11  ;;  %v627_v1 = vadd.f32 %v626_v58, %v625_v57  ;;  %v1788_v47 = vld [vmem:[#allocation14_spill] sm:$0xff] }
  0x7b   : > { %v635_v5 = vadd.f32 %v634_v41, %v633_v59  ;;  %v581_v7 = vadd.f32 %v580_v53, %v579_v45  ;;  %v589_v44 = vadd.f32 %v588_v37, %v587_v32  ;;  %v597_v2 = vadd.f32 %v596_v54, %v595_v46  ;;  %v1786_v32 = vld [vmem:[#allocation12_spill] sm:$0xff] }
  0x7c   : > { %v605_v14 = vadd.f32 %v604_v38, %v603_v25  ;;  %v612_v36 = vrot.slane %v611_v55, 2  ;;  %v620_v15 = vrot.slane %v619_v4, 2  ;;  %v628_v16 = vrot.slane %v627_v1, 2  ;;  %v1787_v25 = vld [vmem:[#allocation13_spill] sm:$0xff]  ;;  %v1789_v38 = vld [vmem:[#allocation8_spill] sm:$0xff] }
  0x7d   : > { %v636_v39 = vrot.slane %v635_v5, 2  ;;  %v582_v17 = vrot.slane %v581_v7, 1  ;;  %v590_v18 = vrot.slane %v589_v44, 1  ;;  %v598_v42 = vrot.slane %v597_v2, 1 }
  0x7e   : > { %v606_v43 = vrot.slane %v605_v14, 1  ;;  %v613_v28 = vadd.f32 %v612_v36, %v611_v55  ;;  %v621_v8 = vadd.f32 %v620_v15, %v619_v4  ;;  %v629_v50 = vadd.f32 %v628_v16, %v627_v1  ;;  %v1791_v1 = vld [vmem:[#allocation10_spill] sm:$0xff] }
  0x7f   : > { %v637_v9 = vadd.f32 %v636_v39, %v635_v5  ;;  %v1594_v40 = vadd.f32 %v582_v17, %v581_v7  ;;  %v1596_v10 = vadd.f32 %v590_v18, %v589_v44  ;;  %v1598_v56 = vadd.f32 %v598_v42, %v597_v2  ;;  %v1792_v7 = vld [vmem:[#allocation11_spill] sm:$0xff] }
  0x80   : > { %v1600_v11 = vadd.f32 %v606_v43, %v605_v14  ;;  %v614_v51 = vrot.slane %v613_v28, 1  ;;  %v622_v57 = vrot.slane %v621_v8, 1  ;;  %v630_v31 = vrot.slane %v629_v50, 1  ;;  %v1793_v42 = vld [vmem:[#allocation15_spill] sm:$0xff] }
  0x81   : > { %v638_v59 = vrot.slane %v637_v9, 1  ;;  %v640_v45 = vsel %vm511_vm0, %v1438_v22, 0.0  ;;  %v648_v46 = vsel %vm511_vm0, %v1786_v32, 0.0  ;;  %v656_v33 = vsel %vm511_vm0, %v1787_v25, 0.0  ;;  %v1790_v22 = vld [vmem:[#allocation9_spill] sm:$0xff] }
  0x82   : > { %v664_v58 = vsel %vm511_vm0, %v1788_v47, 0.0  ;;  %v1610_v41 = vadd.f32 %v614_v51, %v613_v28  ;;  %v1612_v53 = vadd.f32 %v622_v57, %v621_v8  ;;  %v1614_v37 = vadd.f32 %v630_v31, %v629_v50  ;;  %v1794_v28 = vld [vmem:[#allocation16_spill] sm:$0xff]  ;;  %v1795_v50 = vld [vmem:[#allocation17_spill] sm:$0xff] }
  0x83   : > { %v1616_v54 = vadd.f32 %v638_v59, %v637_v9  ;;  %v641_v55 = vadd.f32 %v640_v45, %v1789_v38  ;;  %v649_v4 = vadd.f32 %v648_v46, %v1790_v22  ;;  %v657_v5 = vadd.f32 %v656_v33, %v1791_v1 }
  0x84   : > { %v665_v44 = vadd.f32 %v664_v58, %v1792_v7  ;;  %v672_v2 = vsel %vm511_vm0, %v1468_v61, 0.0  ;;  %v680_v14 = vsel %vm511_vm0, %v1471_v60, 0.0  ;;  %v688_v36 = vsel %vm511_vm0, %v1474_v12, 0.0  ;;  %v1796_v61 = vld [vmem:[#allocation18_spill] sm:$0xff] }
  0x85   : > { %v696_v15 = vsel %vm511_vm0, %v1477_v13, 0.0  ;;  %v642_v16 = vrot.slane %v641_v55, 4  ;;  %v650_v39 = vrot.slane %v649_v4, 4  ;;  %v658_v17 = vrot.slane %v657_v5, 4 }
  0x86   : > { %v666_v18 = vrot.slane %v665_v44, 4  ;;  %v673_v43 = vadd.f32 %v672_v2, %v1793_v42  ;;  %v681_v8 = vadd.f32 %v680_v14, %v1794_v28  ;;  %v689_v9 = vadd.f32 %v688_v36, %v1795_v50 }
  0x87   : > { %v697_v51 = vadd.f32 %v696_v15, %v1796_v61  ;;  %v643_v57 = vadd.f32 %v642_v16, %v641_v55  ;;  %v651_v60 = vadd.f32 %v650_v39, %v649_v4  ;;  %v659_v31 = vadd.f32 %v658_v17, %v657_v5 }
  0x88   : > { %v667_v59 = vadd.f32 %v666_v18, %v665_v44  ;;  %v674_v12 = vrot.slane %v673_v43, 4  ;;  %v682_v45 = vrot.slane %v681_v8, 4  ;;  %v690_v32 = vrot.slane %v689_v9, 4 }
  0x89   : > { %v698_v13 = vrot.slane %v697_v51, 4  ;;  %v644_v46 = vrot.slane %v643_v57, 2  ;;  %v652_v25 = vrot.slane %v651_v60, 2  ;;  %v660_v33 = vrot.slane %v659_v31, 2 }
  0x8a   : > { %v668_v47 = vrot.slane %v667_v59, 2  ;;  %v675_v58 = vadd.f32 %v674_v12, %v673_v43  ;;  %v683_v38 = vadd.f32 %v682_v45, %v681_v8  ;;  %v691_v22 = vadd.f32 %v690_v32, %v689_v9 }
  0x8b   : > { %v699_v1 = vadd.f32 %v698_v13, %v697_v51  ;;  %v645_v7 = vadd.f32 %v644_v46, %v643_v57  ;;  %v653_v2 = vadd.f32 %v652_v25, %v651_v60  ;;  %v661_v14 = vadd.f32 %v660_v33, %v659_v31 }
  0x8c   : > { %v669_v36 = vadd.f32 %v668_v47, %v667_v59  ;;  %v676_v55 = vrot.slane %v675_v58, 2  ;;  %v684_v4 = vrot.slane %v683_v38, 2  ;;  %v692_v5 = vrot.slane %v691_v22, 2 }
  0x8d   : > { %v700_v44 = vrot.slane %v699_v1, 2  ;;  %v646_v15 = vrot.slane %v645_v7, 1  ;;  %v654_v16 = vrot.slane %v653_v2, 1  ;;  %v662_v39 = vrot.slane %v661_v14, 1 }
  0x8e   : > { %v670_v17 = vrot.slane %v669_v36, 1  ;;  %v677_v18 = vadd.f32 %v676_v55, %v675_v58  ;;  %v685_v42 = vadd.f32 %v684_v4, %v683_v38  ;;  %v693_v28 = vadd.f32 %v692_v5, %v691_v22  ;;  %v1797_v22 = vld [vmem:[#allocation23_spill] sm:$0xff]  ;;  %v1800_v55 = vld [vmem:[#allocation21_spill] sm:$0xff]  ;;  %v1801_v4 = vld [vmem:[#allocation22_spill] sm:$0xff] }
  0x8f   : > { %v701_v50 = vadd.f32 %v700_v44, %v699_v1  ;;  %v1634_v43 = vadd.f32 %v646_v15, %v645_v7  ;;  %v1636_v8 = vadd.f32 %v654_v16, %v653_v2  ;;  %v1638_v9 = vadd.f32 %v662_v39, %v661_v14 }
  0x90   : > { %v1640_v61 = vadd.f32 %v670_v17, %v669_v36  ;;  %v678_v51 = vrot.slane %v677_v18, 1  ;;  %v686_v57 = vrot.slane %v685_v42, 1  ;;  %v694_v60 = vrot.slane %v693_v28, 1 }
  0x91   : > { %v702_v31 = vrot.slane %v701_v50, 1  ;;  %v704_v59 = vsel %vm511_vm0, %v1495_v26, 0.0  ;;  %v712_v12 = vsel %vm511_vm0, %v1498_v27, 0.0  ;;  %v720_v45 = vsel %vm511_vm0, %v1501_v52, 0.0 }
  0x92   : > { %v728_v32 = vsel %vm511_vm0, %v1504_v30, 0.0  ;;  %v1650_v13 = vadd.f32 %v678_v51, %v677_v18  ;;  %v1652_v46 = vadd.f32 %v686_v57, %v685_v42  ;;  %v1654_v25 = vadd.f32 %v694_v60, %v693_v28 }
  0x93   : > { %v1656_v33 = vadd.f32 %v702_v31, %v701_v50  ;;  %v705_v47 = vadd.f32 %v704_v59, %v1483_v19  ;;  %v713_v26 = vadd.f32 %v712_v12, %v1486_v6  ;;  %v721_v27 = vadd.f32 %v720_v45, %v1489_v20  ;;  %v1798_v20 = vld [vmem:[#allocation19_spill] sm:$0xff] }
  0x94   : > { %v729_v58 = vadd.f32 %v728_v32, %v1492_v21  ;;  %v736_v52 = vsel %vm511_vm0, %v1519_v24, 0.0  ;;  %v744_v30 = vsel %vm511_vm0, %v1522_v23, 0.0  ;;  %v752_v38 = vsel %vm511_vm0, %v1525_v63, 0.0  ;;  %v1799_v21 = vld [vmem:[#allocation20_spill] sm:$0xff] }
  0x95   : > { %v760_v1 = vsel %vm511_vm0, %v1797_v22, 0.0  ;;  %v706_v19 = vrot.slane %v705_v47, 4  ;;  %v714_v7 = vrot.slane %v713_v26, 4  ;;  %v722_v6 = vrot.slane %v721_v27, 4 }
  0x96   : > { %v730_v2 = vrot.slane %v729_v58, 4  ;;  %v737_v14 = vadd.f32 %v736_v52, %v1798_v20  ;;  %v745_v36 = vadd.f32 %v744_v30, %v1799_v21  ;;  %v753_v24 = vadd.f32 %v752_v38, %v1800_v55 }
  0x97   : > { %v761_v5 = vadd.f32 %v760_v1, %v1801_v4  ;;  %v707_v23 = vadd.f32 %v706_v19, %v705_v47  ;;  %v715_v44 = vadd.f32 %v714_v7, %v713_v26  ;;  %v723_v15 = vadd.f32 %v722_v6, %v721_v27 }
  0x98   : > { %v731_v63 = vadd.f32 %v730_v2, %v729_v58  ;;  %v738_v16 = vrot.slane %v737_v14, 4  ;;  %v746_v39 = vrot.slane %v745_v36, 4  ;;  %v754_v17 = vrot.slane %v753_v24, 4 }
  0x99   : > { %v762_v18 = vrot.slane %v761_v5, 4  ;;  %v708_v42 = vrot.slane %v707_v23, 2  ;;  %v716_v28 = vrot.slane %v715_v44, 2  ;;  %v724_v50 = vrot.slane %v723_v15, 2 }
  0x9a   : > { %v732_v51 = vrot.slane %v731_v63, 2  ;;  %v739_v57 = vadd.f32 %v738_v16, %v737_v14  ;;  %v747_v60 = vadd.f32 %v746_v39, %v745_v36  ;;  %v755_v31 = vadd.f32 %v754_v17, %v753_v24 }
  0x9b   : > { %v763_v59 = vadd.f32 %v762_v18, %v761_v5  ;;  %v709_v12 = vadd.f32 %v708_v42, %v707_v23  ;;  %v717_v45 = vadd.f32 %v716_v28, %v715_v44  ;;  %v725_v32 = vadd.f32 %v724_v50, %v723_v15 }
  0x9c   : > { %v733_v47 = vadd.f32 %v732_v51, %v731_v63  ;;  %v740_v26 = vrot.slane %v739_v57, 2  ;;  %v748_v27 = vrot.slane %v747_v60, 2  ;;  %v756_v58 = vrot.slane %v755_v31, 2 }
  0x9d   : > { %v764_v52 = vrot.slane %v763_v59, 2  ;;  %v710_v30 = vrot.slane %v709_v12, 1  ;;  %v718_v38 = vrot.slane %v717_v45, 1  ;;  %v726_v22 = vrot.slane %v725_v32, 1 }
  0x9e   : > { %v734_v1 = vrot.slane %v733_v47, 1  ;;  %v741_v19 = vadd.f32 %v740_v26, %v739_v57  ;;  %v749_v7 = vadd.f32 %v748_v27, %v747_v60  ;;  %v757_v6 = vadd.f32 %v756_v58, %v755_v31 }
  0x9f   : > { %v765_v2 = vadd.f32 %v764_v52, %v763_v59  ;;  %v711_v20 = vadd.f32 %v710_v30, %v709_v12  ;;  %v719_v14 = vadd.f32 %v718_v38, %v717_v45  ;;  %v727_v21 = vadd.f32 %v726_v22, %v725_v32 }
  0xa0   : > { %v735_v36 = vadd.f32 %v734_v1, %v733_v47  ;;  %v742_v55 = vrot.slane %v741_v19, 1  ;;  %v750_v24 = vrot.slane %v749_v7, 1  ;;  %v758_v4 = vrot.slane %v757_v6, 1 }
  0xa1   : > { %v766_v5 = vrot.slane %v765_v2, 1  ;;  %v801_v23 = vsel %vm800_vm1, %v1570_v29, %v1554_v48  ;;  %v814_v44 = vsel %vm800_vm1, %v1572_v3, %v1556_v49  ;;  %v821_v15 = vsel %vm800_vm1, %v1574_v34, %v1558_v62 }
  0xa2   : > { %v828_v63 = vsel %vm800_vm1, %v1576_v35, %v1560_v0  ;;  %v743_v16 = vadd.f32 %v742_v55, %v741_v19  ;;  %v751_v39 = vadd.f32 %v750_v24, %v749_v7  ;;  %v759_v17 = vadd.f32 %v758_v4, %v757_v6 }
  0xa3   : > { %v767_v18 = vadd.f32 %v766_v5, %v765_v2  ;;  %v803_v48 = vsel %vm802_vm2, %v1594_v40, %v801_v23  ;;  %v815_v29 = vsel %vm802_vm2, %v1596_v10, %v814_v44  ;;  %v822_v49 = vsel %vm802_vm2, %v1598_v56, %v821_v15 }
  0xa4   : > { %v829_v62 = vsel %vm802_vm2, %v1600_v11, %v828_v63  ;;  %v805_v0 = vsel %vm804_vm3, %v1610_v41, %v803_v48  ;;  %v816_v3 = vsel %vm804_vm3, %v1612_v53, %v815_v29  ;;  %v823_v34 = vsel %vm804_vm3, %v1614_v37, %v822_v49 }
  0xa5   : > { %v830_v35 = vsel %vm804_vm3, %v1616_v54, %v829_v62  ;;  %v807_v40 = vsel %vm806_vm4, %v1634_v43, %v805_v0  ;;  %v817_v10 = vsel %vm806_vm4, %v1636_v8, %v816_v3  ;;  %v824_v56 = vsel %vm806_vm4, %v1638_v9, %v823_v34 }
  0xa6   : > { %v831_v11 = vsel %vm806_vm4, %v1640_v61, %v830_v35  ;;  %v809_v41 = vsel %vm808_vm5, %v1650_v13, %v807_v40  ;;  %v818_v53 = vsel %vm808_vm5, %v1652_v46, %v817_v10  ;;  %v825_v37 = vsel %vm808_vm5, %v1654_v25, %v824_v56 }
  0xa7   : > { %v832_v54 = vsel %vm808_vm5, %v1656_v33, %v831_v11  ;;  %v811_v43 = vsel %vm810_vm6, %v711_v20, %v809_v41  ;;  %v819_v8 = vsel %vm810_vm6, %v719_v14, %v818_v53  ;;  %v826_v9 = vsel %vm810_vm6, %v727_v21, %v825_v37 }
  0xa8   : > { %v833_v61 = vsel %vm810_vm6, %v735_v36, %v832_v54  ;;  %v813_v42 = vsel %vm812_vm7, %v743_v16, %v811_v43  ;;  %v820_v13 = vsel %vm812_vm7, %v751_v39, %v819_v8  ;;  %v827_v46 = vsel %vm812_vm7, %v759_v17, %v826_v9 }
  0xa9   : > { %v834_v28 = vsel %vm812_vm7, %v767_v18, %v833_v61  ;;  %839 = vst [vmem:[%s373_s20] sm:$0xff] %v813_v42  ;;  %840 = vst [vmem:[%s373_s20 + $0x8] sm:$0xff] %v820_v13 }
  0xaa   : > { %841 = vst [vmem:[%s373_s20 + $0x10] sm:$0xff] %v827_v46  ;;  %842 = vst [vmem:[%s373_s20 + $0x18] sm:$0xff] %v834_v28 }
  0xab PF: > { %s12_s13 = sadd.s32 1, %s1048_s13   ;;  %s1803_s9 = smov %s1036_s10 }
  0xac   : > { %p9_p10 = scmp.ge.s32.totalorder %s12_s13, 4   ;;  %s1804_s10 = smov %s1104_s18 }
  0xad   : > { %s1805_s11 = smov %s1044_s12  ;;  %s1806_s12 = smov %s1808_s14 }
  0xae   :  { %11 = sbr.rel (!%p9_p10) target bundleno = 3 (0x3), region = 117 }

</bundles_post_ra>
